<compile_context>
chip_gen: v5e
topology: v5e:2x2
jax: 0.10.0
libtpu: 0.0.40
codegen_flags: <defaults>
</compile_context>

<pallas_src>
import math

import jax
import jax.numpy as jnp
from jax import lax
from jax.experimental import pallas as pl
from jax.experimental.pallas import tpu as pltpu

# ----- small config (consistent with KRLawGPT / myGPTConfig, scaled down) -----
B = 4            # batch
T = 32           # sequence length (<= block_size)
VOCAB = 512      # vocab_size
BLOCK_SIZE = 64  # block_size (positional table length)
N_LAYER = 2
N_HEAD = 4
N_EMBD = 128
HEAD_DIM = N_EMBD // N_HEAD

NB = 2                   # parallel batch blocks (grid axis 0, megacore-friendly)
B_BLK = B // NB          # batches per block
ROWS = B_BLK * T         # activation rows handled per grid step

EPS = 1e-5
GELU_K = math.sqrt(2.0 / math.pi)


# ----------------------------- kernel helpers --------------------------------
def _layer_norm(x, w):
    # torch.nn.functional.layer_norm over last dim, eps=1e-5, bias=None (f32)
    mean = jnp.mean(x, axis=-1, keepdims=True)
    var = jnp.mean((x - mean) ** 2, axis=-1, keepdims=True)
    return (x - mean) * lax.rsqrt(var + EPS) * w


def _my_gelu(x):
    # myGelu: 0.5*x*(1+tanh(sqrt(2/pi)*(x+0.044715*x^3)))   (f32)
    return 0.5 * x * (1.0 + jnp.tanh(GELU_K * (x + 0.044715 * x * x * x)))


# -------------------------- fused transformer kernel --------------------------
def gpt_kernel(x0_ref, ln1w_ref, wq_ref, wk_ref, wv_ref, wproj_ref, ln2w_ref,
               wfc_ref, wfcp_ref, lnfw_ref, wteT_ref,
               logits_ref, x_sc):
    l = pl.program_id(1)                                   # layer axis (arbitrary)

    # Load this batch-block's embedding slab into the resident VMEM scratch once
    @pl.when(l == 0)
    def _():
        x_sc[...] = x0_ref[...]

    x = x_sc[...]                                          # (ROWS, C) f32

    # ---------------- attention branch: x + attn(ln_1(x)) ----------------
    h = _layer_norm(x, ln1w_ref[0]).astype(jnp.bfloat16)   # (ROWS, C)
    hb = jnp.broadcast_to(h[None, :, :], (N_HEAD, ROWS, N_EMBD))   # (H, ROWS, C)

    # Head-batched QKV projections (1/sqrt(hd) already folded into wq).
    q = jnp.einsum('hrc,hcd->hrd', hb, wq_ref[0],
                   preferred_element_type=jnp.float32)     # (H, ROWS, hd)
    k = jnp.einsum('hrc,hcd->hrd', hb, wk_ref[0],
                   preferred_element_type=jnp.float32)
    v = jnp.einsum('hrc,hcd->hrd', hb, wv_ref[0],
                   preferred_element_type=jnp.float32)

    # (H, ROWS, hd) -> (H*B_BLK, T, hd): pure leading-dim reshape (rows are
    # (batch, time) ordered), no relayout.
    q = q.reshape(N_HEAD * B_BLK, T, HEAD_DIM).astype(jnp.bfloat16)
    k = k.reshape(N_HEAD * B_BLK, T, HEAD_DIM).astype(jnp.bfloat16)
    v = v.reshape(N_HEAD * B_BLK, T, HEAD_DIM).astype(jnp.bfloat16)

    row = lax.broadcasted_iota(jnp.int32, (T, T), 0)
    col = lax.broadcasted_iota(jnp.int32, (T, T), 1)
    causal = (row >= col)[None, :, :]                      # (1, T, T)
    neg_big = jnp.float32(-1e30)

    s = jnp.einsum('bqd,bkd->bqk', q, k,
                   preferred_element_type=jnp.float32)     # (H*B_BLK, T, T) f32
    s = jnp.where(causal, s, neg_big)
    s = s - jnp.max(s, axis=-1, keepdims=True)
    p = jnp.exp(s)
    p = p * pl.reciprocal(jnp.sum(p, axis=-1, keepdims=True), approx=True)

    o = jnp.einsum('bqk,bkd->bqd', p.astype(jnp.bfloat16), v,
                   preferred_element_type=jnp.float32)     # (H*B_BLK, T, hd)
    o = o.reshape(N_HEAD, ROWS, HEAD_DIM).astype(jnp.bfloat16)

    # Head merge folded into c_proj:  concat_h(o) @ Wproj  ==  sum_h o_h @ Wproj_h
    attn = jnp.einsum('hrd,hdc->hrc', o, wproj_ref[0],
                      preferred_element_type=jnp.float32)  # (H, ROWS, C)
    attn = jnp.sum(attn, axis=0)                           # (ROWS, C)
    x = x + attn

    # ---------------- MLP branch: x + mlp(ln_2(x)) ----------------
    h2 = _layer_norm(x, ln2w_ref[0]).astype(jnp.bfloat16)
    f = jnp.dot(h2, wfc_ref[0], preferred_element_type=jnp.float32)   # (ROWS, 4C)
    f = _my_gelu(f).astype(jnp.bfloat16)
    f = jnp.dot(f, wfcp_ref[0], preferred_element_type=jnp.float32)   # (ROWS, C)
    x = x + f
    x_sc[...] = x

    # ---- last layer: ln_f + tied lm_head on the last token of each sequence ----
    @pl.when(l == pl.num_programs(1) - 1)
    def _():
        # strided read: rows T-1, 2T-1, ... (last token per sequence in block)
        x_last = x_sc[pl.ds(T - 1, B_BLK, stride=T), :]                 # (B_BLK, C)
        hf = _layer_norm(x_last, lnfw_ref[...]).astype(jnp.bfloat16)
        # logits = hf @ wte.T ; wte_T is pre-transposed host-side (no vxpose here)
        logits_ref[0] = jnp.dot(hf, wteT_ref[...],
                                preferred_element_type=jnp.float32)     # (B_BLK, V)


# ----------------------------- pallas_call wrapper -----------------------------
def run_model(x2d, params):
    args = (x2d,
            params["ln1_w"], params["w_q"], params["w_k"], params["w_v"],
            params["w_proj_h"], params["ln2_w"], params["w_fc"],
            params["w_fc_proj"], params["ln_f_w"], params["wte_t"])

    layer4 = lambda bb, l: (l, 0, 0, 0)
    layer3 = lambda bb, l: (l, 0, 0)
    const2 = lambda bb, l: (0, 0)

    in_specs = [
        pl.BlockSpec((ROWS, N_EMBD), lambda bb, l: (bb, 0)),                      # x0
        pl.BlockSpec((1, 1, N_EMBD), layer3),                                     # ln1_w
        pl.BlockSpec((1, N_HEAD, N_EMBD, HEAD_DIM), layer4),                      # w_q
        pl.BlockSpec((1, N_HEAD, N_EMBD, HEAD_DIM), layer4),                      # w_k
        pl.BlockSpec((1, N_HEAD, N_EMBD, HEAD_DIM), layer4),                      # w_v
        pl.BlockSpec((1, N_HEAD, HEAD_DIM, N_EMBD), layer4),                      # w_proj_h
        pl.BlockSpec((1, 1, N_EMBD), layer3),                                     # ln2_w
        pl.BlockSpec((1, N_EMBD, 4 * N_EMBD), layer3),                            # w_fc
        pl.BlockSpec((1, 4 * N_EMBD, N_EMBD), layer3),                            # w_fc_proj
        pl.BlockSpec((1, N_EMBD), const2),                                        # ln_f_w
        pl.BlockSpec((N_EMBD, VOCAB), const2),                                    # wte_t
    ]

    out = pl.pallas_call(
        gpt_kernel,
        out_shape=jax.ShapeDtypeStruct((NB, B_BLK, VOCAB), jnp.float32),
        grid=(NB, N_LAYER),                       # (batch-block, layer)
        in_specs=in_specs,
        out_specs=pl.BlockSpec((1, B_BLK, VOCAB), lambda bb, l: (bb, 0, 0)),
        scratch_shapes=[pltpu.VMEM((ROWS, N_EMBD), jnp.float32)],
        compiler_params=pltpu.CompilerParams(
            # batch-block axis is independent (2nd TC on v7x); layer axis is
            # a sequential dependency chain.
            dimension_semantics=("parallel", "arbitrary")),
    )(*args)
    return out.reshape(B, VOCAB)


# ----------------------------- parameter init ---------------------------------
def init_params(key):
    keys = jax.random.split(key, 2 + 4 * N_LAYER)

    def normal(k, shape, std):
        return std * jax.random.normal(k, shape, dtype=jnp.float32)

    c_proj_std = 0.02 / math.sqrt(2 * N_LAYER)
    scale = 1.0 / math.sqrt(HEAD_DIM)

    wte = normal(keys[0], (VOCAB, N_EMBD), 0.02)          # tied with lm_head
    wpe = normal(keys[1], (BLOCK_SIZE, N_EMBD), 0.02)

    wq, wk, wv, wp, wfc, wfcp = [], [], [], [], [], []
    kk = 2
    for _ in range(N_LAYER):
        w_attn_t = normal(keys[kk + 0], (N_EMBD, 3 * N_EMBD), 0.02)   # c_attn.weight.T
        q_t = w_attn_t[:, 0 * N_EMBD:1 * N_EMBD].reshape(N_EMBD, N_HEAD, HEAD_DIM)
        k_t = w_attn_t[:, 1 * N_EMBD:2 * N_EMBD].reshape(N_EMBD, N_HEAD, HEAD_DIM)
        v_t = w_attn_t[:, 2 * N_EMBD:3 * N_EMBD].reshape(N_EMBD, N_HEAD, HEAD_DIM)
        # per-head weight slabs (H, C, hd); 1/sqrt(head_dim) folded into Q
        wq.append(jnp.transpose(q_t, (1, 0, 2)) * scale)
        wk.append(jnp.transpose(k_t, (1, 0, 2)))
        wv.append(jnp.transpose(v_t, (1, 0, 2)))

        w_proj_t = normal(keys[kk + 1], (N_EMBD, N_EMBD), c_proj_std)  # c_proj.weight.T
        wp.append(w_proj_t.reshape(N_HEAD, HEAD_DIM, N_EMBD))          # (H, hd, C)

        wfc.append(normal(keys[kk + 2], (N_EMBD, 4 * N_EMBD), 0.02))   # c_fc.weight.T
        wfcp.append(normal(keys[kk + 3], (4 * N_EMBD, N_EMBD), c_proj_std))
        kk += 4

    return {
        "wte": wte,                                    # f32 master (embedding gather)
        "wte_t": wte.T.astype(jnp.bfloat16),           # tied lm_head, pre-transposed (C, V)
        "wpe": wpe,
        "ln_f_w": jnp.ones((1, N_EMBD), jnp.float32),
        "ln1_w": jnp.ones((N_LAYER, 1, N_EMBD), jnp.float32),
        "ln2_w": jnp.ones((N_LAYER, 1, N_EMBD), jnp.float32),
        "w_q": jnp.stack(wq).astype(jnp.bfloat16),        # (L, H, C, hd)
        "w_k": jnp.stack(wk).astype(jnp.bfloat16),
        "w_v": jnp.stack(wv).astype(jnp.bfloat16),
        "w_proj_h": jnp.stack(wp).astype(jnp.bfloat16),   # (L, H, hd, C)
        "w_fc": jnp.stack(wfc).astype(jnp.bfloat16),      # (L, C, 4C)
        "w_fc_proj": jnp.stack(wfcp).astype(jnp.bfloat16),
    }


# ----------------------------- forward (glue + kernel) ------------------------
def krlawgpt_forward(idx, params):
    # idx: (B, T) int32 token ids; returns logits (B, 1, VOCAB), matching the
    # PyTorch forward with targets=None (loss is None).
    tok_emb = params["wte"][idx]                      # (B, T, C) gather (glue)
    pos_emb = params["wpe"][:T]                       # (T, C)
    x2d = (tok_emb + pos_emb[None, :, :]).reshape(B * T, N_EMBD).astype(jnp.float32)
    logits = run_model(x2d, params)                   # (B, VOCAB)
    return logits[:, None, :]                         # (B, 1, VOCAB)


# ------------------------------------ main -------------------------------------
if __name__ == "__main__":
    key = jax.random.PRNGKey(0)
    pkey, ikey = jax.random.split(key)
    params = init_params(pkey)
    idx = jax.random.randint(ikey, (B, T), 0, VOCAB, dtype=jnp.int32)

    logits = krlawgpt_forward(idx, params)
    logits = jax.block_until_ready(logits)
    assert logits.shape == (B, 1, VOCAB), logits.shape
    assert bool(jnp.all(jnp.isfinite(logits)))
    print("KERNEL_OK")
</pallas_src>

<mosaic_0001>
module attributes {stable_mosaic.version = 11 : i64} {
  func.func @gpt_kernel(%arg0: i32, %arg1: i32, %arg2: memref<64x128xf32, #tpu.memory_space<vmem>>, %arg3: memref<1x1x128xf32, #tpu.memory_space<vmem>>, %arg4: memref<1x4x128x32xbf16, #tpu.memory_space<vmem>>, %arg5: memref<1x4x128x32xbf16, #tpu.memory_space<vmem>>, %arg6: memref<1x4x128x32xbf16, #tpu.memory_space<vmem>>, %arg7: memref<1x4x32x128xbf16, #tpu.memory_space<vmem>>, %arg8: memref<1x1x128xf32, #tpu.memory_space<vmem>>, %arg9: memref<1x128x512xbf16, #tpu.memory_space<vmem>>, %arg10: memref<1x512x128xbf16, #tpu.memory_space<vmem>>, %arg11: memref<1x128xf32, #tpu.memory_space<vmem>>, %arg12: memref<128x512xbf16, #tpu.memory_space<vmem>>, %arg13: memref<1x2x512xf32, #tpu.memory_space<vmem>>, %arg14: memref<64x128xf32, #tpu.memory_space<vmem>>) attributes {dimension_semantics = [#tpu.dimension_semantics<parallel>, #tpu.dimension_semantics<arbitrary>], iteration_bounds = array<i64: 2, 2>, scalar_prefetch = 0 : i64, scratch_operands = 1 : i64, tpu.core_type = #tpu.core_type<tc>, window_params = [{transform_indices = @transform_0, window_bounds = array<i64: 64, 128>}, {transform_indices = @transform_1, window_bounds = array<i64: 1, 1, 128>}, {transform_indices = @transform_2, window_bounds = array<i64: 1, 4, 128, 32>}, {transform_indices = @transform_3, window_bounds = array<i64: 1, 4, 128, 32>}, {transform_indices = @transform_4, window_bounds = array<i64: 1, 4, 128, 32>}, {transform_indices = @transform_5, window_bounds = array<i64: 1, 4, 32, 128>}, {transform_indices = @transform_6, window_bounds = array<i64: 1, 1, 128>}, {transform_indices = @transform_7, window_bounds = array<i64: 1, 128, 512>}, {transform_indices = @transform_8, window_bounds = array<i64: 1, 512, 128>}, {pipeline_mode = #tpu.pipeline_mode<synchronous>, transform_indices = @transform_9, window_bounds = array<i64: 1, 128>}, {pipeline_mode = #tpu.pipeline_mode<synchronous>, transform_indices = @transform_10, window_bounds = array<i64: 128, 512>}, {transform_indices = @transform_11, window_bounds = array<i64: 1, 2, 512>}]} {
    %c0_i32 = arith.constant 0 : i32
    %0 = arith.cmpi eq, %arg1, %c0_i32 : i32
    %1 = arith.extui %0 : i1 to i32
    %c0_i32_0 = arith.constant 0 : i32
    %2 = arith.cmpi ne, %1, %c0_i32_0 : i32
    scf.if %2 {
      %c0_58 = arith.constant 0 : index
      %c0_59 = arith.constant 0 : index
      %121 = vector.load %arg2[%c0_58, %c0_59] : memref<64x128xf32, #tpu.memory_space<vmem>>, vector<64x128xf32>
      %c0_60 = arith.constant 0 : index
      %c0_61 = arith.constant 0 : index
      %122 = vector.load %arg14[%c0_60, %c0_61] : memref<64x128xf32, #tpu.memory_space<vmem>>, vector<64x128xf32>
      tpu.vector_store %arg14[%c0_60, %c0_61], %121 {strides = array<i32>} : memref<64x128xf32, #tpu.memory_space<vmem>>, vector<64x128xf32>,
    } else {
    }
    %c0 = arith.constant 0 : index
    %c0_1 = arith.constant 0 : index
    %3 = vector.load %arg14[%c0, %c0_1] : memref<64x128xf32, #tpu.memory_space<vmem>>, vector<64x128xf32>
    %c0_2 = arith.constant 0 : index
    %c0_3 = arith.constant 0 : index
    %c0_4 = arith.constant 0 : index
    %4 = vector.load %arg3[%c0_2, %c0_3, %c0_4] : memref<1x1x128xf32, #tpu.memory_space<vmem>>, vector<1x1x128xf32>
    %5 = vector.shape_cast %4 : vector<1x1x128xf32> to vector<1x128xf32>
    %cst = arith.constant dense<0.000000e+00> : vector<64xf32>
    %6 = vector.multi_reduction <add>, %3, %cst [1] : vector<64x128xf32> to vector<64xf32>
    %7 = vector.shape_cast %6 : vector<64xf32> to vector<64x1xf32>
    %cst_5 = arith.constant 1.280000e+02 : f32
    %8 = vector.broadcast %cst_5 : f32 to vector<64x1xf32>
    %9 = arith.divf %7, %8 : vector<64x1xf32>
    %10 = vector.broadcast %9 : vector<64x1xf32> to vector<64x128xf32>
    %11 = arith.subf %3, %10 : vector<64x128xf32>
    %12 = arith.mulf %11, %11 : vector<64x128xf32>
    %cst_6 = arith.constant dense<0.000000e+00> : vector<64xf32>
    %13 = vector.multi_reduction <add>, %12, %cst_6 [1] : vector<64x128xf32> to vector<64xf32>
    %14 = vector.shape_cast %13 : vector<64xf32> to vector<64x1xf32>
    %cst_7 = arith.constant 1.280000e+02 : f32
    %15 = vector.broadcast %cst_7 : f32 to vector<64x1xf32>
    %16 = arith.divf %14, %15 : vector<64x1xf32>
    %17 = vector.broadcast %9 : vector<64x1xf32> to vector<64x128xf32>
    %18 = arith.subf %3, %17 : vector<64x128xf32>
    %cst_8 = arith.constant 9.99999974E-6 : f32
    %19 = vector.broadcast %cst_8 : f32 to vector<64x1xf32>
    %20 = arith.addf %16, %19 : vector<64x1xf32>
    %21 = math.rsqrt %20 : vector<64x1xf32>
    %22 = vector.broadcast %21 : vector<64x1xf32> to vector<64x128xf32>
    %23 = arith.mulf %18, %22 : vector<64x128xf32>
    %24 = vector.broadcast %5 : vector<1x128xf32> to vector<64x128xf32>
    %25 = arith.mulf %23, %24 : vector<64x128xf32>
    %26 = arith.truncf %25 : vector<64x128xf32> to vector<64x128xbf16>
    %27 = vector.shape_cast %26 : vector<64x128xbf16> to vector<1x64x128xbf16>
    %28 = vector.shape_cast %27 : vector<1x64x128xbf16> to vector<1x64x128xbf16>
    %29 = vector.broadcast %28 : vector<1x64x128xbf16> to vector<4x64x128xbf16>
    %c0_9 = arith.constant 0 : index
    %c0_10 = arith.constant 0 : index
    %c0_11 = arith.constant 0 : index
    %c0_12 = arith.constant 0 : index
    %30 = vector.load %arg4[%c0_9, %c0_10, %c0_11, %c0_12] : memref<1x4x128x32xbf16, #tpu.memory_space<vmem>>, vector<1x4x128x32xbf16>
    %31 = vector.shape_cast %30 : vector<1x4x128x32xbf16> to vector<4x128x32xbf16>
    "tpu.trace_start"() <{level = 10 : i32, message = "hrc,hcd->hrd"}> : () -> ()
    %cst_13 = arith.constant dense<0.000000e+00> : vector<4x64x32xf32>
    %32 = tpu.matmul %29, %31, %cst_13 {dimension_numbers = #tpu.dot_dimension_numbers<[2], [1], [1], [2], [0, 0, 0, 1, 1, 2], [0], [0]>} : vector<4x64x128xbf16>, vector<4x128x32xbf16>, vector<4x64x32xf32> -> vector<4x64x32xf32>
    "tpu.trace_stop"() : () -> ()
    %c0_14 = arith.constant 0 : index
    %c0_15 = arith.constant 0 : index
    %c0_16 = arith.constant 0 : index
    %c0_17 = arith.constant 0 : index
    %33 = vector.load %arg5[%c0_14, %c0_15, %c0_16, %c0_17] : memref<1x4x128x32xbf16, #tpu.memory_space<vmem>>, vector<1x4x128x32xbf16>
    %34 = vector.shape_cast %33 : vector<1x4x128x32xbf16> to vector<4x128x32xbf16>
    "tpu.trace_start"() <{level = 10 : i32, message = "hrc,hcd->hrd"}> : () -> ()
    %cst_18 = arith.constant dense<0.000000e+00> : vector<4x64x32xf32>
    %35 = tpu.matmul %29, %34, %cst_18 {dimension_numbers = #tpu.dot_dimension_numbers<[2], [1], [1], [2], [0, 0, 0, 1, 1, 2], [0], [0]>} : vector<4x64x128xbf16>, vector<4x128x32xbf16>, vector<4x64x32xf32> -> vector<4x64x32xf32>
    "tpu.trace_stop"() : () -> ()
    %c0_19 = arith.constant 0 : index
    %c0_20 = arith.constant 0 : index
    %c0_21 = arith.constant 0 : index
    %c0_22 = arith.constant 0 : index
    %36 = vector.load %arg6[%c0_19, %c0_20, %c0_21, %c0_22] : memref<1x4x128x32xbf16, #tpu.memory_space<vmem>>, vector<1x4x128x32xbf16>
    %37 = vector.shape_cast %36 : vector<1x4x128x32xbf16> to vector<4x128x32xbf16>
    "tpu.trace_start"() <{level = 10 : i32, message = "hrc,hcd->hrd"}> : () -> ()
    %cst_23 = arith.constant dense<0.000000e+00> : vector<4x64x32xf32>
    %38 = tpu.matmul %29, %37, %cst_23 {dimension_numbers = #tpu.dot_dimension_numbers<[2], [1], [1], [2], [0, 0, 0, 1, 1, 2], [0], [0]>} : vector<4x64x128xbf16>, vector<4x128x32xbf16>, vector<4x64x32xf32> -> vector<4x64x32xf32>
    "tpu.trace_stop"() : () -> ()
    %39 = vector.shape_cast %32 : vector<4x64x32xf32> to vector<8x32x32xf32>
    %40 = arith.truncf %39 : vector<8x32x32xf32> to vector<8x32x32xbf16>
    %41 = vector.shape_cast %35 : vector<4x64x32xf32> to vector<8x32x32xf32>
    %42 = arith.truncf %41 : vector<8x32x32xf32> to vector<8x32x32xbf16>
    %43 = vector.shape_cast %38 : vector<4x64x32xf32> to vector<8x32x32xf32>
    %44 = arith.truncf %43 : vector<8x32x32xf32> to vector<8x32x32xbf16>
    %45 = tpu.iota {dimensions = array<i32: 0>} : vector<32x32xi32>
    %46 = tpu.iota {dimensions = array<i32: 1>} : vector<32x32xi32>
    %47 = arith.cmpi sge, %45, %46 : vector<32x32xi32>
    %48 = vector.shape_cast %47 : vector<32x32xi1> to vector<1x32x32xi1>
    "tpu.trace_start"() <{level = 10 : i32, message = "bqd,bkd->bqk"}> : () -> ()
    %cst_24 = arith.constant dense<0.000000e+00> : vector<8x32x32xf32>
    %49 = tpu.matmul %40, %42, %cst_24 {dimension_numbers = #tpu.dot_dimension_numbers<[2], [2], [1], [1], [0, 0, 0, 1, 1, 1], [0], [0]>} : vector<8x32x32xbf16>, vector<8x32x32xbf16>, vector<8x32x32xf32> -> vector<8x32x32xf32>
    %cst_25 = arith.constant -1.000000e+30 : f32
    "tpu.trace_stop"() : () -> ()
    %50 = vector.shape_cast %48 : vector<1x32x32xi1> to vector<1x32x32xi1>
    %51 = vector.broadcast %50 : vector<1x32x32xi1> to vector<8x32x32xi1>
    %52 = vector.broadcast %cst_25 : f32 to vector<8x32x32xf32>
    %53 = arith.select %51, %49, %52 : vector<8x32x32xi1>, vector<8x32x32xf32>
    %cst_26 = arith.constant dense<0xFF800000> : vector<8x32xf32>
    %54 = vector.multi_reduction <maximumf>, %53, %cst_26 [2] : vector<8x32x32xf32> to vector<8x32xf32>
    %55 = vector.shape_cast %54 : vector<8x32xf32> to vector<8x32x1xf32>
    %56 = vector.broadcast %55 : vector<8x32x1xf32> to vector<8x32x32xf32>
    %57 = arith.subf %53, %56 : vector<8x32x32xf32>
    %58 = math.exp %57 : vector<8x32x32xf32>
    %cst_27 = arith.constant dense<0.000000e+00> : vector<8x32xf32>
    %59 = vector.multi_reduction <add>, %58, %cst_27 [2] : vector<8x32x32xf32> to vector<8x32xf32>
    %60 = vector.shape_cast %59 : vector<8x32xf32> to vector<8x32x1xf32>
    %61 = tpu.reciprocal %60 {approx = true} : vector<8x32x1xf32> -> vector<8x32x1xf32>
    %62 = vector.broadcast %61 : vector<8x32x1xf32> to vector<8x32x32xf32>
    %63 = arith.mulf %58, %62 : vector<8x32x32xf32>
    %64 = arith.truncf %63 : vector<8x32x32xf32> to vector<8x32x32xbf16>
    "tpu.trace_start"() <{level = 10 : i32, message = "bqk,bkd->bqd"}> : () -> ()
    %cst_28 = arith.constant dense<0.000000e+00> : vector<8x32x32xf32>
    %65 = tpu.matmul %64, %44, %cst_28 {dimension_numbers = #tpu.dot_dimension_numbers<[2], [1], [1], [2], [0, 0, 0, 1, 1, 2], [0], [0]>} : vector<8x32x32xbf16>, vector<8x32x32xbf16>, vector<8x32x32xf32> -> vector<8x32x32xf32>
    "tpu.trace_stop"() : () -> ()
    %66 = vector.shape_cast %65 : vector<8x32x32xf32> to vector<4x64x32xf32>
    %67 = arith.truncf %66 : vector<4x64x32xf32> to vector<4x64x32xbf16>
    %c0_29 = arith.constant 0 : index
    %c0_30 = arith.constant 0 : index
    %c0_31 = arith.constant 0 : index
    %c0_32 = arith.constant 0 : index
    %68 = vector.load %arg7[%c0_29, %c0_30, %c0_31, %c0_32] : memref<1x4x32x128xbf16, #tpu.memory_space<vmem>>, vector<1x4x32x128xbf16>
    %69 = vector.shape_cast %68 : vector<1x4x32x128xbf16> to vector<4x32x128xbf16>
    "tpu.trace_start"() <{level = 10 : i32, message = "hrd,hdc->hrc"}> : () -> ()
    %cst_33 = arith.constant dense<0.000000e+00> : vector<4x64x128xf32>
    %70 = tpu.matmul %67, %69, %cst_33 {dimension_numbers = #tpu.dot_dimension_numbers<[2], [1], [1], [2], [0, 0, 0, 1, 1, 2], [0], [0]>} : vector<4x64x32xbf16>, vector<4x32x128xbf16>, vector<4x64x128xf32> -> vector<4x64x128xf32>
    "tpu.trace_stop"() : () -> ()
    %cst_34 = arith.constant dense<0.000000e+00> : vector<64x128xf32>
    %71 = vector.multi_reduction <add>, %70, %cst_34 [0] : vector<4x64x128xf32> to vector<64x128xf32>
    %72 = arith.addf %3, %71 : vector<64x128xf32>
    %c0_35 = arith.constant 0 : index
    %c0_36 = arith.constant 0 : index
    %c0_37 = arith.constant 0 : index
    %73 = vector.load %arg8[%c0_35, %c0_36, %c0_37] : memref<1x1x128xf32, #tpu.memory_space<vmem>>, vector<1x1x128xf32>
    %74 = vector.shape_cast %73 : vector<1x1x128xf32> to vector<1x128xf32>
    %cst_38 = arith.constant dense<0.000000e+00> : vector<64xf32>
    %75 = vector.multi_reduction <add>, %72, %cst_38 [1] : vector<64x128xf32> to vector<64xf32>
    %76 = vector.shape_cast %75 : vector<64xf32> to vector<64x1xf32>
    %cst_39 = arith.constant 1.280000e+02 : f32
    %77 = vector.broadcast %cst_39 : f32 to vector<64x1xf32>
    %78 = arith.divf %76, %77 : vector<64x1xf32>
    %79 = vector.broadcast %78 : vector<64x1xf32> to vector<64x128xf32>
    %80 = arith.subf %72, %79 : vector<64x128xf32>
    %81 = arith.mulf %80, %80 : vector<64x128xf32>
    %cst_40 = arith.constant dense<0.000000e+00> : vector<64xf32>
    %82 = vector.multi_reduction <add>, %81, %cst_40 [1] : vector<64x128xf32> to vector<64xf32>
    %83 = vector.shape_cast %82 : vector<64xf32> to vector<64x1xf32>
    %cst_41 = arith.constant 1.280000e+02 : f32
    %84 = vector.broadcast %cst_41 : f32 to vector<64x1xf32>
    %85 = arith.divf %83, %84 : vector<64x1xf32>
    %86 = vector.broadcast %78 : vector<64x1xf32> to vector<64x128xf32>
    %87 = arith.subf %72, %86 : vector<64x128xf32>
    %cst_42 = arith.constant 9.99999974E-6 : f32
    %88 = vector.broadcast %cst_42 : f32 to vector<64x1xf32>
    %89 = arith.addf %85, %88 : vector<64x1xf32>
    %90 = math.rsqrt %89 : vector<64x1xf32>
    %91 = vector.broadcast %90 : vector<64x1xf32> to vector<64x128xf32>
    %92 = arith.mulf %87, %91 : vector<64x128xf32>
    %93 = vector.broadcast %74 : vector<1x128xf32> to vector<64x128xf32>
    %94 = arith.mulf %92, %93 : vector<64x128xf32>
    %95 = arith.truncf %94 : vector<64x128xf32> to vector<64x128xbf16>
    %c0_43 = arith.constant 0 : index
    %c0_44 = arith.constant 0 : index
    %c0_45 = arith.constant 0 : index
    %96 = vector.load %arg9[%c0_43, %c0_44, %c0_45] : memref<1x128x512xbf16, #tpu.memory_space<vmem>>, vector<1x128x512xbf16>
    %97 = vector.shape_cast %96 : vector<1x128x512xbf16> to vector<128x512xbf16>
    %cst_46 = arith.constant dense<0.000000e+00> : vector<64x512xf32>
    %98 = tpu.matmul %95, %97, %cst_46 {dimension_numbers = #tpu.dot_dimension_numbers<[1], [0], [0], [1], [0, 0, 1, 1], [], []>} : vector<64x128xbf16>, vector<128x512xbf16>, vector<64x512xf32> -> vector<64x512xf32>
    %cst_47 = arith.constant 5.000000e-01 : f32
    %99 = vector.broadcast %cst_47 : f32 to vector<64x512xf32>
    %100 = arith.mulf %99, %98 : vector<64x512xf32>
    %cst_48 = arith.constant 4.471500e-02 : f32
    %101 = vector.broadcast %cst_48 : f32 to vector<64x512xf32>
    %102 = arith.mulf %101, %98 : vector<64x512xf32>
    %103 = arith.mulf %102, %98 : vector<64x512xf32>
    %104 = arith.mulf %103, %98 : vector<64x512xf32>
    %105 = arith.addf %98, %104 : vector<64x512xf32>
    %cst_49 = arith.constant 0.797884583 : f32
    %106 = vector.broadcast %cst_49 : f32 to vector<64x512xf32>
    %107 = arith.mulf %106, %105 : vector<64x512xf32>
    %108 = math.tanh %107 : vector<64x512xf32>
    %cst_50 = arith.constant 1.000000e+00 : f32
    %109 = vector.broadcast %cst_50 : f32 to vector<64x512xf32>
    %110 = arith.addf %109, %108 : vector<64x512xf32>
    %111 = arith.mulf %100, %110 : vector<64x512xf32>
    %112 = arith.truncf %111 : vector<64x512xf32> to vector<64x512xbf16>
    %c0_51 = arith.constant 0 : index
    %c0_52 = arith.constant 0 : index
    %c0_53 = arith.constant 0 : index
    %113 = vector.load %arg10[%c0_51, %c0_52, %c0_53] : memref<1x512x128xbf16, #tpu.memory_space<vmem>>, vector<1x512x128xbf16>
    %114 = vector.shape_cast %113 : vector<1x512x128xbf16> to vector<512x128xbf16>
    %cst_54 = arith.constant dense<0.000000e+00> : vector<64x128xf32>
    %115 = tpu.matmul %112, %114, %cst_54 {dimension_numbers = #tpu.dot_dimension_numbers<[1], [0], [0], [1], [0, 0, 1, 1], [], []>} : vector<64x512xbf16>, vector<512x128xbf16>, vector<64x128xf32> -> vector<64x128xf32>
    %116 = arith.addf %72, %115 : vector<64x128xf32>
    %c0_55 = arith.constant 0 : index
    %c0_56 = arith.constant 0 : index
    %117 = vector.load %arg14[%c0_55, %c0_56] : memref<64x128xf32, #tpu.memory_space<vmem>>, vector<64x128xf32>
    tpu.vector_store %arg14[%c0_55, %c0_56], %116 {strides = array<i32>} : memref<64x128xf32, #tpu.memory_space<vmem>>, vector<64x128xf32>,
    %c1_i32 = arith.constant 1 : i32
    %118 = arith.cmpi eq, %arg1, %c1_i32 : i32
    %119 = arith.extui %118 : i1 to i32
    %c0_i32_57 = arith.constant 0 : i32
    %120 = arith.cmpi ne, %119, %c0_i32_57 : i32
    scf.if %120 {
      %c31 = arith.constant 31 : index
      %c0_58 = arith.constant 0 : index
      %121 = tpu.strided_load %arg14[%c31, %c0_58] {strides = array<i32: 32, 1>} : memref<64x128xf32, #tpu.memory_space<vmem>>, vector<2x128xf32>
      %c0_59 = arith.constant 0 : index
      %c0_60 = arith.constant 0 : index
      %122 = vector.load %arg11[%c0_59, %c0_60] : memref<1x128xf32, #tpu.memory_space<vmem>>, vector<1x128xf32>
      %cst_61 = arith.constant dense<0.000000e+00> : vector<2xf32>
      %123 = vector.multi_reduction <add>, %121, %cst_61 [1] : vector<2x128xf32> to vector<2xf32>
      %124 = vector.shape_cast %123 : vector<2xf32> to vector<2x1xf32>
      %cst_62 = arith.constant 1.280000e+02 : f32
      %125 = vector.broadcast %cst_62 : f32 to vector<2x1xf32>
      %126 = arith.divf %124, %125 : vector<2x1xf32>
      %127 = vector.broadcast %126 : vector<2x1xf32> to vector<2x128xf32>
      %128 = arith.subf %121, %127 : vector<2x128xf32>
      %129 = arith.mulf %128, %128 : vector<2x128xf32>
      %cst_63 = arith.constant dense<0.000000e+00> : vector<2xf32>
      %130 = vector.multi_reduction <add>, %129, %cst_63 [1] : vector<2x128xf32> to vector<2xf32>
      %131 = vector.shape_cast %130 : vector<2xf32> to vector<2x1xf32>
      %cst_64 = arith.constant 1.280000e+02 : f32
      %132 = vector.broadcast %cst_64 : f32 to vector<2x1xf32>
      %133 = arith.divf %131, %132 : vector<2x1xf32>
      %134 = vector.broadcast %126 : vector<2x1xf32> to vector<2x128xf32>
      %135 = arith.subf %121, %134 : vector<2x128xf32>
      %cst_65 = arith.constant 9.99999974E-6 : f32
      %136 = vector.broadcast %cst_65 : f32 to vector<2x1xf32>
      %137 = arith.addf %133, %136 : vector<2x1xf32>
      %138 = math.rsqrt %137 : vector<2x1xf32>
      %139 = vector.broadcast %138 : vector<2x1xf32> to vector<2x128xf32>
      %140 = arith.mulf %135, %139 : vector<2x128xf32>
      %141 = vector.broadcast %122 : vector<1x128xf32> to vector<2x128xf32>
      %142 = arith.mulf %140, %141 : vector<2x128xf32>
      %143 = arith.truncf %142 : vector<2x128xf32> to vector<2x128xbf16>
      %c0_66 = arith.constant 0 : index
      %c0_67 = arith.constant 0 : index
      %144 = vector.load %arg12[%c0_66, %c0_67] : memref<128x512xbf16, #tpu.memory_space<vmem>>, vector<128x512xbf16>
      %cst_68 = arith.constant dense<0.000000e+00> : vector<2x512xf32>
      %145 = tpu.matmul %143, %144, %cst_68 {dimension_numbers = #tpu.dot_dimension_numbers<[1], [0], [0], [1], [0, 0, 1, 1], [], []>} : vector<2x128xbf16>, vector<128x512xbf16>, vector<2x512xf32> -> vector<2x512xf32>
      %c0_69 = arith.constant 0 : index
      %c0_70 = arith.constant 0 : index
      %c0_71 = arith.constant 0 : index
      %146 = vector.load %arg13[%c0_69, %c0_70, %c0_71] : memref<1x2x512xf32, #tpu.memory_space<vmem>>, vector<1x2x512xf32>
      %147 = vector.shape_cast %146 : vector<1x2x512xf32> to vector<2x512xf32>
      %148 = vector.shape_cast %145 : vector<2x512xf32> to vector<1x2x512xf32>
      tpu.vector_store %arg13[%c0_69, %c0_70, %c0_71], %148 {strides = array<i32>} : memref<1x2x512xf32, #tpu.memory_space<vmem>>, vector<1x2x512xf32>,
    } else {
    }
    return
  }
  func.func @transform_0(%arg0: i32, %arg1: i32) -> (i32, i32) {
    %c0_i32 = arith.constant 0 : i32
    %c0_i32_0 = arith.constant 0 : i32
    return %arg0, %c0_i32 : i32, i32
  }
  func.func @transform_1(%arg0: i32, %arg1: i32) -> (i32, i32, i32) {
    %c0_i32 = arith.constant 0 : i32
    %c0_i32_0 = arith.constant 0 : i32
    %c0_i32_1 = arith.constant 0 : i32
    return %arg1, %c0_i32, %c0_i32_0 : i32, i32, i32
  }
  func.func @transform_2(%arg0: i32, %arg1: i32) -> (i32, i32, i32, i32) {
    %c0_i32 = arith.constant 0 : i32
    %c0_i32_0 = arith.constant 0 : i32
    %c0_i32_1 = arith.constant 0 : i32
    %c0_i32_2 = arith.constant 0 : i32
    return %arg1, %c0_i32, %c0_i32_0, %c0_i32_1 : i32, i32, i32, i32
  }
  func.func @transform_3(%arg0: i32, %arg1: i32) -> (i32, i32, i32, i32) {
    %c0_i32 = arith.constant 0 : i32
    %c0_i32_0 = arith.constant 0 : i32
    %c0_i32_1 = arith.constant 0 : i32
    %c0_i32_2 = arith.constant 0 : i32
    return %arg1, %c0_i32, %c0_i32_0, %c0_i32_1 : i32, i32, i32, i32
  }
  func.func @transform_4(%arg0: i32, %arg1: i32) -> (i32, i32, i32, i32) {
    %c0_i32 = arith.constant 0 : i32
    %c0_i32_0 = arith.constant 0 : i32
    %c0_i32_1 = arith.constant 0 : i32
    %c0_i32_2 = arith.constant 0 : i32
    return %arg1, %c0_i32, %c0_i32_0, %c0_i32_1 : i32, i32, i32, i32
  }
  func.func @transform_5(%arg0: i32, %arg1: i32) -> (i32, i32, i32, i32) {
    %c0_i32 = arith.constant 0 : i32
    %c0_i32_0 = arith.constant 0 : i32
    %c0_i32_1 = arith.constant 0 : i32
    %c0_i32_2 = arith.constant 0 : i32
    return %arg1, %c0_i32, %c0_i32_0, %c0_i32_1 : i32, i32, i32, i32
  }
  func.func @transform_6(%arg0: i32, %arg1: i32) -> (i32, i32, i32) {
    %c0_i32 = arith.constant 0 : i32
    %c0_i32_0 = arith.constant 0 : i32
    %c0_i32_1 = arith.constant 0 : i32
    return %arg1, %c0_i32, %c0_i32_0 : i32, i32, i32
  }
  func.func @transform_7(%arg0: i32, %arg1: i32) -> (i32, i32, i32) {
    %c0_i32 = arith.constant 0 : i32
    %c0_i32_0 = arith.constant 0 : i32
    %c0_i32_1 = arith.constant 0 : i32
    return %arg1, %c0_i32, %c0_i32_0 : i32, i32, i32
  }
  func.func @transform_8(%arg0: i32, %arg1: i32) -> (i32, i32, i32) {
    %c0_i32 = arith.constant 0 : i32
    %c0_i32_0 = arith.constant 0 : i32
    %c0_i32_1 = arith.constant 0 : i32
    return %arg1, %c0_i32, %c0_i32_0 : i32, i32, i32
  }
  func.func @transform_9(%arg0: i32, %arg1: i32) -> (i32, i32) {
    %c0_i32 = arith.constant 0 : i32
    %c0_i32_0 = arith.constant 0 : i32
    %c0_i32_1 = arith.constant 0 : i32
    return %c0_i32, %c0_i32_0 : i32, i32
  }
  func.func @transform_10(%arg0: i32, %arg1: i32) -> (i32, i32) {
    %c0_i32 = arith.constant 0 : i32
    %c0_i32_0 = arith.constant 0 : i32
    %c0_i32_1 = arith.constant 0 : i32
    return %c0_i32, %c0_i32_0 : i32, i32
  }
  func.func @transform_11(%arg0: i32, %arg1: i32) -> (i32, i32, i32) {
    %c0_i32 = arith.constant 0 : i32
    %c0_i32_0 = arith.constant 0 : i32
    %c0_i32_1 = arith.constant 0 : i32
    return %arg0, %c0_i32, %c0_i32_0 : i32, i32, i32
  }
}

</mosaic_0001>

<bundles_post_ra>
// kernel: tpu_custom_call.1
= control target key start
LH: loop header
LB: loop body
LE: loop exit
PB: predicated region body
PF: predicated region fallthrough
CT: control target
= control target key end

     0   :  { %s8438_s0 = inlined_call_operand.vmem [shape: f32[128,128], index: 0, kind: input, shape index: {}]   ;;  %s8439_s1 = inlined_call_operand.vmem [shape: f32[2,1,128], index: 1, kind: input, shape index: {}]   ;;  %s8440_s2 = inlined_call_operand.vmem [shape: bf16[2,4,128,32], index: 2, kind: input, shape index: {}]   ;;  %s8441_s3 = inlined_call_operand.vmem [shape: bf16[2,4,128,32], index: 3, kind: input, shape index: {}]   ;;  %s8442_s4 = inlined_call_operand.vmem [shape: bf16[2,4,128,32], index: 4, kind: input, shape index: {}]   ;;  %s8443_s5 = inlined_call_operand.vmem [shape: bf16[2,4,32,128], index: 5, kind: input, shape index: {}]   ;;  %s8444_s6 = inlined_call_operand.vmem [shape: f32[2,1,128], index: 6, kind: input, shape index: {}]   ;;  %s8445_s7 = inlined_call_operand.vmem [shape: bf16[2,128,512], index: 7, kind: input, shape index: {}]   ;;  %s8446_s8 = inlined_call_operand.vmem [shape: bf16[2,512,128], index: 8, kind: input, shape index: {}]   ;;  %s8447_s9 = inlined_call_operand.vmem [shape: f32[1,128], index: 9, kind: input, shape index: {}]   ;;  %s8448_s10 = inlined_call_operand.vmem [shape: bf16[128,512], index: 10, kind: input, shape index: {}]   ;;  %s8449_s11 = inlined_call_operand.hbm [shape: f32[2,2,512], index: 11, kind: output, shape index: {}]  }
   0x1   :  { %8467 = sst [smem:[#allocation19_spill]] %s8438_s0 }
   0x2   :  { %8468 = sst [smem:[#allocation20_spill]] %s8440_s2 }
   0x3   :  { %8469 = sst [smem:[#allocation21_spill]] %s8449_s11 }
   0x4   :  { %16 = vsyncpa [#allocation4], 0 }
   0x5   :  { %18 = vsyncpa [#allocation4 + $0x1], 0  ;;  %s6789_s17 = smov 0   ;;  %s6791_s18 = smov 0  }
   0x6   :  { %s6793_s19 = smov 0   ;;  %s6795_s20 = smov 0  }
   0x7   :  { %s6797_s21 = smov 0   ;;  %s6799_s22 = smov 0  }
   0x8   :  { %s6801_s23 = smov 0   ;;  %s6803_s24 = smov 0  }
   0x9 LB: > { %8470 = sst [smem:[#allocation6_spill]] %s6698_s17  ;;  %s5239_s25 = sadd.s32 4294967295, %s6726_s24   ;;  %s6726_s24 = sphi %s6803_s24, %s24_s24   ;;  %s6722_s23 = sphi %s6801_s23, %s8516_s23   ;;  %s6718_s22 = sphi %s6799_s22, %s8515_s22   ;;  %s6714_s21 = sphi %s6797_s21, %s8514_s21   ;;  %s6710_s20 = sphi %s6795_s20, %s8513_s20   ;;  %s6706_s19 = sphi %s6793_s19, %s8512_s19   ;;  %s6702_s18 = sphi %s6791_s18, %s8511_s18   ;;  %s6698_s17 = sphi %s6789_s17, %s8510_s17  }
   0xa   : > { %8471 = sst [smem:[#allocation7_spill]] %s6702_s18  ;;  %s5240_s26 = sadd.s32 4294967294, %s6726_s24  }
   0xb   : > { %8472 = sst [smem:[#allocation8_spill]] %s6706_s19  ;;  %s33_s27 = sadd.s32 1, %s6718_s22 }
   0xc   : > { %8473 = sst [smem:[#allocation9_spill]] %s6718_s22  ;;  %p34_p0 = scmp.ge.s32.totalorder %s33_s27, 2 }
   0xd   : > { %8474 = sst [smem:[#allocation10_spill]] %s6722_s23  ;;  %s36_s28 = sadd.s32 1, %s6722_s23 }
   0xe   : > { %8475 = sst [smem:[#allocation11_spill]] %s6726_s24  ;;  %p329_p1 = scmp.ne.s32.totalorder %s6706_s19, %s6702_s18 }
   0xf   : > { %p330_p2 = scmp.eq.s32.totalorder %s5239_s25, 3  ;;  %s8518_s27 = smov (%p34_p0, %s33_s27), 0 }
  0x10   : > { %8476 = sst [smem:[#allocation12_spill]] %s8518_s27  ;;  %s8520_s28 = smov (!%p34_p0, %s36_s28), %s6722_s23 }
  0x11   : > { %p6836_p3 = por %p330_p2, %p329_p1  ;;  %p335_p4 = scmp.ne.s32.totalorder %s6702_s18, %s6698_s17 }
  0x12   : > { %p38_p5 = scmp.ge.s32.totalorder %s8520_s28, 2  ;;  %p336_p6 = scmp.eq.s32.totalorder %s5240_s26, 3 }
  0x13   : > { %s8477_s29 = scalar_select %p6836_p3, 1, 0 }
  0x14   : > { %p5243_p7 = scmp.ge.s32.totalorder %s6726_s24, 1  ;;  %p429_p8 = scmp.lt.s32.totalorder %s6726_s24, 5 }
  0x15   : > { %8478 = sst [smem:[#allocation13_spill]] %s8477_s29  ;;  %s8522_s28 = smov (%p38_p5, %s8520_s28), 0 }
  0x16   : > { %8479 = sst [smem:[#allocation14_spill]] %s8522_s28  ;;  %p6846_p9 = por %p336_p6, %p335_p4 }
  0x17   : > { %p430_p10 = pnand %p5243_p7, %p429_p8  ;;  %s316_s12 = ssub.s32 %s6722_s23, %s8522_s28 }
  0x18   : > { %s8480_s30 = scalar_select %p6846_p9, 1, 0 }
  0x19   : > { %s319_s13 = sadd.s32 1, %s6706_s19  ;;  %p317_p11 = scmp.eq.s32.totalorder %s316_s12, 0 }
  0x1a   : > { %8481 = sst [smem:[#allocation15_spill]] %s8480_s30  ;;  %433 = sbr.rel (%p430_p10) target bundleno = 2515 (0x9d3), region = 64 }
  0x1b   : > { %s6854_s14 = scalar_select %p317_p11, %s6706_s19, %s319_s13  }
  0x1d   : > { %8482 = sst [smem:[#allocation16_spill]] %s6854_s14 }
  0x1f   : > { %s8453_s15 = sand.u32 1, %s6702_s18   ;;  %s6857_s16 = sshll.u32 %s6714_s21, 3 }
  0x20   : > { %8483 = sst [smem:[#allocation17_spill]] %s6857_s16  ;;  %s6861_s25 = sshll.u32 %s8453_s15, 3 }
  0x21   : > { %p506_p12 = scmp.lt.s32.totalorder %s6857_s16, 15  ;;  %p511_p13 = scmp.lt.s32.totalorder %s6710_s20, 1 }
  0x22   : > { %s8484_s0 = sld [smem:[#allocation19_spill]]  ;;  %p5259_p0 = scmp.ne.s32.totalorder %s6710_s20, 0 }
  0x23   : > { %s507_s26 = scalar_select %p506_p12, %s6857_s16, 15 }
  0x24   : > { %s6867_s12 = scalar_select %p511_p13, %s6710_s20, 1 }
  0x25   : > { %s5246_s13 = sshll.u32 %s507_s26, 3  ;;  %s8485_s2 = sld [smem:[#allocation20_spill]] }
  0x26   : > { %s6114_s14 = sshll.u32 %s6867_s12, 8  ;;  %s6117_s19 = sshll.u32 %s6867_s12, 6 }
  0x27   : > { %s6886_s11 = scalar_lea.vmem %s8441_s3, %s6114_s14  ;;  %s6891_s27 = scalar_lea.vmem %s8442_s4, %s6114_s14 }
  0x28   : > { %s509_s21 = scalar_lea.vmem %s8484_s0, %s5246_s13  ;;  %s6896_s23 = scalar_lea.vmem %s8443_s5, %s6117_s19 }
  0x29   : > { %s536_s17 = scalar_lea.vmem %s8444_s6, %s6867_s12  ;;  %s6905_s18 = scalar_lea.vmem %s8445_s7, %s6114_s14 }
  0x2a   : > { %s6910_s16 = scalar_lea.vmem %s8446_s8, %s6114_s14  ;;  %s504_s26 = scalar_lea.vmem [#allocation3], %s6861_s25 }
  0x2b   : > { %s6881_s24 = scalar_lea.vmem %s8485_s2, %s6114_s14  ;;  %551 = sbr.rel (%p5259_p0) target bundleno = 57 (0x39), region = 68 }
  0x30   : > { %v552_v0 = vld [vmem:[%s509_s21] sm:$0xff]  ;;  %v553_v1 = vld [vmem:[%s509_s21 + $0x8] sm:$0xff]  ;;  %v554_v2 = vld [vmem:[%s509_s21 + $0x10] sm:$0xff] }
  0x31   : > { %560 = vst [vmem:[#allocation2] sm:$0xff] %v552_v0  ;;  %v555_v3 = vld [vmem:[%s509_s21 + $0x18] sm:$0xff]  ;;  %v556_v4 = vld [vmem:[%s509_s21 + $0x20] sm:$0xff]  ;;  %v557_v5 = vld [vmem:[%s509_s21 + $0x28] sm:$0xff] }
  0x32   : > { %561 = vst [vmem:[#allocation2 + $0x8] sm:$0xff] %v553_v1  ;;  %v558_v6 = vld [vmem:[%s509_s21 + $0x30] sm:$0xff]  ;;  %v559_v7 = vld [vmem:[%s509_s21 + $0x38] sm:$0xff] }
  0x33   : > { %562 = vst [vmem:[#allocation2 + $0x10] sm:$0xff] %v554_v2 }
  0x34   : > { %563 = vst [vmem:[#allocation2 + $0x18] sm:$0xff] %v555_v3 }
  0x35   : > { %564 = vst [vmem:[#allocation2 + $0x20] sm:$0xff] %v556_v4 }
  0x36   : > { %565 = vst [vmem:[#allocation2 + $0x28] sm:$0xff] %v557_v5 }
  0x37   : > { %566 = vst [vmem:[#allocation2 + $0x30] sm:$0xff] %v558_v6 }
  0x38   : > { %567 = vst [vmem:[#allocation2 + $0x38] sm:$0xff] %v559_v7 }
  0x39 PF: > { %v568_v10 = vld [vmem:[#allocation2] sm:$0xff]  ;;  %v569_v13 = vld [vmem:[#allocation2 + $0x8] sm:$0xff]  ;;  %v6728_v15 = vmov 128.0   ;;  %v6127_v51 = vld [vmem:[%s6881_s24 + $0x38] sm:$0xff]  ;;  %s8487_s19 = scalar_lea.vmem %s8439_s1, %s6867_s12  ;;  %p5980_p1 = scmp.ne.s32.totalorder %s6710_s20, 1 }
  0x3a   : > { %v570_v9 = vld [vmem:[#allocation2 + $0x10] sm:$0xff]  ;;  %577 = vadd.xlane.f32.xlu0 %v568_v10  ;;  %6395 = vrcp.f32 %v6728_v15  ;;  %v6135_v52 = vld [vmem:[%s6881_s24 + $0x78] sm:$0xff]  ;;  %899 = vmatpush.bf16.msra.mxu0 %v6127_v51  ;;  %v6125_v59 = vld [vmem:[%s6881_s24 + $0x28] sm:$0xff] }
  0x3b   : > { %581 = vadd.xlane.f32.xlu1 %v570_v9  ;;  %v571_v12 = vld [vmem:[#allocation2 + $0x18] sm:$0xff]  ;;  %976 = vmatpush.bf16.msra.mxu1 %v6135_v52  ;;  %v6126_v55 = vld [vmem:[%s6881_s24 + $0x30] sm:$0xff]  ;;  %v6133_v60 = vld [vmem:[%s6881_s24 + $0x68] sm:$0xff] }
  0x3c   : > { %v572_v8 = vld [vmem:[#allocation2 + $0x20] sm:$0xff]  ;;  %v6143_v53 = vld [vmem:[%s6881_s24 + $0xb8] sm:$0xff]  ;;  %v6134_v56 = vld [vmem:[%s6881_s24 + $0x70] sm:$0xff] }
  0x3d   : > { %585 = vadd.xlane.f32.xlu2 %v572_v8  ;;  %v573_v11 = vld [vmem:[#allocation2 + $0x28] sm:$0xff]  ;;  %v6151_v54 = vld [vmem:[%s6881_s24 + $0xf8] sm:$0xff]  ;;  %1053 = vmatpush.bf16.msra.mxu2 %v6143_v53  ;;  %v6142_v57 = vld [vmem:[%s6881_s24 + $0xb0] sm:$0xff] }
  0x3e   : > { %v574_v14 = vld [vmem:[#allocation2 + $0x30] sm:$0xff]  ;;  %1130 = vmatpush.bf16.msra.mxu3 %v6151_v54  ;;  %900 = vmatpush.bf16.msra.mxu0 %v6126_v55  ;;  %v6141_v61 = vld [vmem:[%s6881_s24 + $0xa8] sm:$0xff]  ;;  %v6124_v63 = vld [vmem:[%s6881_s24 + $0x20] sm:$0xff] }
  0x3f   : > { %v6931_v38 = vld [vmem:[#allocation2 + $0x38] sm:$0xff]  ;;  %v6150_v58 = vld [vmem:[%s6881_s24 + $0xf0] sm:$0xff]  ;;  %977 = vmatpush.bf16.msra.mxu1 %v6134_v56  ;;  %v6149_v62 = vld [vmem:[%s6881_s24 + $0xe8] sm:$0xff] }
  0x40   : > { %v6396_v16 = vpop.eup %6395  ;;  %v6132_v0 = vld [vmem:[%s6881_s24 + $0x60] sm:$0xff]  ;;  %v6123_v3 = vld [vmem:[%s6881_s24 + $0x18] sm:$0xff]  ;;  %v6122_v7 = vld [vmem:[%s6881_s24 + $0x10] sm:$0xff] }
  0x41   : > { %v594_v17 = vmul.f32 128.0, %v6396_v16  ;;  %vm598_vm0 = vweird.f32 %v6396_v16  ;;  %1054 = vmatpush.bf16.msra.mxu2 %v6142_v57  ;;  %v6140_v1 = vld [vmem:[%s6881_s24 + $0xa0] sm:$0xff]  ;;  %v6131_v4 = vld [vmem:[%s6881_s24 + $0x58] sm:$0xff]  ;;  %v6137_v15 = vld [vmem:[%s6881_s24 + $0x88] sm:$0xff] }
  0x42   : > { %579 = vadd.xlane.f32.xlu0 %v569_v13  ;;  %1131 = vmatpush.bf16.msra.mxu3 %v6150_v58  ;;  %v6148_v2 = vld [vmem:[%s6881_s24 + $0xe0] sm:$0xff]  ;;  %v6139_v5 = vld [vmem:[%s6881_s24 + $0x98] sm:$0xff] }
  0x43   : > { %583 = vadd.xlane.f32.xlu1 %v571_v12  ;;  %v595_v18 = vsub.f32 1.0, %v594_v17  ;;  %901 = vmatpush.bf16.msra.mxu0 %v6125_v59  ;;  %v6147_v6 = vld [vmem:[%s6881_s24 + $0xd8] sm:$0xff]  ;;  %v6145_v17 = vld [vmem:[%s6881_s24 + $0xc8] sm:$0xff] }
  0x44   : > { %978 = vmatpush.bf16.msra.mxu1 %v6133_v60 }
  0x45   : > { %587 = vadd.xlane.f32.xlu2 %v573_v11  ;;  %v596_v19 = vmul.f32 %v6396_v16, %v595_v18  ;;  %1055 = vmatpush.bf16.msra.mxu2 %v6141_v61  ;;  %v6120_v18 = vld [vmem:[%s6881_s24] sm:$0xff] }
  0x46   : > { %1132 = vmatpush.bf16.msra.mxu3 %v6149_v62  ;;  %v7004_v61 = vld [vmem:[%s8487_s19] ss:$0 sm:$0xff] }
  0x47   : > { %v597_v20 = vadd.f32 %v6396_v16, %v596_v19  ;;  %902 = vmatpush.bf16.msra.mxu0 %v6124_v63  ;;  %v6128_v19 = vld [vmem:[%s6881_s24 + $0x40] sm:$0xff] }
  0x48   : > { %979 = vmatpush.bf16.msra.mxu1 %v6132_v0 }
  0x49   : > { %v6914_v21 = vsel %vm598_vm0, %v6396_v16, %v597_v20  ;;  %1056 = vmatpush.bf16.msra.mxu2 %v6140_v1  ;;  %v6136_v20 = vld [vmem:[%s6881_s24 + $0x80] sm:$0xff] }
  0x4a   : > { %8486 = vst [vmem:[#allocation18_spill] sm:$0xff] %v6914_v21  ;;  %1133 = vmatpush.bf16.msra.mxu3 %v6148_v2 }
  0x4b   : > { %903 = vmatpush.bf16.msra.mxu0 %v6123_v3 }
  0x4c   : > { %980 = vmatpush.bf16.msra.mxu1 %v6131_v4 }
  0x4d   : > { %589 = vadd.xlane.f32.xlu2 %v574_v14  ;;  %1057 = vmatpush.bf16.msra.mxu2 %v6139_v5 }
  0x4e   : > { %1134 = vmatpush.bf16.msra.mxu3 %v6147_v6 }
  0x4f   : > { %904 = vmatpush.bf16.msra.mxu0 %v6122_v7 }
  0xad   : > { %v578_v24 = vpop.xlane.xlu0 %577 }
  0xae   : > { %v582_v23 = vpop.xlane.xlu1 %581  ;;  %v600_v25 = vmul.f32 %v6914_v21, %v578_v24 }
  0xaf   : > { %v602_v35 = vmul.f32 %v6914_v21, %v582_v23  ;;  %v6144_v23 = vld [vmem:[%s6881_s24 + $0xc0] sm:$0xff] }
  0xb0   : > { %v586_v22 = vpop.xlane.xlu2 %585  ;;  %v6917_v26 = vsub.f32 %v568_v10, %v600_v25  ;;  %v6146_v10 = vld [vmem:[%s6881_s24 + $0xd0] sm:$0xff] }
  0xb1   : > { %v604_v34 = vmul.f32 %v6914_v21, %v586_v22  ;;  %v6937_v41 = vsub.f32 %v570_v9, %v602_v35  ;;  %v6138_v9 = vld [vmem:[%s6881_s24 + $0x90] sm:$0xff]  ;;  %1135 = vmatpush.bf16.msra.mxu3 %v6146_v10 }
  0xb2   : > { %v616_v27 = vmul.f32 %v6917_v26, %v6917_v26  ;;  %1058 = vmatpush.bf16.msra.mxu2 %v6138_v9 }
  0xb3   : > { %v6935_v40 = vsub.f32 %v572_v8, %v604_v34  ;;  %v618_v47 = vmul.f32 %v6937_v41, %v6937_v41  ;;  %v6130_v8 = vld [vmem:[%s6881_s24 + $0x50] sm:$0xff] }
  0xb4   : > { %624 = vadd.xlane.f32.xlu0 %v616_v27  ;;  %981 = vmatpush.bf16.msra.mxu1 %v6130_v8 }
  0xb5   : > { %v580_v31 = vpop.xlane.xlu0 %579  ;;  %v620_v46 = vmul.f32 %v6935_v40, %v6935_v40  ;;  %1136 = vmatpush.bf16.msra.mxu3 %v6145_v17 }
  0xb6   : > { %v584_v29 = vpop.xlane.xlu1 %583  ;;  %v601_v32 = vmul.f32 %v6914_v21, %v580_v31  ;;  %1059 = vmatpush.bf16.msra.mxu2 %v6137_v15  ;;  %v6172_v15 = vld [vmem:[%s6886_s11 + $0xa0] sm:$0xff] }
  0xb7   : > { %v603_v30 = vmul.f32 %v6914_v21, %v584_v29 }
  0xb8   : > { %v588_v28 = vpop.xlane.xlu2 %587  ;;  %v6927_v36 = vsub.f32 %v569_v13, %v601_v32  ;;  %v6121_v13 = vld [vmem:[%s6881_s24 + $0x8] sm:$0xff] }
  0xb9   : > { %v6923_v33 = vsub.f32 %v571_v12, %v603_v30  ;;  %v605_v45 = vmul.f32 %v6914_v21, %v588_v28  ;;  %905 = vmatpush.bf16.msra.mxu0 %v6121_v13  ;;  %1137 = vmatpush.bf16.msra.mxu3 %v6144_v23 }
  0xba   : > { %v617_v39 = vmul.f32 %v6927_v36, %v6927_v36  ;;  %1060 = vmatpush.bf16.msra.mxu2 %v6136_v20 }
  0xbb   : > { %v619_v37 = vmul.f32 %v6923_v33, %v6923_v33  ;;  %v6950_v49 = vsub.f32 %v573_v11, %v605_v45 }
  0xbc   : > { %591 = vadd.xlane.f32.xlu0 %v6931_v38  ;;  %626 = vadd.xlane.f32.xlu1 %v617_v39 }
  0xbd   : > { %630 = vadd.xlane.f32.xlu2 %v619_v37  ;;  %v621_v50 = vmul.f32 %v6950_v49, %v6950_v49  ;;  %906 = vmatpush.bf16.msra.mxu0 %v6120_v18 }
  0xc0   : > { %v590_v42 = vpop.xlane.xlu2 %589 }
  0xc1   : > { %v606_v43 = vmul.f32 %v6914_v21, %v590_v42 }
  0xc3   : > { %v6941_v44 = vsub.f32 %v574_v14, %v606_v43  ;;  %v6129_v14 = vld [vmem:[%s6881_s24 + $0x48] sm:$0xff] }
  0xc4   : > { %632 = vadd.xlane.f32.xlu0 %v620_v46  ;;  %628 = vadd.xlane.f32.xlu1 %v618_v47 }
  0xc5   : > { %v622_v48 = vmul.f32 %v6941_v44, %v6941_v44  ;;  %982 = vmatpush.bf16.msra.mxu1 %v6129_v14 }
  0xc7   : > { %636 = vadd.xlane.f32.xlu2 %v622_v48 }
  0xc9   : > { %983 = vmatpush.bf16.msra.mxu1 %v6128_v19 }
  0xcc   : > { %634 = vadd.xlane.f32.xlu1 %v621_v50 }
 0x127   : > { %v625_v11 = vpop.xlane.xlu0 %624 }
 0x128   : > { %v640_v12 = vmul.f32 %v625_v11, %v6914_v21 }
 0x12a   : > { %v648_v16 = vadd.f32 1e-05, %v640_v12 }
 0x12c   : > { %6397 = vrsqrt.f32 %v648_v16  ;;  %vm662_vm2 = vweird.f32 %v648_v16 }
 0x12f   : > { %v627_v25 = vpop.xlane.xlu1 %626  ;;  %v592_v27 = vpop.xlane.xlu0 %591 }
 0x130   : > { %v631_v22 = vpop.xlane.xlu2 %630  ;;  %v641_v28 = vmul.f32 %v627_v25, %v6914_v21  ;;  %v607_v29 = vmul.f32 %v6914_v21, %v592_v27 }
 0x131   : > { %v643_v24 = vmul.f32 %v631_v22, %v6914_v21 }
 0x132   : > { %v6398_v31 = vpop.eup %6397  ;;  %v649_v32 = vadd.f32 1e-05, %v641_v28  ;;  %v6991_v34 = vsub.f32 %v6931_v38, %v607_v29 }
 0x133   : > { %v651_v30 = vadd.f32 1e-05, %v643_v24  ;;  %v657_v35 = vmul.f32 %v6398_v31, %v648_v16  ;;  %vm663_vm1 = vweird.f32 %v6398_v31 }
 0x134   : > { %v623_v37 = vmul.f32 %v6991_v34, %v6991_v34  ;;  %vm664_vm3 = vmor %vm662_vm2, %vm663_vm1  ;;  %vm672_vm4 = vweird.f32 %v649_v32 }
 0x135   : > { %6399 = vrsqrt.f32 %v651_v30  ;;  %v658_v39 = vmul.f32 %v6398_v31, %v657_v35  ;;  %vm692_vm7 = vweird.f32 %v651_v30 }
 0x136   : > { %6401 = vrsqrt.f32 %v649_v32  ;;  %638 = vadd.xlane.f32.xlu0 %v623_v37 }
 0x137   : > { %v659_v42 = vmul.f32 0.5, %v658_v39  ;;  %v629_v43 = vpop.xlane.xlu1 %628  ;;  %v633_v45 = vpop.xlane.xlu0 %632 }
 0x138   : > { %v642_v46 = vmul.f32 %v629_v43, %v6914_v21  ;;  %v644_v47 = vmul.f32 %v633_v45, %v6914_v21 }
 0x139   : > { %v660_v50 = vsub.f32 1.5, %v659_v42 }
 0x13a   : > { %v650_v52 = vadd.f32 1e-05, %v642_v46  ;;  %v6997_v55 = vadd.f32 1e-05, %v644_v47 }
 0x13b   : > { %v6400_v48 = vpop.eup %6399  ;;  %v661_v53 = vmul.f32 %v6398_v31, %v660_v50 }
 0x13c   : > { %v6402_v38 = vpop.eup %6401  ;;  %v687_v51 = vmul.f32 %v6400_v48, %v651_v30  ;;  %6403 = vrsqrt.f32 %v650_v52  ;;  %vm693_vm8 = vweird.f32 %v6400_v48  ;;  %vm682_vm9 = vweird.f32 %v650_v52 }
 0x13d   : > { %v667_v54 = vmul.f32 %v6402_v38, %v649_v32  ;;  %v665_v56 = vsel %vm664_vm3, %v6398_v31, %v661_v53  ;;  %vm673_vm5 = vweird.f32 %v6402_v38  ;;  %6405 = vrsqrt.f32 %v6997_v55  ;;  %vm7012_vm11 = vmor %vm692_vm7, %vm693_vm8 }
 0x13e   : > { %v688_v57 = vmul.f32 %v6400_v48, %v687_v51  ;;  %v736_v62 = vmul.f32 %v665_v56, %v6917_v26  ;;  %vm674_vm6 = vmor %vm672_vm4, %vm673_vm5  ;;  %vm702_vm15 = vweird.f32 %v6997_v55 }
 0x13f   : > { %v668_v58 = vmul.f32 %v6402_v38, %v667_v54  ;;  %v635_v60 = vpop.xlane.xlu1 %634 }
 0x140   : > { %v645_v63 = vmul.f32 %v635_v60, %v6914_v21  ;;  %v689_v0 = vmul.f32 0.5, %v688_v57  ;;  %v747_v6 = vmul.f32 %v7004_v61, %v736_v62 }
 0x141   : > { %v669_v59 = vmul.f32 0.5, %v668_v58 }
 0x142   : > { %v6404_v2 = vpop.eup %6403  ;;  %v653_v5 = vadd.f32 1e-05, %v645_v63  ;;  %v690_v7 = vsub.f32 1.5, %v689_v0  ;;  %v755_v12 = vpack.c.bf16 %v747_v6, %v747_v6  ;;  %v6159_v63 = vld [vmem:[%s6886_s11 + $0x38] sm:$0xff] }
 0x143   : > { %v670_v1 = vsub.f32 1.5, %v669_v59  ;;  %v677_v4 = vmul.f32 %v6404_v2, %v650_v52  ;;  %v6406_v10 = vpop.eup %6405  ;;  %vm683_vm10 = vweird.f32 %v6404_v2  ;;  %v637_v59 = vpop.xlane.xlu2 %636  ;;  %v6167_v0 = vld [vmem:[%s6886_s11 + $0x78] sm:$0xff]  ;;  %1271 = vmatpush.bf16.msrb.mxu0 %v6159_v63 }
 0x144   : > { %6407 = vrsqrt.f32 %v653_v5  ;;  %v691_v14 = vmul.f32 %v6400_v48, %v690_v7  ;;  %v697_v17 = vmul.f32 %v6406_v10, %v6997_v55  ;;  %vm684_vm12 = vmor %vm682_vm9, %vm683_vm10  ;;  %vm712_vm13 = vweird.f32 %v653_v5  ;;  %1348 = vmatpush.bf16.msrb.mxu1 %v6167_v0  ;;  %v6182_v7 = vld [vmem:[%s6886_s11 + $0xf0] sm:$0xff]  ;;  %v6207_v0 = vld [vmem:[%s6891_s27 + $0xb8] sm:$0xff] }
 0x145   : > { %v671_v3 = vmul.f32 %v6402_v38, %v670_v1  ;;  %v678_v9 = vmul.f32 %v6404_v2, %v677_v4  ;;  %vm703_vm0 = vweird.f32 %v6406_v10  ;;  %v646_v60 = vmul.f32 %v637_v59, %v6914_v21  ;;  %v6175_v1 = vld [vmem:[%s6886_s11 + $0xb8] sm:$0xff]  ;;  %v6166_v4 = vld [vmem:[%s6886_s11 + $0x70] sm:$0xff] }
 0x146   : > { %v695_v23 = vsel %vm7012_vm11, %v6400_v48, %v691_v14  ;;  %v698_v25 = vmul.f32 %v6406_v10, %v697_v17  ;;  %vm704_vm2 = vmor %vm702_vm15, %vm703_vm0  ;;  %1425 = vmatpush.bf16.msrb.mxu2 %v6175_v1  ;;  %v6164_v14 = vld [vmem:[%s6886_s11 + $0x60] sm:$0xff]  ;;  %v6215_v1 = vld [vmem:[%s6891_s27 + $0xf8] sm:$0xff]  ;;  %vm2030_vm9 = vcmask 261120  }
 0x147   : > { %v675_v8 = vsel %vm674_vm6, %v6402_v38, %v671_v3  ;;  %v679_v11 = vmul.f32 0.5, %v678_v9  ;;  %v739_v31 = vmul.f32 %v695_v23, %v6923_v33  ;;  %v7047_v62 = vadd.f32 1e-05, %v646_v60  ;;  %v6158_v3 = vld [vmem:[%s6886_s11 + $0x30] sm:$0xff]  ;;  %v6157_v9 = vld [vmem:[%s6886_s11 + $0x28] sm:$0xff] }
 0x148   : > { %v737_v26 = vmul.f32 %v675_v8, %v6927_v36  ;;  %v835_v36 = vunpack.c.l.b16 %v755_v12  ;;  %v699_v32 = vmul.f32 0.5, %v698_v25  ;;  %1272 = vmatpush.bf16.msrb.mxu0 %v6158_v3  ;;  %1349 = vmatpush.bf16.msrb.mxu1 %v6166_v4  ;;  %v6198_v3 = vld [vmem:[%s6891_s27 + $0x70] sm:$0xff] }
 0x149   : > { %v680_v16 = vsub.f32 1.5, %v679_v11  ;;  %v750_v42 = vmul.f32 %v7004_v61, %v739_v31  ;;  %6409 = vrsqrt.f32 %v7047_v62  ;;  %v6181_v11 = vld [vmem:[%s6886_s11 + $0xe8] sm:$0xff]  ;;  %v6178_v31 = vld [vmem:[%s6886_s11 + $0xd0] sm:$0xff]  ;;  %vm722_vm3 = vweird.f32 %v7047_v62 }
 0x14a   : > { %v748_v13 = vmul.f32 %v7004_v61, %v737_v26  ;;  %v6408_v20 = vpop.eup %6407  ;;  %v700_v43 = vsub.f32 1.5, %v699_v32  ;;  %v6173_v26 = vld [vmem:[%s6886_s11 + $0xa8] sm:$0xff]  ;;  %v6206_v4 = vld [vmem:[%s6891_s27 + $0xb0] sm:$0xff] }
 0x14b   : > { %v681_v19 = vmul.f32 %v6404_v2, %v680_v16  ;;  %v707_v27 = vmul.f32 %v6408_v20, %v653_v5  ;;  %vm713_vm14 = vweird.f32 %v6408_v20  ;;  %v758_v45 = vpack.c.bf16 %v750_v42, %v750_v42  ;;  %v6174_v5 = vld [vmem:[%s6886_s11 + $0xb0] sm:$0xff]  ;;  %v6180_v16 = vld [vmem:[%s6886_s11 + $0xe0] sm:$0xff] }
 0x14c   : > { %v756_v18 = vpack.c.bf16 %v748_v13, %v748_v13  ;;  %vm714_vm1 = vmor %vm712_vm13, %vm713_vm14  ;;  %v701_v46 = vmul.f32 %v6406_v10, %v700_v43  ;;  %1426 = vmatpush.bf16.msrb.mxu2 %v6174_v5  ;;  %1273 = vmatpush.bf16.msrb.mxu0 %v6157_v9  ;;  %v6156_v13 = vld [vmem:[%s6886_s11 + $0x20] sm:$0xff]  ;;  %v6214_v5 = vld [vmem:[%s6891_s27 + $0xf0] sm:$0xff] }
 0x14d   : > { %v685_v24 = vsel %vm684_vm12, %v6404_v2, %v681_v19  ;;  %v708_v30 = vmul.f32 %v6408_v20, %v707_v27  ;;  %v838_v50 = vunpack.c.l.b16 %v758_v45  ;;  %v6183_v2 = vld [vmem:[%s6886_s11 + $0xf8] sm:$0xff]  ;;  %v6154_v27 = vld [vmem:[%s6886_s11 + $0x10] sm:$0xff]  ;;  %v6213_v9 = vld [vmem:[%s6891_s27 + $0xe8] sm:$0xff] }
 0x14e   : > { %v836_v22 = vunpack.c.l.b16 %v756_v18  ;;  %v738_v29 = vmul.f32 %v685_v24, %v6937_v41  ;;  %v705_v38 = vsel %vm704_vm2, %v6406_v10, %v701_v46  ;;  %1502 = vmatpush.bf16.msrb.mxu3 %v6183_v2  ;;  %v6165_v10 = vld [vmem:[%s6886_s11 + $0x68] sm:$0xff]  ;;  %v6179_v24 = vld [vmem:[%s6886_s11 + $0xd8] sm:$0xff]  ;;  %v6190_v2 = vld [vmem:[%s6891_s27 + $0x30] sm:$0xff] }
 0x14f   : > { %v709_v35 = vmul.f32 0.5, %v708_v30  ;;  %v740_v53 = vmul.f32 %v705_v38, %v6935_v40  ;;  %v7057_v6 = vpop.eup %6409  ;;  %1350 = vmatpush.bf16.msrb.mxu1 %v6165_v10  ;;  %v6170_v30 = vld [vmem:[%s6886_s11 + $0x90] sm:$0xff]  ;;  %v6176_v38 = vld [vmem:[%s6886_s11 + $0xc0] sm:$0xff] }
 0x150   : > { %v7019_v28 = vpack.c.b16 %v836_v22, %v835_v36  ;;  %v749_v37 = vmul.f32 %v7004_v61, %v738_v29  ;;  %v717_v8 = vmul.f32 %v7057_v6, %v7047_v62  ;;  %1427 = vmatpush.bf16.msrb.mxu2 %v6173_v26  ;;  %1274 = vmatpush.bf16.msrb.mxu0 %v6156_v13  ;;  %v6163_v36 = vld [vmem:[%s6886_s11 + $0x58] sm:$0xff]  ;;  %v6162_v29 = vld [vmem:[%s6886_s11 + $0x50] sm:$0xff]  ;;  %vm723_vm4 = vweird.f32 %v7057_v6  ;;  %v6188_v10 = vld [vmem:[%s6891_s27 + $0x20] sm:$0xff] }
 0x151   : > { %v710_v39 = vsub.f32 1.5, %v709_v35  ;;  %v751_v55 = vmul.f32 %v7004_v61, %v740_v53  ;;  %v6171_v22 = vld [vmem:[%s6886_s11 + $0x98] sm:$0xff]  ;;  %v6153_v35 = vld [vmem:[%s6886_s11 + $0x8] sm:$0xff]  ;;  %vm7086_vm5 = vmor %vm722_vm3, %vm723_vm4 }
 0x152   : > { %907 = vmatmul.bf16.vlgmr.msra.gmra.mxu0 %v7019_v28  ;;  %984 = vmatmul.bf16.vlgmr.msra.gmra.mxu1 %v7019_v28  ;;  %v757_v41 = vpack.c.bf16 %v749_v37, %v749_v37  ;;  %v718_v12 = vmul.f32 %v7057_v6, %v717_v8  ;;  %v6161_v37 = vld [vmem:[%s6886_s11 + $0x48] sm:$0xff]  ;;  %v6196_v26 = vld [vmem:[%s6891_s27 + $0x60] sm:$0xff]  ;;  %v6187_v13 = vld [vmem:[%s6891_s27 + $0x18] sm:$0xff] }
 0x153   : > { %1061 = vmatmul.bf16.vlgmr.msra.gmra.mxu2 %v7019_v28  ;;  %1138 = vmatmul.bf16.vlgmr.msra.gmra.mxu3 %v7019_v28  ;;  %v711_v33 = vmul.f32 %v6408_v20, %v710_v39  ;;  %v6169_v39 = vld [vmem:[%s6886_s11 + $0x88] sm:$0xff] }
 0x154   : > { %v837_v47 = vunpack.c.l.b16 %v757_v41  ;;  %1503 = vmatpush.bf16.msrb.mxu3 %v6182_v7  ;;  %1351 = vmatpush.bf16.msrb.mxu1 %v6164_v14  ;;  %v719_v19 = vmul.f32 0.5, %v718_v12  ;;  %v6177_v41 = vld [vmem:[%s6886_s11 + $0xc8] sm:$0xff]  ;;  %v6212_v12 = vld [vmem:[%s6891_s27 + $0xe0] sm:$0xff]  ;;  %v6195_v14 = vld [vmem:[%s6891_s27 + $0x58] sm:$0xff] }
 0x155   : > { %v715_v48 = vsel %vm714_vm1, %v6408_v20, %v711_v33  ;;  %1428 = vmatpush.bf16.msrb.mxu2 %v6172_v15  ;;  %v6155_v20 = vld [vmem:[%s6886_s11 + $0x18] sm:$0xff]  ;;  %v6197_v7 = vld [vmem:[%s6891_s27 + $0x68] sm:$0xff] }
 0x156   : > { %v7030_v51 = vpack.c.b16 %v838_v50, %v837_v47  ;;  %v741_v52 = vmul.f32 %v715_v48, %v6950_v49  ;;  %v759_v49 = vpack.c.bf16 %v751_v55, %v751_v55  ;;  %1275 = vmatpush.bf16.msrb.mxu0 %v6155_v20  ;;  %v720_v25 = vsub.f32 1.5, %v719_v19  ;;  %v6152_v47 = vld [vmem:[%s6886_s11] sm:$0xff]  ;;  %v6205_v8 = vld [vmem:[%s6891_s27 + $0xa8] sm:$0xff]  ;;  %v6203_v15 = vld [vmem:[%s6891_s27 + $0x98] sm:$0xff] }
 0x157   : > { %v6160_v48 = vld [vmem:[%s6886_s11 + $0x40] sm:$0xff]  ;;  %v6202_v19 = vld [vmem:[%s6891_s27 + $0x90] sm:$0xff] }
 0x158   : > { %v752_v54 = vmul.f32 %v7004_v61, %v741_v52  ;;  %v839_v40 = vunpack.c.l.b16 %v759_v49  ;;  %1504 = vmatpush.bf16.msrb.mxu3 %v6181_v11  ;;  %1352 = vmatpush.bf16.msrb.mxu1 %v6163_v36  ;;  %v721_v32 = vmul.f32 %v7057_v6, %v720_v25  ;;  %v6168_v50 = vld [vmem:[%s6886_s11 + $0x80] sm:$0xff]  ;;  %v6210_v20 = vld [vmem:[%s6891_s27 + $0xd0] sm:$0xff]  ;;  %v6185_v36 = vld [vmem:[%s6891_s27 + $0x8] sm:$0xff] }
 0x159   : > { %1429 = vmatpush.bf16.msrb.mxu2 %v6171_v22  ;;  %v6204_v11 = vld [vmem:[%s6891_s27 + $0xa0] sm:$0xff]  ;;  %v6193_v22 = vld [vmem:[%s6891_s27 + $0x48] sm:$0xff] }
 0x15a   : > { %v760_v56 = vpack.c.bf16 %v752_v54, %v752_v54  ;;  %1276 = vmatpush.bf16.msrb.mxu0 %v6154_v27  ;;  %v725_v45 = vsel %vm7086_vm5, %v7057_v6, %v721_v32  ;;  %v6189_v6 = vld [vmem:[%s6891_s27 + $0x28] sm:$0xff]  ;;  %v6184_v25 = vld [vmem:[%s6891_s27] sm:$0xff] }
 0x15b   : > { %v742_v53 = vmul.f32 %v725_v45, %v6941_v44  ;;  %v6192_v27 = vld [vmem:[%s6891_s27 + $0x40] sm:$0xff] }
 0x15c   : > { %v840_v57 = vunpack.c.l.b16 %v760_v56  ;;  %1505 = vmatpush.bf16.msrb.mxu3 %v6180_v16  ;;  %1353 = vmatpush.bf16.msrb.mxu1 %v6162_v29  ;;  %v6211_v16 = vld [vmem:[%s6891_s27 + $0xd8] sm:$0xff]  ;;  %v6200_v29 = vld [vmem:[%s6891_s27 + $0x80] sm:$0xff] }
 0x15d   : > { %1430 = vmatpush.bf16.msrb.mxu2 %v6170_v30  ;;  %v753_v56 = vmul.f32 %v7004_v61, %v742_v53  ;;  %v6208_v30 = vld [vmem:[%s6891_s27 + $0xc0] sm:$0xff] }
 0x15e   : > { %v7040_v58 = vpack.c.b16 %v840_v57, %v839_v40  ;;  %1277 = vmatpush.bf16.msrb.mxu0 %v6153_v35 }
 0x15f   : > { %v761_v40 = vpack.c.bf16 %v753_v56, %v753_v56 }
 0x160   : > { %1506 = vmatpush.bf16.msrb.mxu3 %v6179_v24  ;;  %1354 = vmatpush.bf16.msrb.mxu1 %v6161_v37  ;;  %v6209_v24 = vld [vmem:[%s6891_s27 + $0xc8] sm:$0xff] }
 0x161   : > { %1431 = vmatpush.bf16.msrb.mxu2 %v6169_v39  ;;  %v841_v60 = vunpack.c.l.b16 %v761_v40 }
 0x162   : > { %912 = vmatmul.bf16.gmra.mxu0 %v7030_v51  ;;  %989 = vmatmul.bf16.gmra.mxu1 %v7030_v51 }
 0x163   : > { %1066 = vmatmul.bf16.gmra.mxu2 %v7030_v51  ;;  %1143 = vmatmul.bf16.gmra.mxu3 %v7030_v51 }
 0x164   : > { %1507 = vmatpush.bf16.msrb.mxu3 %v6178_v31  ;;  %1278 = vmatpush.bf16.msrb.mxu0 %v6152_v47 }
 0x165   : > { %1355 = vmatpush.bf16.msrb.mxu1 %v6160_v48  ;;  %1432 = vmatpush.bf16.msrb.mxu2 %v6168_v50 }
 0x168   : > { %1508 = vmatpush.bf16.msrb.mxu3 %v6177_v41 }
 0x169   : > { %1797 = vmatpush.bf16.msra.mxu2 %v6207_v0 }
 0x16c   : > { %1509 = vmatpush.bf16.msrb.mxu3 %v6176_v38 }
 0x16d   : > { %1798 = vmatpush.bf16.msra.mxu2 %v6206_v4 }
 0x170   : > { %1874 = vmatpush.bf16.msra.mxu3 %v6215_v1 }
 0x171   : > { %1799 = vmatpush.bf16.msra.mxu2 %v6205_v8 }
 0x172   : > { %917 = vmatmul.bf16.gmra.mxu0 %v7040_v58  ;;  %994 = vmatmul.bf16.gmra.mxu1 %v7040_v58 }
 0x173   : > { %1071 = vmatmul.bf16.gmra.mxu2 %v7040_v58  ;;  %1148 = vmatmul.bf16.gmra.mxu3 %v7040_v58 }
 0x174   : > { %1875 = vmatpush.bf16.msra.mxu3 %v6214_v5 }
 0x175   : > { %1800 = vmatpush.bf16.msra.mxu2 %v6204_v11 }
 0x178   : > { %1876 = vmatpush.bf16.msra.mxu3 %v6213_v9 }
 0x179   : > { %1801 = vmatpush.bf16.msra.mxu2 %v6203_v15 }
 0x17c   : > { %1877 = vmatpush.bf16.msra.mxu3 %v6212_v12 }
 0x17d   : > { %1802 = vmatpush.bf16.msra.mxu2 %v6202_v19 }
 0x180   : > { %1878 = vmatpush.bf16.msra.mxu3 %v6211_v16 }
 0x184   : > { %1879 = vmatpush.bf16.msra.mxu3 %v6210_v20 }
 0x188   : > { %1880 = vmatpush.bf16.msra.mxu3 %v6209_v24 }
 0x18c   : > { %1881 = vmatpush.bf16.msra.mxu3 %v6208_v30 }
 0x1a9   : > { %v639_v17 = vpop.xlane.xlu0 %638 }
 0x1aa   : > { %v647_v18 = vmul.f32 %v639_v17, %v6914_v21  ;;  %v6186_v17 = vld [vmem:[%s6891_s27 + $0x10] sm:$0xff] }
 0x1ac   : > { %v655_v23 = vadd.f32 1e-05, %v647_v18  ;;  %v6194_v18 = vld [vmem:[%s6891_s27 + $0x50] sm:$0xff] }
 0x1ae   : > { %6411 = vrsqrt.f32 %v655_v23  ;;  %vm732_vm7 = vweird.f32 %v655_v23 }
 0x1b4   : > { %v6412_v42 = vpop.eup %6411 }
 0x1b5   : > { %v727_v33 = vmul.f32 %v6412_v42, %v655_v23  ;;  %vm733_vm6 = vweird.f32 %v6412_v42  ;;  %v6201_v23 = vld [vmem:[%s6891_s27 + $0x88] sm:$0xff] }
 0x1b6   : > { %vm734_vm8 = vmor %vm732_vm7, %vm733_vm6  ;;  %1803 = vmatpush.bf16.msra.mxu2 %v6201_v23 }
 0x1b7   : > { %v728_v46 = vmul.f32 %v6412_v42, %v727_v33 }
 0x1b9   : > { %v729_v52 = vmul.f32 0.5, %v728_v46 }
 0x1ba   : > { %1804 = vmatpush.bf16.msra.mxu2 %v6200_v29 }
 0x1bb   : > { %v730_v54 = vsub.f32 1.5, %v729_v52 }
 0x1bd   : > { %v731_v55 = vmul.f32 %v6412_v42, %v730_v54 }
 0x1bf   : > { %v735_v49 = vsel %vm734_vm8, %v6412_v42, %v731_v55 }
 0x1c0   : > { %v743_v57 = vmul.f32 %v735_v49, %v6991_v34  ;;  %v6191_v34 = vld [vmem:[%s6891_s27 + $0x38] sm:$0xff] }
 0x1c1   : > { %1643 = vmatpush.bf16.msra.mxu0 %v6191_v34 }
 0x1c2   : > { %v754_v59 = vmul.f32 %v7004_v61, %v743_v57  ;;  %v6199_v61 = vld [vmem:[%s6891_s27 + $0x78] sm:$0xff] }
 0x1c3   : > { %1720 = vmatpush.bf16.msra.mxu1 %v6199_v61 }
 0x1c4   : > { %v762_v44 = vpack.c.bf16 %v754_v59, %v754_v59 }
 0x1c5   : > { %1644 = vmatpush.bf16.msra.mxu0 %v6190_v2 }
 0x1c6   : > { %v842_v62 = vunpack.c.l.b16 %v762_v44 }
 0x1c7   : > { %1721 = vmatpush.bf16.msra.mxu1 %v6198_v3 }
 0x1c8   : > { %v7102_v63 = vpack.c.b16 %v842_v62, %v841_v60 }
 0x1c9   : > { %1645 = vmatpush.bf16.msra.mxu0 %v6189_v6 }
 0x1ca   : > { %922 = vmatmul.bf16.gmra.mxu0 %v7102_v63  ;;  %999 = vmatmul.bf16.gmra.mxu1 %v7102_v63 }
 0x1cb   : > { %1076 = vmatmul.bf16.gmra.mxu2 %v7102_v63  ;;  %1153 = vmatmul.bf16.gmra.mxu3 %v7102_v63 }
 0x1cc   : > { %1722 = vmatpush.bf16.msra.mxu1 %v6197_v7 }
 0x1cd   : > { %1646 = vmatpush.bf16.msra.mxu0 %v6188_v10 }
 0x1cf   : > { %v7156_v31 = vpop.f32.mrf.mxu0  ;;  %v7158_v32 = vpop.f32.mrf.mxu1 }
 0x1d0   : > { %1723 = vmatpush.bf16.msra.mxu1 %v6196_v26 }
 0x1d1   : > { %1647 = vmatpush.bf16.msra.mxu0 %v6187_v13 }
 0x1d4   : > { %1724 = vmatpush.bf16.msra.mxu1 %v6195_v14 }
 0x1d5   : > { %1648 = vmatpush.bf16.msra.mxu0 %v6186_v17 }
 0x1d6   : > { %v7160_v35 = vpop.f32.mrf.mxu2  ;;  %v7162_v37 = vpop.f32.mrf.mxu3 }
 0x1d7   : > { %v7164_v39 = vpop.f32.mrf.mxu0  ;;  %v7166_v42 = vpop.f32.mrf.mxu1 }
 0x1d8   : > { %1725 = vmatpush.bf16.msra.mxu1 %v6194_v18 }
 0x1d9   : > { %1649 = vmatpush.bf16.msra.mxu0 %v6185_v36 }
 0x1da   : > { %1279 = vmatmul.bf16.vlgmr.msrb.gmra.mxu0 %v7019_v28  ;;  %1356 = vmatmul.bf16.vlgmr.msrb.gmra.mxu1 %v7019_v28 }
 0x1db   : > { %1433 = vmatmul.bf16.vlgmr.msrb.gmra.mxu2 %v7019_v28  ;;  %1510 = vmatmul.bf16.vlgmr.msrb.gmra.mxu3 %v7019_v28 }
 0x1dc   : > { %1726 = vmatpush.bf16.msra.mxu1 %v6193_v22 }
 0x1dd   : > { %1650 = vmatpush.bf16.msra.mxu0 %v6184_v25 }
 0x1de   : > { %v7172_v43 = vpop.f32.mrf.mxu2  ;;  %v7174_v41 = vpop.f32.mrf.mxu3 }
 0x1df   : > { %v7176_v33 = vpop.f32.mrf.mxu0  ;;  %v7178_v45 = vpop.f32.mrf.mxu1 }
 0x1e0   : > { %1727 = vmatpush.bf16.msra.mxu1 %v6192_v27 }
 0x1e6   : > { %v7180_v46 = vpop.f32.mrf.mxu2  ;;  %v7182_v47 = vpop.f32.mrf.mxu3 }
 0x1e7   : > { %v7186_v48 = vpop.f32.mrf.mxu0  ;;  %v7188_v50 = vpop.f32.mrf.mxu1 }
 0x1ea   : > { %1284 = vmatmul.bf16.gmra.mxu0 %v7030_v51  ;;  %1361 = vmatmul.bf16.gmra.mxu1 %v7030_v51 }
 0x1eb   : > { %1438 = vmatmul.bf16.gmra.mxu2 %v7030_v51  ;;  %1515 = vmatmul.bf16.gmra.mxu3 %v7030_v51 }
 0x1ee   : > { %v7194_v38 = vpop.f32.mrf.mxu3 }
 0x1ef   : > { %v7196_v52 = vpop.f32.mrf.mxu0  ;;  %v7198_v53 = vpop.f32.mrf.mxu1 }
 0x1f6   : > { %v7206_v55 = vpop.f32.mrf.mxu3 }
 0x1f7   : > { %v7210_v56 = vpop.f32.mrf.mxu1 }
 0x1fa   : > { %1289 = vmatmul.bf16.gmra.mxu0 %v7040_v58  ;;  %1366 = vmatmul.bf16.gmra.mxu1 %v7040_v58 }
 0x1fb   : > { %1443 = vmatmul.bf16.gmra.mxu2 %v7040_v58  ;;  %1520 = vmatmul.bf16.gmra.mxu3 %v7040_v58 }
 0x1fe   : > { %v7214_v57 = vpop.f32.mrf.mxu3 }
 0x20a   : > { %1294 = vmatmul.bf16.gmra.mxu0 %v7102_v63  ;;  %1371 = vmatmul.bf16.gmra.mxu1 %v7102_v63 }
 0x20b   : > { %1448 = vmatmul.bf16.gmra.mxu2 %v7102_v63  ;;  %1525 = vmatmul.bf16.gmra.mxu3 %v7102_v63 }
 0x21a   : > { %1651 = vmatmul.bf16.vlgmr.msra.gmra.mxu0 %v7019_v28  ;;  %1728 = vmatmul.bf16.vlgmr.msra.gmra.mxu1 %v7019_v28 }
 0x21b   : > { %1805 = vmatmul.bf16.vlgmr.msra.gmra.mxu2 %v7019_v28  ;;  %1882 = vmatmul.bf16.vlgmr.msra.gmra.mxu3 %v7019_v28  ;;  %v7192_v28 = vpop.f32.mrf.mxu2 }
 0x223   : > { %v7204_v54 = vpop.f32.mrf.mxu2 }
 0x22a   : > { %1656 = vmatmul.bf16.gmra.mxu0 %v7030_v51  ;;  %1733 = vmatmul.bf16.gmra.mxu1 %v7030_v51 }
 0x22b   : > { %1810 = vmatmul.bf16.gmra.mxu2 %v7030_v51  ;;  %1887 = vmatmul.bf16.gmra.mxu3 %v7030_v51  ;;  %v7208_v51 = vpop.f32.mrf.mxu0  ;;  %v7212_v49 = vpop.f32.mrf.mxu2 }
 0x23a   : > { %1661 = vmatmul.bf16.gmra.mxu0 %v7040_v58  ;;  %1738 = vmatmul.bf16.gmra.mxu1 %v7040_v58 }
 0x23b   : > { %1815 = vmatmul.bf16.gmra.mxu2 %v7040_v58  ;;  %1892 = vmatmul.bf16.gmra.mxu3 %v7040_v58 }
 0x247   : > { %v7216_v40 = vpop.f32.mrf.mxu0  ;;  %v7218_v59 = vpop.f32.mrf.mxu1 }
 0x24a   : > { %1666 = vmatmul.bf16.gmra.mxu0 %v7102_v63  ;;  %1743 = vmatmul.bf16.gmra.mxu1 %v7102_v63 }
 0x24b   : > { %1820 = vmatmul.bf16.gmra.mxu2 %v7102_v63  ;;  %1897 = vmatmul.bf16.gmra.mxu3 %v7102_v63 }
 0x24e   : > { %v7224_v58 = vpop.f32.mrf.mxu2  ;;  %v7226_v44 = vpop.f32.mrf.mxu3 }
 0x24f   : > { %v7228_v60 = vpop.f32.mrf.mxu0  ;;  %v7230_v62 = vpop.f32.mrf.mxu1 }
 0x256   : > { %v7232_v34 = vpop.f32.mrf.mxu2  ;;  %v7234_v61 = vpop.f32.mrf.mxu3 }
 0x257   : > { %v1280_v0 = vpop.f32.mrf.mxu0  ;;  %v1357_v1 = vpop.f32.mrf.mxu1 }
 0x258   : > { %v1935_v22 = vpack.c.bf16 %v1280_v0, %v1280_v0  ;;  %v1943_v23 = vpack.c.bf16 %v1357_v1, %v1357_v1 }
 0x25a   : > { %v2024_v0 = vunpack.c.l.b16 %v1935_v22  ;;  %v2127_v1 = vunpack.c.l.b16 %v1943_v23 }
 0x25e   : > { %v7236_v2 = vpop.f32.mrf.mxu2  ;;  %v7238_v3 = vpop.f32.mrf.mxu3 }
 0x25f   : > { %v1282_v4 = vpop.f32.mrf.mxu0  ;;  %v1359_v63 = vpop.f32.mrf.mxu1  ;;  %v1951_v22 = vpack.c.bf16 %v7236_v2, %v7236_v2  ;;  %v1959_v23 = vpack.c.bf16 %v7238_v3, %v7238_v3 }
 0x260   : > { %v1936_v16 = vpack.c.bf16 %v1282_v4, %v1282_v4  ;;  %v1944_v17 = vpack.c.bf16 %v1359_v63, %v1359_v63 }
 0x262   : > { %v2025_v30 = vunpack.c.l.b16 %v1936_v16 }
 0x264   : > { %v2028_v16 = vpack.c.b16 %v2025_v30, %v2024_v0 }
 0x266   : > { %v1436_v5 = vpop.f32.mrf.mxu2  ;;  %v1513_v6 = vpop.f32.mrf.mxu3 }
 0x267   : > { %v1285_v7 = vpop.f32.mrf.mxu0  ;;  %v1362_v8 = vpop.f32.mrf.mxu1 }
 0x268   : > { %v1937_v9 = vpack.c.bf16 %v1285_v7, %v1285_v7  ;;  %v1945_v10 = vpack.c.bf16 %v1362_v8, %v1362_v8  ;;  %v2128_v7 = vunpack.c.l.b16 %v1944_v17 }
 0x26a   : > { %v2026_v18 = vunpack.c.l.b16 %v1937_v9  ;;  %v2129_v19 = vunpack.c.l.b16 %v1945_v10  ;;  %v2131_v17 = vpack.c.b16 %v2128_v7, %v2127_v1 }
 0x26e   : > { %v1439_v26 = vpop.f32.mrf.mxu2  ;;  %v1516_v11 = vpop.f32.mrf.mxu3 }
 0x26f   : > { %v1287_v12 = vpop.f32.mrf.mxu0  ;;  %v1364_v13 = vpop.f32.mrf.mxu1  ;;  %v1953_v27 = vpack.c.bf16 %v1439_v26, %v1439_v26  ;;  %v1961_v29 = vpack.c.bf16 %v1516_v11, %v1516_v11 }
 0x270   : > { %v1938_v14 = vpack.c.bf16 %v1287_v12, %v1287_v12  ;;  %v1946_v15 = vpack.c.bf16 %v1364_v13, %v1364_v13 }
 0x271   : > { %v2231_v26 = vunpack.c.l.b16 %v1953_v27  ;;  %v2333_v11 = vunpack.c.l.b16 %v1961_v29 }
 0x272   : > { %v2027_v20 = vunpack.c.l.b16 %v1938_v14  ;;  %v2130_v36 = vunpack.c.l.b16 %v1946_v15 }
 0x274   : > { %v2029_v24 = vpack.c.b16 %v2027_v20, %v2026_v18  ;;  %v2132_v25 = vpack.c.b16 %v2130_v36, %v2129_v19  ;;  %v1952_v18 = vpack.c.bf16 %v1436_v5, %v1436_v5  ;;  %v1960_v19 = vpack.c.bf16 %v1513_v6, %v1513_v6 }
 0x275   : > { %v1911_v5 = vpack.c.bf16 %v7158_v32, %v7158_v32 }
 0x276   : > { %v1441_v8 = vpop.f32.mrf.mxu2  ;;  %v1518_v21 = vpop.f32.mrf.mxu3  ;;  %v2041_v12 = vsel %vm2030_vm9, %v2029_v24, 0  ;;  %v2143_v4 = vsel %vm2030_vm9, %v2132_v25, 0  ;;  %v1912_v24 = vpack.c.bf16 %v7166_v42, %v7166_v42  ;;  %v1903_v25 = vpack.c.bf16 %v7156_v31, %v7156_v31 }
 0x277   : > { %v1954_v63 = vpack.c.bf16 %v1441_v8, %v1441_v8  ;;  %v1962_v9 = vpack.c.bf16 %v1518_v21, %v1518_v21  ;;  %v7242_v10 = vpop.f32.mrf.mxu0  ;;  %v7244_v13 = vpop.f32.mrf.mxu1  ;;  %2049 = vmatpush.bf16.xpose.msrb.mxu0 %v2041_v12  ;;  %2151 = vmatpush.bf16.xpose.msrb.mxu2 %v2143_v4  ;;  %v1904_v21 = vpack.c.bf16 %v7164_v39, %v7164_v39  ;;  %v2038_v39 = vsel %vm2030_vm9, %v2028_v16, 0 }
 0x278   : > { %v2140_v42 = vsel %vm2030_vm9, %v2131_v17, 0  ;;  %v2230_v29 = vunpack.c.l.b16 %v1952_v18  ;;  %v2332_v30 = vunpack.c.l.b16 %v1960_v19  ;;  %v2118_v32 = vunpack.c.l.b16 %v1912_v24 }
 0x279   : > { %v2232_v14 = vunpack.c.l.b16 %v1954_v63  ;;  %v2334_v15 = vunpack.c.l.b16 %v1962_v9  ;;  %v2015_v8 = vunpack.c.l.b16 %v1904_v21  ;;  %v2229_v12 = vunpack.c.l.b16 %v1951_v22 }
 0x27a   : > { %v2331_v4 = vunpack.c.l.b16 %v1959_v23  ;;  %v2014_v63 = vunpack.c.l.b16 %v1903_v25  ;;  %v2117_v9 = vunpack.c.l.b16 %v1911_v5  ;;  %v1905_v21 = vpack.c.bf16 %v7176_v33, %v7176_v33 }
 0x27b   : > { %v2234_v20 = vpack.c.b16 %v2232_v14, %v2231_v26  ;;  %v2336_v36 = vpack.c.b16 %v2334_v15, %v2333_v11  ;;  %v2233_v0 = vpack.c.b16 %v2230_v29, %v2229_v12  ;;  %v1913_v24 = vpack.c.bf16 %v7178_v45, %v7178_v45 }
 0x27c   : > { %v2335_v1 = vpack.c.b16 %v2332_v30, %v2331_v4  ;;  %v2018_v26 = vpack.c.b16 %v2015_v8, %v2014_v63  ;;  %v2121_v11 = vpack.c.b16 %v2118_v32, %v2117_v9 }
 0x27d   : > { %v2245_v3 = vsel %vm2030_vm9, %v2234_v20, 0  ;;  %v2347_v31 = vsel %vm2030_vm9, %v2336_v36, 0  ;;  %v2242_v18 = vsel %vm2030_vm9, %v2233_v0, 0  ;;  %v1906_v20 = vpack.c.bf16 %v7186_v48, %v7186_v48 }
 0x27e   : > { %v7258_v6 = vpop.f32.mrf.mxu2  ;;  %v7260_v27 = vpop.f32.mrf.mxu3  ;;  %v2344_v19 = vsel %vm2030_vm9, %v2335_v1, 0  ;;  %v1914_v36 = vpack.c.bf16 %v7188_v50, %v7188_v50  ;;  %v2016_v48 = vunpack.c.l.b16 %v1905_v21  ;;  %v2119_v8 = vunpack.c.l.b16 %v1913_v24 }
 0x27f   : > { %v1292_v2 = vpop.f32.mrf.mxu0  ;;  %v1369_v7 = vpop.f32.mrf.mxu1  ;;  %2050 = vmatpush.bf16.xpose.msrb.mxu0 %v2038_v39  ;;  %2152 = vmatpush.bf16.xpose.msrb.mxu2 %v2140_v42  ;;  %v2017_v39 = vunpack.c.l.b16 %v1906_v20  ;;  %v1939_v0 = vpack.c.bf16 %v7242_v10, %v7242_v10  ;;  %v1947_v1 = vpack.c.bf16 %v7244_v13, %v7244_v13 }
 0x280   : > { %v2120_v42 = vunpack.c.l.b16 %v1914_v36  ;;  %v1940_v32 = vpack.c.bf16 %v1292_v2, %v1292_v2  ;;  %v1948_v50 = vpack.c.bf16 %v1369_v7, %v1369_v7 }
 0x281   : > { %v2019_v9 = vpack.c.b16 %v2017_v39, %v2016_v48 }
 0x282   : > { %v2122_v45 = vpack.c.b16 %v2120_v42, %v2119_v8 }
 0x286   : > { %v7266_v14 = vpop.f32.mrf.mxu2  ;;  %v7268_v15 = vpop.f32.mrf.mxu3  ;;  %5644 = vmatmul.msk.bf16.vlgmr.msrb.gmra.mxu0 %vm2030_vm9, %v2018_v26  ;;  %5648 = vmatmul.msk.bf16.vlgmr.msrb.gmra.mxu2 %vm2030_vm9, %v2121_v11 }
 0x287   : > { %2253 = vmatpush.bf16.xpose.msra.mxu0 %v2245_v3  ;;  %2355 = vmatpush.bf16.xpose.msra.mxu2 %v2347_v31  ;;  %v1295_v16 = vpop.f32.mrf.mxu0  ;;  %v1372_v17 = vpop.f32.mrf.mxu1 }
 0x288   : > { %v1941_v22 = vpack.c.bf16 %v1295_v16, %v1295_v16  ;;  %v1949_v23 = vpack.c.bf16 %v1372_v17, %v1372_v17 }
 0x28a   : > { %v2078_v12 = vunpack.c.l.b16 %v1941_v22  ;;  %v2180_v4 = vunpack.c.l.b16 %v1949_v23  ;;  %v2076_v22 = vunpack.c.l.b16 %v1939_v0  ;;  %v2178_v23 = vunpack.c.l.b16 %v1947_v1 }
 0x28e   : > { %v1449_v25 = vpop.f32.mrf.mxu2  ;;  %v1526_v5 = vpop.f32.mrf.mxu3 }
 0x28f   : > { %2254 = vmatpush.bf16.xpose.msra.mxu0 %v2242_v18  ;;  %2356 = vmatpush.bf16.xpose.msra.mxu2 %v2344_v19  ;;  %v1297_v29 = vpop.f32.mrf.mxu0  ;;  %v1374_v30 = vpop.f32.mrf.mxu1  ;;  %v1957_v16 = vpack.c.bf16 %v1449_v25, %v1449_v25  ;;  %v1965_v17 = vpack.c.bf16 %v1526_v5, %v1526_v5  ;;  %v2077_v18 = vunpack.c.l.b16 %v1940_v32  ;;  %v2179_v19 = vunpack.c.l.b16 %v1948_v50 }
 0x290   : > { %v1942_v3 = vpack.c.bf16 %v1297_v29, %v1297_v29  ;;  %v1950_v31 = vpack.c.bf16 %v1374_v30, %v1374_v30  ;;  %v1919_v32 = vpack.c.bf16 %v7160_v35, %v7160_v35  ;;  %v1927_v50 = vpack.c.bf16 %v7162_v37, %v7162_v37 }
 0x291   : > { %v2282_v25 = vunpack.c.l.b16 %v1957_v16  ;;  %v2384_v5 = vunpack.c.l.b16 %v1965_v17  ;;  %v2080_v29 = vpack.c.b16 %v2077_v18, %v2076_v22  ;;  %v2182_v30 = vpack.c.b16 %v2179_v19, %v2178_v23 }
 0x292   : > { %v2079_v33 = vunpack.c.l.b16 %v1942_v3  ;;  %v2181_v63 = vunpack.c.l.b16 %v1950_v31  ;;  %v1956_v3 = vpack.c.bf16 %v7266_v14, %v7266_v14  ;;  %v1964_v31 = vpack.c.bf16 %v7268_v15, %v7268_v15 }
 0x293   : > { %v1920_v14 = vpack.c.bf16 %v7172_v43, %v7172_v43  ;;  %v1928_v15 = vpack.c.bf16 %v7174_v41, %v7174_v41  ;;  %v1963_v35 = vpack.c.bf16 %v7260_v27, %v7260_v27  ;;  %v1907_v37 = vpack.c.bf16 %v7196_v52, %v7196_v52 }
 0x294   : > { %v2081_v26 = vpack.c.b16 %v2079_v33, %v2078_v12  ;;  %v2183_v11 = vpack.c.b16 %v2181_v63, %v2180_v4  ;;  %v1908_v12 = vpack.c.bf16 %v7208_v51, %v7208_v51  ;;  %v1916_v4 = vpack.c.bf16 %v7210_v56, %v7210_v56 }
 0x295   : > { %v1955_v33 = vpack.c.bf16 %v7258_v6, %v7258_v6  ;;  %v1915_v51 = vpack.c.bf16 %v7198_v53, %v7198_v53  ;;  %v2089_v43 = vsel %vm2030_vm9, %v2080_v29, 0  ;;  %v2191_v41 = vsel %vm2030_vm9, %v2182_v30, 0 }
 0x296   : > { %v1451_v2 = vpop.f32.mrf.mxu2  ;;  %v1528_v7 = vpop.f32.mrf.mxu3  ;;  %5645 = vmatmul.msk.bf16.gmra.mxu0 %vm2030_vm9, %v2019_v9  ;;  %5649 = vmatmul.msk.bf16.gmra.mxu2 %vm2030_vm9, %v2122_v45  ;;  %v2092_v20 = vsel %vm2030_vm9, %v2081_v26, 0  ;;  %v2194_v36 = vsel %vm2030_vm9, %v2183_v11, 0  ;;  %v2281_v9 = vunpack.c.l.b16 %v1956_v3  ;;  %v2383_v45 = vunpack.c.l.b16 %v1964_v31 }
 0x297   : > { %v1958_v10 = vpack.c.bf16 %v1451_v2, %v1451_v2  ;;  %v1966_v21 = vpack.c.bf16 %v1528_v7, %v1528_v7  ;;  %v7290_v24 = vpop.f32.mrf.mxu0  ;;  %v7292_v13 = vpop.f32.mrf.mxu1  ;;  %2100 = vmatpush.bf16.xpose.msrb.mxu1 %v2092_v20  ;;  %2202 = vmatpush.bf16.xpose.msrb.mxu3 %v2194_v36  ;;  %v2067_v27 = vunpack.c.l.b16 %v1908_v12  ;;  %v2169_v1 = vunpack.c.l.b16 %v1916_v4 }
 0x298   : > { %v2220_v26 = vunpack.c.l.b16 %v1920_v14  ;;  %v2322_v11 = vunpack.c.l.b16 %v1928_v15  ;;  %v2280_v16 = vunpack.c.l.b16 %v1955_v33  ;;  %v2382_v17 = vunpack.c.l.b16 %v1963_v35 }
 0x299   : > { %v2283_v39 = vunpack.c.l.b16 %v1958_v10  ;;  %v2385_v42 = vunpack.c.l.b16 %v1966_v21  ;;  %v2066_v18 = vunpack.c.l.b16 %v1907_v37  ;;  %v2168_v19 = vunpack.c.l.b16 %v1915_v51 }
 0x29a   : > { %v2219_v2 = vunpack.c.l.b16 %v1919_v32  ;;  %v2321_v7 = vunpack.c.l.b16 %v1927_v50  ;;  %v2284_v20 = vpack.c.b16 %v2281_v9, %v2280_v16  ;;  %v2386_v36 = vpack.c.b16 %v2383_v45, %v2382_v17 }
 0x29b   : > { %v2285_v48 = vpack.c.b16 %v2283_v39, %v2282_v25  ;;  %v2387_v8 = vpack.c.b16 %v2385_v42, %v2384_v5  ;;  %v2070_v10 = vpack.c.b16 %v2067_v27, %v2066_v18  ;;  %v2172_v21 = vpack.c.b16 %v2169_v1, %v2168_v19 }
 0x29c   : > { %v2223_v22 = vpack.c.b16 %v2220_v26, %v2219_v2  ;;  %v2325_v23 = vpack.c.b16 %v2322_v11, %v2321_v7  ;;  %v2293_v29 = vsel %vm2030_vm9, %v2284_v20, 0  ;;  %v2395_v30 = vsel %vm2030_vm9, %v2386_v36, 0 }
 0x29d   : > { %v2296_v52 = vsel %vm2030_vm9, %v2285_v48, 0  ;;  %v2398_v53 = vsel %vm2030_vm9, %v2387_v8, 0  ;;  %v1910_v3 = vpack.c.bf16 %v7228_v60, %v7228_v60  ;;  %v1918_v31 = vpack.c.bf16 %v7230_v62, %v7230_v62 }
 0x29e   : > { %v7318_v63 = vpop.f32.mrf.mxu2  ;;  %v7320_v56 = vpop.f32.mrf.mxu3  ;;  %v1922_v48 = vpack.c.bf16 %v7192_v28, %v7192_v28  ;;  %v1930_v8 = vpack.c.bf16 %v7194_v38, %v7194_v38  ;;  %v1909_v32 = vpack.c.bf16 %v7216_v40, %v7216_v40  ;;  %v1917_v50 = vpack.c.bf16 %v7218_v59, %v7218_v59 }
 0x29f   : > { %v7324_v6 = vpop.f32.mrf.mxu0  ;;  %v7326_v0 = vpop.f32.mrf.mxu1  ;;  %2101 = vmatpush.bf16.xpose.msrb.mxu1 %v2089_v43  ;;  %2203 = vmatpush.bf16.xpose.msrb.mxu3 %v2191_v41  ;;  %v1921_v60 = vpack.c.bf16 %v7180_v46, %v7180_v46  ;;  %v1929_v62 = vpack.c.bf16 %v7182_v47, %v7182_v47  ;;  %v2069_v28 = vunpack.c.l.b16 %v1910_v3  ;;  %v2171_v33 = vunpack.c.l.b16 %v1918_v31 }
 0x2a0   : > { %v2222_v37 = vunpack.c.l.b16 %v1922_v48  ;;  %v2324_v51 = vunpack.c.l.b16 %v1930_v8  ;;  %v2068_v41 = vunpack.c.l.b16 %v1909_v32  ;;  %v2170_v59 = vunpack.c.l.b16 %v1917_v50 }
 0x2a1   : > { %v1968_v9 = vpack.c.bf16 %v7324_v6, %v7324_v6  ;;  %v1976_v45 = vpack.c.bf16 %v7326_v0, %v7326_v0  ;;  %v2221_v27 = vunpack.c.l.b16 %v1921_v60  ;;  %v2323_v1 = vunpack.c.l.b16 %v1929_v62 }
 0x2a2   : > { %v2071_v26 = vpack.c.b16 %v2069_v28, %v2068_v41  ;;  %v2173_v11 = vpack.c.b16 %v2171_v33, %v2170_v59  ;;  %v1967_v16 = vpack.c.bf16 %v7290_v24, %v7290_v24  ;;  %v1975_v17 = vpack.c.bf16 %v7292_v13, %v7292_v13 }
 0x2a3   : > { %v2224_v6 = vpack.c.b16 %v2222_v37, %v2221_v27  ;;  %v2326_v2 = vpack.c.b16 %v2324_v51, %v2323_v1  ;;  %v2858_v20 = vunpack.c.l.b16 %v1968_v9  ;;  %v2952_v36 = vunpack.c.l.b16 %v1976_v45 }
 0x2a4   : > { %v1991_v3 = vpack.c.bf16 %v7320_v56, %v7320_v56  ;;  %v1924_v60 = vpack.c.bf16 %v7212_v49, %v7212_v49  ;;  %v1923_v28 = vpack.c.bf16 %v7204_v54, %v7204_v54  ;;  %v1931_v33 = vpack.c.bf16 %v7206_v55, %v7206_v55 }
 0x2a5   : > { %v1925_v27 = vpack.c.bf16 %v7224_v58, %v7224_v58  ;;  %v1933_v1 = vpack.c.bf16 %v7226_v44, %v7226_v44 }
 0x2a6   : > { %v7330_v25 = vpop.f32.mrf.mxu2  ;;  %v7332_v5 = vpop.f32.mrf.mxu3  ;;  %5646 = vmatmul.msk.bf16.vlgmr.msrb.gmra.mxu1 %vm2030_vm9, %v2070_v10  ;;  %5650 = vmatmul.msk.bf16.vlgmr.msrb.gmra.mxu3 %vm2030_vm9, %v2172_v21  ;;  %v3139_v62 = vunpack.c.l.b16 %v1991_v3  ;;  %v2270_v41 = vunpack.c.l.b16 %v1923_v28  ;;  %v2372_v59 = vunpack.c.l.b16 %v1931_v33 }
 0x2a7   : > { %2304 = vmatpush.bf16.xpose.msra.mxu1 %v2296_v52  ;;  %2406 = vmatpush.bf16.xpose.msra.mxu3 %v2398_v53  ;;  %v1657_v39 = vpop.f32.mrf.mxu0  ;;  %v1734_v42 = vpop.f32.mrf.mxu1  ;;  %v1984_v10 = vpack.c.bf16 %v7330_v25, %v7330_v25  ;;  %v1992_v24 = vpack.c.bf16 %v7332_v5, %v7332_v5  ;;  %v2857_v25 = vunpack.c.l.b16 %v1967_v16 }
 0x2a8   : > { %5652 = vmatmul.msk.bf16.vlgmr.msra.gmra.mxu0 %vm2030_vm9, %v2223_v22  ;;  %5656 = vmatmul.msk.bf16.vlgmr.msra.gmra.mxu2 %vm2030_vm9, %v2325_v23  ;;  %v1969_v12 = vpack.c.bf16 %v1657_v39, %v1657_v39  ;;  %v1977_v4 = vpack.c.bf16 %v1734_v42, %v1734_v42 }
 0x2a9   : > { %v2861_v32 = vpack.c.b16 %v2858_v20, %v2857_v25 }
 0x2aa   : > { %v2859_v46 = vunpack.c.l.b16 %v1969_v12  ;;  %v2953_v52 = vunpack.c.l.b16 %v1977_v4  ;;  %v3046_v12 = vunpack.c.l.b16 %v1984_v10  ;;  %v3140_v4 = vunpack.c.l.b16 %v1992_v24 }
 0x2ae   : > { %v1811_v14 = vpop.f32.mrf.mxu2  ;;  %v1888_v15 = vpop.f32.mrf.mxu3 }
 0x2af   : > { %2305 = vmatpush.bf16.xpose.msra.mxu1 %v2293_v29  ;;  %2407 = vmatpush.bf16.xpose.msra.mxu3 %v2395_v30  ;;  %v1659_v35 = vpop.f32.mrf.mxu0  ;;  %v1736_v38 = vpop.f32.mrf.mxu1  ;;  %v1985_v7 = vpack.c.bf16 %v1811_v14, %v1811_v14  ;;  %v1993_v0 = vpack.c.bf16 %v1888_v15, %v1888_v15  ;;  %v2951_v29 = vunpack.c.l.b16 %v1975_v17  ;;  %v1983_v30 = vpack.c.bf16 %v7318_v63, %v7318_v63 }
 0x2b0   : > { %v1970_v40 = vpack.c.bf16 %v1659_v35, %v1659_v35  ;;  %v1978_v43 = vpack.c.bf16 %v1736_v38, %v1736_v38  ;;  %v1932_v63 = vpack.c.bf16 %v7214_v57, %v7214_v57  ;;  %v3143_v57 = vpack.c.b16 %v3140_v4, %v3139_v62 }
 0x2b1   : > { %v3047_v5 = vunpack.c.l.b16 %v1985_v7  ;;  %v3141_v31 = vunpack.c.l.b16 %v1993_v0  ;;  %v2955_v50 = vpack.c.b16 %v2952_v36, %v2951_v29  ;;  %v3045_v56 = vunpack.c.l.b16 %v1983_v30 }
 0x2b2   : > { %v2860_v53 = vunpack.c.l.b16 %v1970_v40  ;;  %v2954_v47 = vunpack.c.l.b16 %v1978_v43  ;;  %v2271_v40 = vunpack.c.l.b16 %v1924_v60  ;;  %v2373_v43 = vunpack.c.l.b16 %v1932_v63 }
 0x2b3   : > { %v3049_v51 = vpack.c.b16 %v3046_v12, %v3045_v56  ;;  %v2272_v36 = vunpack.c.l.b16 %v1925_v27 }
 0x2b4   : > { %v2862_v18 = vpack.c.b16 %v2860_v53, %v2859_v46  ;;  %v2956_v19 = vpack.c.b16 %v2954_v47, %v2953_v52  ;;  %v2274_v9 = vpack.c.b16 %v2271_v40, %v2270_v41  ;;  %v2376_v45 = vpack.c.b16 %v2373_v43, %v2372_v59 }
 0x2b5   : > { %v1926_v53 = vpack.c.bf16 %v7232_v34, %v7232_v34  ;;  %v1934_v47 = vpack.c.bf16 %v7234_v61, %v7234_v61  ;;  %v2374_v61 = vunpack.c.l.b16 %v1933_v1 }
 0x2b6   : > { %v1813_v21 = vpop.f32.mrf.mxu2  ;;  %v1890_v22 = vpop.f32.mrf.mxu3  ;;  %5647 = vmatmul.msk.bf16.gmra.mxu1 %vm2030_vm9, %v2071_v26  ;;  %5651 = vmatmul.msk.bf16.gmra.mxu3 %vm2030_vm9, %v2173_v11 }
 0x2b7   : > { %v1986_v13 = vpack.c.bf16 %v1813_v21, %v1813_v21  ;;  %v1994_v23 = vpack.c.bf16 %v1890_v22, %v1890_v22  ;;  %v7372_v39 = vpop.f32.mrf.mxu0  ;;  %v7374_v42 = vpop.f32.mrf.mxu1  ;;  %2877 = vmatpush.bf16.msrb.mxu0 %v2862_v18  ;;  %2971 = vmatpush.bf16.msrb.mxu2 %v2956_v19  ;;  %v2273_v18 = vunpack.c.l.b16 %v1926_v53  ;;  %v2375_v19 = vunpack.c.l.b16 %v1934_v47 }
 0x2b8   : > { %5653 = vmatmul.msk.bf16.gmra.mxu0 %vm2030_vm9, %v2224_v6  ;;  %5657 = vmatmul.msk.bf16.gmra.mxu2 %vm2030_vm9, %v2326_v2  ;;  %v1971_v58 = vpack.c.bf16 %v7372_v39, %v7372_v39  ;;  %v1979_v44 = vpack.c.bf16 %v7374_v42, %v7374_v42 }
 0x2b9   : > { %v3048_v48 = vunpack.c.l.b16 %v1986_v13  ;;  %v3142_v8 = vunpack.c.l.b16 %v1994_v23  ;;  %v2275_v13 = vpack.c.b16 %v2273_v18, %v2272_v36  ;;  %v2377_v23 = vpack.c.b16 %v2375_v19, %v2374_v61 }
 0x2bb   : > { %v3050_v14 = vpack.c.b16 %v3048_v48, %v3047_v5  ;;  %v3144_v15 = vpack.c.b16 %v3142_v8, %v3141_v31  ;;  %2878 = vmatpush.bf16.msrb.mxu0 %v2861_v32  ;;  %2972 = vmatpush.bf16.msrb.mxu2 %v2955_v50  ;;  %v2904_v48 = vunpack.c.l.b16 %v1971_v58  ;;  %v2998_v8 = vunpack.c.l.b16 %v1979_v44 }
 0x2be   : > { %v7388_v35 = vpop.f32.mrf.mxu2  ;;  %v7390_v38 = vpop.f32.mrf.mxu3 }
 0x2bf   : > { %3065 = vmatpush.bf16.msra.mxu0 %v3050_v14  ;;  %3159 = vmatpush.bf16.msra.mxu2 %v3144_v15  ;;  %v1664_v49 = vpop.f32.mrf.mxu0  ;;  %v1741_v37 = vpop.f32.mrf.mxu1  ;;  %v1987_v14 = vpack.c.bf16 %v7388_v35, %v7388_v35  ;;  %v1995_v15 = vpack.c.bf16 %v7390_v38, %v7390_v38  ;;  %v1999_v38 = vlaneseq }
 0x2c0   : > { %v1972_v7 = vpack.c.bf16 %v1664_v49, %v1664_v49  ;;  %v1980_v0 = vpack.c.bf16 %v1741_v37, %v1741_v37 }
 0x2c1   : > { %v3092_v40 = vunpack.c.l.b16 %v1987_v14  ;;  %v3186_v43 = vunpack.c.l.b16 %v1995_v15  ;;  %v2000_v59 = vshrl.u32 %v1999_v38, 7 }
 0x2c2   : > { %v2905_v25 = vunpack.c.l.b16 %v1972_v7  ;;  %v2999_v29 = vunpack.c.l.b16 %v1980_v0 }
 0x2c3   : > { %3066 = vmatpush.bf16.msra.mxu0 %v3049_v51  ;;  %3160 = vmatpush.bf16.msra.mxu2 %v3143_v57  ;;  %v2001_v53 = vadd.s32 8, %v2000_v59 }
 0x2c4   : > { %v2908_v60 = vpack.c.b16 %v2905_v25, %v2904_v48  ;;  %v3002_v63 = vpack.c.b16 %v2999_v29, %v2998_v8 }
 0x2c6   : > { %v1818_v54 = vpop.f32.mrf.mxu2  ;;  %v1895_v46 = vpop.f32.mrf.mxu3  ;;  %5654 = vmatmul.msk.bf16.vlgmr.msra.gmra.mxu1 %vm2030_vm9, %v2274_v9  ;;  %5658 = vmatmul.msk.bf16.vlgmr.msra.gmra.mxu3 %vm2030_vm9, %v2376_v45  ;;  %v2005_v9 = vand.u32 127, %v1999_v38 }
 0x2c7   : > { %v1667_v55 = vpop.f32.mrf.mxu0  ;;  %v1744_v52 = vpop.f32.mrf.mxu1  ;;  %v1988_v32 = vpack.c.bf16 %v1818_v54, %v1818_v54  ;;  %v1996_v42 = vpack.c.bf16 %v1895_v46, %v1895_v46 }
 0x2c8   : > { %v1973_v26 = vpack.c.bf16 %v1667_v55, %v1667_v55  ;;  %v1981_v11 = vpack.c.bf16 %v1744_v52, %v1744_v52  ;;  %vm7412_vm10 = vcmp.ge.s32.totalorder %v2000_v59, %v2005_v9  ;;  %vm7428_vm11 = vcmp.ge.s32.totalorder %v2001_v53, %v2005_v9 }
 0x2c9   : > { %v3093_v49 = vunpack.c.l.b16 %v1988_v32  ;;  %v3187_v37 = vunpack.c.l.b16 %v1996_v42 }
 0x2ca   : > { %v2906_v10 = vunpack.c.l.b16 %v1973_v26  ;;  %v3000_v21 = vunpack.c.l.b16 %v1981_v11 }
 0x2cb   : > { %v3096_v35 = vpack.c.b16 %v3093_v49, %v3092_v40  ;;  %v3190_v41 = vpack.c.b16 %v3187_v37, %v3186_v43 }
 0x2ce   : > { %v1821_v16 = vpop.f32.mrf.mxu2  ;;  %v1898_v17 = vpop.f32.mrf.mxu3 }
 0x2cf   : > { %v1669_v6 = vpop.f32.mrf.mxu0  ;;  %v1746_v2 = vpop.f32.mrf.mxu1  ;;  %v1989_v5 = vpack.c.bf16 %v1821_v16, %v1821_v16  ;;  %v1997_v31 = vpack.c.bf16 %v1898_v17, %v1898_v17  ;;  %v2002_v17 = vadd.s32 16, %v2000_v59 }
 0x2d0   : > { %v1974_v34 = vpack.c.bf16 %v1669_v6, %v1669_v6  ;;  %v1982_v20 = vpack.c.bf16 %v1746_v2, %v1746_v2 }
 0x2d1   : > { %v3094_v56 = vunpack.c.l.b16 %v1989_v5  ;;  %v3188_v62 = vunpack.c.l.b16 %v1997_v31  ;;  %vm7444_vm12 = vcmp.ge.s32.totalorder %v2002_v17, %v2005_v9 }
 0x2d2   : > { %v2907_v22 = vunpack.c.l.b16 %v1974_v34  ;;  %v3001_v24 = vunpack.c.l.b16 %v1982_v20  ;;  %v2003_v20 = vadd.s32 24, %v2000_v59 }
 0x2d4   : > { %v2909_v30 = vpack.c.b16 %v2907_v22, %v2906_v10  ;;  %v3003_v3 = vpack.c.b16 %v3001_v24, %v3000_v21  ;;  %vm7460_vm13 = vcmp.ge.s32.totalorder %v2003_v20, %v2005_v9 }
 0x2d6   : > { %v1823_v50 = vpop.f32.mrf.mxu2  ;;  %v1900_v39 = vpop.f32.mrf.mxu3  ;;  %5655 = vmatmul.msk.bf16.gmra.mxu1 %vm2030_vm9, %v2275_v13  ;;  %5659 = vmatmul.msk.bf16.gmra.mxu3 %vm2030_vm9, %v2377_v23 }
 0x2d7   : > { %v1990_v12 = vpack.c.bf16 %v1823_v50, %v1823_v50  ;;  %v1998_v4 = vpack.c.bf16 %v1900_v39, %v1900_v39  ;;  %2924 = vmatpush.bf16.msrb.mxu1 %v2909_v30  ;;  %3018 = vmatpush.bf16.msrb.mxu3 %v3003_v3 }
 0x2d9   : > { %v3095_v28 = vunpack.c.l.b16 %v1990_v12  ;;  %v3189_v33 = vunpack.c.l.b16 %v1998_v4 }
 0x2db   : > { %v3097_v51 = vpack.c.b16 %v3095_v28, %v3094_v56  ;;  %v3191_v57 = vpack.c.b16 %v3189_v33, %v3188_v62  ;;  %2925 = vmatpush.bf16.msrb.mxu1 %v2908_v60  ;;  %3019 = vmatpush.bf16.msrb.mxu3 %v3002_v63 }
 0x2df   : > { %3112 = vmatpush.bf16.msra.mxu1 %v3097_v51  ;;  %3206 = vmatpush.bf16.msra.mxu3 %v3191_v57 }
 0x2e3   : > { %3113 = vmatpush.bf16.msra.mxu1 %v3096_v35  ;;  %3207 = vmatpush.bf16.msra.mxu3 %v3190_v41 }
 0x303   : > { %v2052_v54 = vpop.f32.mrf.mxu0 }
 0x304   : > { %v7418_v46 = vsel %vm7412_vm10, %v2052_v54, -1e+30 }
 0x305   : > { %v2459_v55 = vsel %vm2030_vm9, %v7418_v46, -inf }
 0x306   : > { %2460 = vmax.xlane.f32.xlu0 %v2459_v55 }
 0x309   : > { %v2154_v52 = vpop.f32.mrf.mxu2 }
 0x30a   : > { %v7424_v47 = vsel %vm7412_vm10, %v2154_v52, -1e+30 }
 0x30b   : > { %v2054_v27 = vpop.f32.mrf.mxu0  ;;  %v2483_v1 = vsel %vm2030_vm9, %v7424_v47, -inf }
 0x30c   : > { %2484 = vmax.xlane.f32.xlu1 %v2483_v1  ;;  %v7434_v11 = vsel %vm7428_vm11, %v2054_v27, -1e+30 }
 0x30d   : > { %v2462_v2 = vsel %vm2030_vm9, %v7434_v11, -inf }
 0x311   : > { %v2156_v16 = vpop.f32.mrf.mxu2 }
 0x312   : > { %v7438_v18 = vsel %vm7428_vm11, %v2156_v16, -1e+30 }
 0x313   : > { %v2057_v19 = vpop.f32.mrf.mxu0  ;;  %v2486_v6 = vsel %vm2030_vm9, %v7438_v18, -inf }
 0x314   : > { %2487 = vmax.xlane.f32.xlu2 %v2486_v6  ;;  %2463 = vmax.xlane.f32.xlu1 %v2462_v2  ;;  %v7450_v0 = vsel %vm7444_vm12, %v2057_v19, -1e+30 }
 0x315   : > { %v2465_v44 = vsel %vm2030_vm9, %v7450_v0, -inf }
 0x319   : > { %v2159_v34 = vpop.f32.mrf.mxu2 }
 0x31a   : > { %v7454_v36 = vsel %vm7444_vm12, %v2159_v34, -1e+30 }
 0x31b   : > { %v2059_v61 = vpop.f32.mrf.mxu0  ;;  %v2489_v58 = vsel %vm2030_vm9, %v7454_v36, -inf }
 0x31c   : > { %2490 = vmax.xlane.f32.xlu2 %v2489_v58  ;;  %2466 = vmax.xlane.f32.xlu1 %v2465_v44  ;;  %v7466_v21 = vsel %vm7460_vm13, %v2059_v61, -1e+30 }
 0x31d   : > { %v2468_v25 = vsel %vm2030_vm9, %v7466_v21, -inf }
 0x321   : > { %v2161_v22 = vpop.f32.mrf.mxu2 }
 0x322   : > { %v7470_v24 = vsel %vm7460_vm13, %v2161_v22, -1e+30 }
 0x323   : > { %v2103_v13 = vpop.f32.mrf.mxu1  ;;  %v2492_v23 = vsel %vm2030_vm9, %v7470_v24, -inf }
 0x324   : > { %v7478_v29 = vsel %vm7412_vm10, %v2103_v13, -1e+30  ;;  %2493 = vmax.xlane.f32.xlu0 %v2492_v23  ;;  %2469 = vmax.xlane.f32.xlu2 %v2468_v25 }
 0x325   : > { %v2256_v30 = vpop.f32.mrf.mxu0  ;;  %v2471_v3 = vsel %vm2030_vm9, %v7478_v29, -inf }
 0x326   : > { %2472 = vmax.xlane.f32.xlu1 %v2471_v3  ;;  %v7484_v5 = vsel %vm7412_vm10, %v2256_v30, -1e+30 }
 0x327   : > { %v2507_v50 = vsel %vm2030_vm9, %v7484_v5, -inf }
 0x329   : > { %v2205_v31 = vpop.f32.mrf.mxu3 }
 0x32a   : > { %v7502_v14 = vsel %vm7412_vm10, %v2205_v31, -1e+30 }
 0x32b   : > { %v2358_v48 = vpop.f32.mrf.mxu2  ;;  %v2105_v32 = vpop.f32.mrf.mxu1  ;;  %v2495_v62 = vsel %vm2030_vm9, %v7502_v14, -inf }
 0x32c   : > { %v7488_v8 = vsel %vm7412_vm10, %v2358_v48, -1e+30  ;;  %2508 = vmax.xlane.f32.xlu0 %v2507_v50  ;;  %v7506_v60 = vsel %vm7428_vm11, %v2105_v32, -1e+30 }
 0x32d   : > { %v2258_v39 = vpop.f32.mrf.mxu0  ;;  %v2531_v42 = vsel %vm2030_vm9, %v7488_v8, -inf  ;;  %v2474_v33 = vsel %vm2030_vm9, %v7506_v60, -inf }
 0x32e   : > { %2532 = vmax.xlane.f32.xlu2 %v2531_v42  ;;  %v7496_v12 = vsel %vm7428_vm11, %v2258_v39, -1e+30 }
 0x32f   : > { %v2510_v4 = vsel %vm2030_vm9, %v7496_v12, -inf }
 0x330   : > { %2511 = vmax.xlane.f32.xlu1 %v2510_v4 }
 0x331   : > { %v2207_v15 = vpop.f32.mrf.mxu3 }
 0x332   : > { %v7512_v28 = vsel %vm7428_vm11, %v2207_v15, -1e+30 }
 0x333   : > { %v2360_v63 = vpop.f32.mrf.mxu2  ;;  %v2108_v56 = vpop.f32.mrf.mxu1  ;;  %v2498_v37 = vsel %vm2030_vm9, %v7512_v28, -inf }
 0x334   : > { %2496 = vmax.xlane.f32.xlu0 %v2495_v62  ;;  %v7520_v51 = vsel %vm7428_vm11, %v2360_v63, -1e+30  ;;  %v7538_v54 = vsel %vm7444_vm12, %v2108_v56, -1e+30 }
 0x335   : > { %v2261_v49 = vpop.f32.mrf.mxu0  ;;  %v2534_v38 = vsel %vm2030_vm9, %v7520_v51, -inf  ;;  %v2477_v27 = vsel %vm2030_vm9, %v7538_v54, -inf }
 0x336   : > { %2475 = vmax.xlane.f32.xlu2 %v2474_v33  ;;  %v7524_v57 = vsel %vm7444_vm12, %v2261_v49, -1e+30 }
 0x337   : > { %v2513_v59 = vsel %vm2030_vm9, %v7524_v57, -inf }
 0x338   : > { %2499 = vmax.xlane.f32.xlu1 %v2498_v37 }
 0x339   : > { %v2210_v40 = vpop.f32.mrf.mxu3 }
 0x33a   : > { %v7542_v55 = vsel %vm7444_vm12, %v2210_v40, -1e+30 }
 0x33b   : > { %v2363_v43 = vpop.f32.mrf.mxu2  ;;  %v2110_v41 = vpop.f32.mrf.mxu1  ;;  %v2501_v16 = vsel %vm2030_vm9, %v7542_v55, -inf }
 0x33c   : > { %v7528_v35 = vsel %vm7444_vm12, %v2363_v43, -1e+30  ;;  %2535 = vmax.xlane.f32.xlu0 %v2534_v38  ;;  %v7548_v1 = vsel %vm7460_vm13, %v2110_v41, -1e+30 }
 0x33d   : > { %v2537_v9 = vsel %vm2030_vm9, %v7528_v35, -inf  ;;  %v2263_v17 = vpop.f32.mrf.mxu0  ;;  %v2480_v6 = vsel %vm2030_vm9, %v7548_v1, -inf }
 0x33e   : > { %2514 = vmax.xlane.f32.xlu2 %v2513_v59  ;;  %v7556_v2 = vsel %vm7460_vm13, %v2263_v17, -1e+30 }
 0x33f   : > { %v2516_v44 = vsel %vm2030_vm9, %v7556_v2, -inf }
 0x340   : > { %2538 = vmax.xlane.f32.xlu1 %v2537_v9 }
 0x341   : > { %v2212_v52 = vpop.f32.mrf.mxu3 }
 0x342   : > { %v7574_v23 = vsel %vm7460_vm13, %v2212_v52, -1e+30 }
 0x343   : > { %v2307_v53 = vpop.f32.mrf.mxu1  ;;  %v2365_v19 = vpop.f32.mrf.mxu2  ;;  %v2504_v31 = vsel %vm2030_vm9, %v7574_v23, -inf }
 0x344   : > { %2478 = vmax.xlane.f32.xlu0 %v2477_v27  ;;  %v7560_v20 = vsel %vm7460_vm13, %v2365_v19, -1e+30  ;;  %v7564_v61 = vsel %vm7412_vm10, %v2307_v53, -1e+30 }
 0x345   : > { %v2540_v22 = vsel %vm2030_vm9, %v7560_v20, -inf  ;;  %v2519_v13 = vsel %vm2030_vm9, %v7564_v61, -inf }
 0x346   : > { %2502 = vmax.xlane.f32.xlu2 %v2501_v16 }
 0x348   : > { %2481 = vmax.xlane.f32.xlu1 %v2480_v6 }
 0x349   : > { %v2409_v34 = vpop.f32.mrf.mxu3 }
 0x34a   : > { %v7578_v25 = vsel %vm7412_vm10, %v2409_v34, -1e+30 }
 0x34b   : > { %v2309_v58 = vpop.f32.mrf.mxu1  ;;  %v2543_v48 = vsel %vm2030_vm9, %v7578_v25, -inf }
 0x34c   : > { %2517 = vmax.xlane.f32.xlu0 %v2516_v44  ;;  %v7590_v45 = vsel %vm7428_vm11, %v2309_v58, -1e+30 }
 0x34d   : > { %v2522_v15 = vsel %vm2030_vm9, %v7590_v45, -inf }
 0x34e   : > { %2541 = vmax.xlane.f32.xlu2 %v2540_v22 }
 0x350   : > { %2520 = vmax.xlane.f32.xlu1 %v2519_v13 }
 0x351   : > { %v2411_v30 = vpop.f32.mrf.mxu3 }
 0x352   : > { %v7586_v32 = vsel %vm7428_vm11, %v2411_v30, -1e+30 }
 0x353   : > { %v2312_v3 = vpop.f32.mrf.mxu1  ;;  %v2546_v4 = vsel %vm2030_vm9, %v7586_v32, -inf }
 0x354   : > { %2505 = vmax.xlane.f32.xlu0 %v2504_v31  ;;  %v7604_v26 = vsel %vm7444_vm12, %v2312_v3, -1e+30 }
 0x355   : > { %v2525_v7 = vsel %vm2030_vm9, %v7604_v26, -inf }
 0x356   : > { %2544 = vmax.xlane.f32.xlu2 %v2543_v48 }
 0x359   : > { %v2414_v50 = vpop.f32.mrf.mxu3 }
 0x35a   : > { %v7594_v39 = vsel %vm7444_vm12, %v2414_v50, -1e+30 }
 0x35b   : > { %v2549_v42 = vsel %vm2030_vm9, %v7594_v39, -inf  ;;  %v2314_v63 = vpop.f32.mrf.mxu1 }
 0x35c   : > { %2550 = vmax.xlane.f32.xlu1 %v2549_v42  ;;  %2547 = vmax.xlane.f32.xlu0 %v2546_v4  ;;  %v7608_v56 = vsel %vm7460_vm13, %v2314_v63, -1e+30 }
 0x35d   : > { %v2528_v49 = vsel %vm2030_vm9, %v7608_v56, -inf }
 0x35e   : > { %2523 = vmax.xlane.f32.xlu2 %v2522_v15 }
 0x361   : > { %v2416_v62 = vpop.f32.mrf.mxu3 }
 0x362   : > { %v7612_v33 = vsel %vm7460_vm13, %v2416_v62, -1e+30 }
 0x363   : > { %v2552_v37 = vsel %vm2030_vm9, %v7612_v33, -inf }
 0x364   : > { %2529 = vmax.xlane.f32.xlu1 %v2528_v49  ;;  %2526 = vmax.xlane.f32.xlu0 %v2525_v7 }
 0x366   : > { %2553 = vmax.xlane.f32.xlu2 %v2552_v37 }
 0x379   : > { %v2461_v40 = vpop.xlane.xlu0 %2460 }
 0x37a   : > { %v2555_v43 = vsub.f32 %v7418_v46, %v2461_v40 }
 0x37c   : > { %v2587_v41 = vmul.f32 1.442695, %v2555_v43 }
 0x37e   : > { %6413 = vpow2.f32 %v2587_v41 }
 0x37f   : > { %v2485_v10 = vpop.xlane.xlu1 %2484 }
 0x380   : > { %v2563_v38 = vsub.f32 %v7424_v47, %v2485_v10 }
 0x382   : > { %v2603_v59 = vmul.f32 1.442695, %v2563_v38 }
 0x384   : > { %v7622_v9 = vpop.eup %6413  ;;  %6415 = vpow2.f32 %v2603_v59 }
 0x385   : > { %v2651_v52 = vsel %vm2030_vm9, %v7622_v9, 0.0 }
 0x386   : > { %2652 = vadd.xlane.f32.xlu0 %v2651_v52 }
 0x387   : > { %v2488_v53 = vpop.xlane.xlu2 %2487  ;;  %v2464_v27 = vpop.xlane.xlu1 %2463 }
 0x388   : > { %v2564_v16 = vsub.f32 %v7438_v18, %v2488_v53  ;;  %v2556_v17 = vsub.f32 %v7434_v11, %v2464_v27 }
 0x38a   : > { %v7628_v46 = vpop.eup %6415  ;;  %v2605_v19 = vmul.f32 1.442695, %v2564_v16  ;;  %v2589_v6 = vmul.f32 1.442695, %v2556_v17 }
 0x38b   : > { %v2675_v47 = vsel %vm2030_vm9, %v7628_v46, 0.0 }
 0x38c   : > { %6417 = vpow2.f32 %v2605_v19  ;;  %2676 = vadd.xlane.f32.xlu1 %v2675_v47 }
 0x38d   : > { %6419 = vpow2.f32 %v2589_v6 }
 0x38f   : > { %v2491_v34 = vpop.xlane.xlu2 %2490  ;;  %v2467_v58 = vpop.xlane.xlu1 %2466 }
 0x390   : > { %v2565_v44 = vsub.f32 %v7454_v36, %v2491_v34  ;;  %v2557_v22 = vsub.f32 %v7450_v0, %v2467_v58 }
 0x392   : > { %v7634_v13 = vpop.eup %6417  ;;  %v2607_v18 = vmul.f32 1.442695, %v2565_v44  ;;  %v2591_v11 = vmul.f32 1.442695, %v2557_v22 }
 0x393   : > { %v7636_v30 = vpop.eup %6419  ;;  %v2678_v3 = vsel %vm2030_vm9, %v7634_v13, 0.0 }
 0x394   : > { %6421 = vpow2.f32 %v2607_v18  ;;  %v2654_v31 = vsel %vm2030_vm9, %v7636_v30, 0.0  ;;  %2679 = vadd.xlane.f32.xlu2 %v2678_v3 }
 0x395   : > { %6423 = vpow2.f32 %v2591_v11  ;;  %2655 = vadd.xlane.f32.xlu1 %v2654_v31 }
 0x397   : > { %v2494_v48 = vpop.xlane.xlu0 %2493  ;;  %v2470_v36 = vpop.xlane.xlu2 %2469 }
 0x398   : > { %v2566_v0 = vsub.f32 %v7470_v24, %v2494_v48  ;;  %v2558_v50 = vsub.f32 %v7466_v21, %v2470_v36 }
 0x399   : > { %v2473_v42 = vpop.xlane.xlu1 %2472 }
 0x39a   : > { %v7644_v4 = vpop.eup %6421  ;;  %v2609_v15 = vmul.f32 1.442695, %v2566_v0  ;;  %v2593_v63 = vmul.f32 1.442695, %v2558_v50  ;;  %v2559_v49 = vsub.f32 %v7478_v29, %v2473_v42 }
 0x39b   : > { %v7646_v62 = vpop.eup %6423  ;;  %v2681_v37 = vsel %vm2030_vm9, %v7644_v4, 0.0 }
 0x39c   : > { %6425 = vpow2.f32 %v2609_v15  ;;  %v2657_v7 = vsel %vm2030_vm9, %v7646_v62, 0.0  ;;  %2682 = vadd.xlane.f32.xlu0 %v2681_v37  ;;  %v2595_v21 = vmul.f32 1.442695, %v2559_v49 }
 0x39d   : > { %6427 = vpow2.f32 %v2593_v63  ;;  %2658 = vadd.xlane.f32.xlu2 %v2657_v7 }
 0x39e   : > { %6429 = vpow2.f32 %v2595_v21 }
 0x39f   : > { %v2509_v24 = vpop.xlane.xlu0 %2508 }
 0x3a0   : > { %v2571_v43 = vsub.f32 %v7484_v5, %v2509_v24 }
 0x3a1   : > { %v2533_v40 = vpop.xlane.xlu2 %2532 }
 0x3a2   : > { %v2579_v41 = vsub.f32 %v7488_v8, %v2533_v40  ;;  %v7655_v10 = vpop.eup %6425  ;;  %v2619_v29 = vmul.f32 1.442695, %v2571_v43 }
 0x3a3   : > { %v2512_v38 = vpop.xlane.xlu1 %2511  ;;  %v7657_v59 = vpop.eup %6427  ;;  %v2684_v53 = vsel %vm2030_vm9, %v7655_v10, 0.0 }
 0x3a4   : > { %v2635_v52 = vmul.f32 1.442695, %v2579_v41  ;;  %6431 = vpow2.f32 %v2619_v29  ;;  %2685 = vadd.xlane.f32.xlu1 %v2684_v53  ;;  %v2660_v27 = vsel %vm2030_vm9, %v7657_v59, 0.0  ;;  %v7664_v17 = vpop.eup %6429  ;;  %v2572_v11 = vsub.f32 %v7496_v12, %v2512_v38 }
 0x3a5   : > { %2661 = vadd.xlane.f32.xlu0 %v2660_v27 }
 0x3a6   : > { %6433 = vpow2.f32 %v2635_v52  ;;  %v2621_v36 = vmul.f32 1.442695, %v2572_v11 }
 0x3a7   : > { %v2497_v5 = vpop.xlane.xlu0 %2496 }
 0x3a8   : > { %v2567_v16 = vsub.f32 %v7502_v14, %v2497_v5 }
 0x3a9   : > { %v2476_v8 = vpop.xlane.xlu2 %2475 }
 0x3aa   : > { %v2560_v19 = vsub.f32 %v7506_v60, %v2476_v8  ;;  %v7667_v6 = vpop.eup %6431  ;;  %v2611_v47 = vmul.f32 1.442695, %v2567_v16  ;;  %v2663_v60 = vsel %vm2030_vm9, %v7664_v17, 0.0 }
 0x3ab   : > { %v2500_v34 = vpop.xlane.xlu1 %2499  ;;  %v2699_v18 = vsel %vm2030_vm9, %v7667_v6, 0.0 }
 0x3ac   : > { %v7669_v58 = vpop.eup %6433  ;;  %v2597_v44 = vmul.f32 1.442695, %v2560_v19  ;;  %v2568_v22 = vsub.f32 %v7512_v28, %v2500_v34  ;;  %6435 = vpow2.f32 %v2611_v47  ;;  %2700 = vadd.xlane.f32.xlu2 %v2699_v18 }
 0x3ad   : > { %v2723_v14 = vsel %vm2030_vm9, %v7669_v58, 0.0  ;;  %2664 = vadd.xlane.f32.xlu0 %v2663_v60 }
 0x3ae   : > { %6437 = vpow2.f32 %v2597_v44  ;;  %v2613_v3 = vmul.f32 1.442695, %v2568_v22  ;;  %2724 = vadd.xlane.f32.xlu1 %v2723_v14 }
 0x3af   : > { %v2536_v31 = vpop.xlane.xlu0 %2535 }
 0x3b0   : > { %6439 = vpow2.f32 %v2613_v3  ;;  %v2580_v28 = vsub.f32 %v7520_v51, %v2536_v31 }
 0x3b1   : > { %v2515_v48 = vpop.xlane.xlu2 %2514 }
 0x3b2   : > { %v7680_v0 = vpop.eup %6435  ;;  %v2637_v50 = vmul.f32 1.442695, %v2580_v28  ;;  %v2573_v44 = vsub.f32 %v7524_v57, %v2515_v48 }
 0x3b3   : > { %v2539_v42 = vpop.xlane.xlu1 %2538  ;;  %v2687_v12 = vsel %vm2030_vm9, %v7680_v0, 0.0 }
 0x3b4   : > { %v7682_v15 = vpop.eup %6437  ;;  %v2581_v63 = vsub.f32 %v7528_v35, %v2539_v42  ;;  %6441 = vpow2.f32 %v2637_v50  ;;  %2688 = vadd.xlane.f32.xlu2 %v2687_v12  ;;  %v2623_v14 = vmul.f32 1.442695, %v2573_v44 }
 0x3b5   : > { %v2666_v49 = vsel %vm2030_vm9, %v7682_v15, 0.0  ;;  %6443 = vpow2.f32 %v2621_v36 }
 0x3b6   : > { %v7689_v37 = vpop.eup %6439  ;;  %2667 = vadd.xlane.f32.xlu1 %v2666_v49  ;;  %v2639_v7 = vmul.f32 1.442695, %v2581_v63 }
 0x3b7   : > { %v2690_v51 = vsel %vm2030_vm9, %v7689_v37, 0.0  ;;  %v2479_v21 = vpop.xlane.xlu0 %2478 }
 0x3b8   : > { %2691 = vadd.xlane.f32.xlu0 %v2690_v51  ;;  %v2561_v35 = vsub.f32 %v7538_v54, %v2479_v21  ;;  %6445 = vpow2.f32 %v2639_v7 }
 0x3b9   : > { %v2503_v24 = vpop.xlane.xlu2 %2502 }
 0x3ba   : > { %v2569_v40 = vsub.f32 %v7542_v55, %v2503_v24  ;;  %v7695_v43 = vpop.eup %6441  ;;  %v2599_v41 = vmul.f32 1.442695, %v2561_v35 }
 0x3bb   : > { %v2482_v29 = vpop.xlane.xlu1 %2481  ;;  %v7697_v38 = vpop.eup %6443  ;;  %v2726_v53 = vsel %vm2030_vm9, %v7695_v43, 0.0 }
 0x3bc   : > { %v2615_v52 = vmul.f32 1.442695, %v2569_v40  ;;  %6447 = vpow2.f32 %v2599_v41  ;;  %v2562_v27 = vsub.f32 %v7548_v1, %v2482_v29  ;;  %2727 = vadd.xlane.f32.xlu2 %v2726_v53  ;;  %v2702_v54 = vsel %vm2030_vm9, %v7697_v38, 0.0 }
 0x3be   : > { %6449 = vpow2.f32 %v2615_v52  ;;  %v2601_v5 = vmul.f32 1.442695, %v2562_v27  ;;  %v7704_v16 = vpop.eup %6445 }
 0x3bf   : > { %v2518_v55 = vpop.xlane.xlu0 %2517 }
 0x3c0   : > { %2703 = vadd.xlane.f32.xlu0 %v2702_v54  ;;  %6451 = vpow2.f32 %v2601_v5  ;;  %v2574_v48 = vsub.f32 %v7556_v2, %v2518_v55 }
 0x3c1   : > { %v2542_v8 = vpop.xlane.xlu2 %2541 }
 0x3c2   : > { %v2582_v19 = vsub.f32 %v7560_v20, %v2542_v8  ;;  %v7707_v47 = vpop.eup %6447  ;;  %v2729_v20 = vsel %vm2030_vm9, %v7704_v16, 0.0  ;;  %v2625_v12 = vmul.f32 1.442695, %v2574_v48 }
 0x3c3   : > { %v2669_v22 = vsel %vm2030_vm9, %v7707_v47, 0.0  ;;  %v2521_v60 = vpop.xlane.xlu1 %2520 }
 0x3c4   : > { %v7709_v34 = vpop.eup %6449  ;;  %v2641_v1 = vmul.f32 1.442695, %v2582_v19  ;;  %2670 = vadd.xlane.f32.xlu2 %v2669_v22  ;;  %v2575_v24 = vsub.f32 %v7564_v61, %v2521_v60 }
 0x3c5   : > { %v2693_v18 = vsel %vm2030_vm9, %v7709_v34, 0.0 }
 0x3c6   : > { %6453 = vpow2.f32 %v2641_v1  ;;  %2694 = vadd.xlane.f32.xlu1 %v2693_v18  ;;  %v7720_v28 = vpop.eup %6451 }
 0x3c7   : > { %v2506_v11 = vpop.xlane.xlu0 %2505  ;;  %6455 = vpow2.f32 %v2623_v14 }
 0x3c8   : > { %2730 = vadd.xlane.f32.xlu0 %v2729_v20  ;;  %v2570_v57 = vsub.f32 %v7574_v23, %v2506_v11  ;;  %v2672_v23 = vsel %vm2030_vm9, %v7720_v28, 0.0 }
 0x3c9   : > { %v2545_v3 = vpop.xlane.xlu2 %2544 }
 0x3ca   : > { %v2583_v31 = vsub.f32 %v7578_v25, %v2545_v3  ;;  %v2617_v36 = vmul.f32 1.442695, %v2570_v57 }
 0x3cc   : > { %v7723_v50 = vpop.eup %6453  ;;  %v2643_v42 = vmul.f32 1.442695, %v2583_v31  ;;  %6457 = vpow2.f32 %v2617_v36 }
 0x3cd   : > { %v2732_v63 = vsel %vm2030_vm9, %v7723_v50, 0.0  ;;  %v7730_v7 = vpop.eup %6455 }
 0x3ce   : > { %6459 = vpow2.f32 %v2643_v42  ;;  %2733 = vadd.xlane.f32.xlu1 %v2732_v63 }
 0x3cf   : > { %v2551_v25 = vpop.xlane.xlu1 %2550  ;;  %v2548_v49 = vpop.xlane.xlu0 %2547  ;;  %6461 = vpow2.f32 %v2625_v12 }
 0x3d0   : > { %2673 = vadd.xlane.f32.xlu0 %v2672_v23  ;;  %v2584_v2 = vsub.f32 %v7586_v32, %v2548_v49  ;;  %v2585_v53 = vsub.f32 %v7594_v39, %v2551_v25  ;;  %v2705_v32 = vsel %vm2030_vm9, %v7730_v7, 0.0 }
 0x3d1   : > { %v2524_v51 = vpop.xlane.xlu2 %2523 }
 0x3d2   : > { %v2576_v21 = vsub.f32 %v7590_v45, %v2524_v51  ;;  %v7733_v35 = vpop.eup %6457  ;;  %v2645_v40 = vmul.f32 1.442695, %v2584_v2  ;;  %v2627_v45 = vmul.f32 1.442695, %v2575_v24  ;;  %v2647_v55 = vmul.f32 1.442695, %v2585_v53 }
 0x3d3   : > { %v2696_v52 = vsel %vm2030_vm9, %v7733_v35, 0.0 }
 0x3d4   : > { %v7736_v41 = vpop.eup %6459  ;;  %v2629_v29 = vmul.f32 1.442695, %v2576_v21  ;;  %2697 = vadd.xlane.f32.xlu2 %v2696_v52 }
 0x3d5   : > { %v2735_v61 = vsel %vm2030_vm9, %v7736_v41, 0.0  ;;  %v7745_v54 = vpop.eup %6461 }
 0x3d6   : > { %6463 = vpow2.f32 %v2629_v29  ;;  %2706 = vadd.xlane.f32.xlu1 %v2705_v32  ;;  %v2708_v22 = vsel %vm2030_vm9, %v7745_v54, 0.0 }
 0x3d7   : > { %6465 = vpow2.f32 %v2645_v40  ;;  %v2527_v27 = vpop.xlane.xlu0 %2526  ;;  %v2530_v39 = vpop.xlane.xlu1 %2529 }
 0x3d8   : > { %2736 = vadd.xlane.f32.xlu0 %v2735_v61  ;;  %v2577_v8 = vsub.f32 %v7604_v26, %v2527_v27  ;;  %6467 = vpow2.f32 %v2627_v45  ;;  %v2578_v20 = vsub.f32 %v7608_v56, %v2530_v39 }
 0x3d9   : > { %v2554_v5 = vpop.xlane.xlu2 %2553  ;;  %6469 = vpow2.f32 %v2647_v55 }
 0x3da   : > { %v2586_v19 = vsub.f32 %v7612_v33, %v2554_v5  ;;  %v2631_v44 = vmul.f32 1.442695, %v2577_v8  ;;  %v2633_v11 = vmul.f32 1.442695, %v2578_v20 }
 0x3dc   : > { %v7749_v1 = vpop.eup %6463  ;;  %2709 = vadd.xlane.f32.xlu2 %v2708_v22  ;;  %v2649_v26 = vmul.f32 1.442695, %v2586_v19  ;;  %6471 = vpow2.f32 %v2631_v44 }
 0x3dd   : > { %v7753_v18 = vpop.eup %6465  ;;  %v2714_v33 = vsel %vm2030_vm9, %v7749_v1, 0.0 }
 0x3de   : > { %v2738_v14 = vsel %vm2030_vm9, %v7753_v18, 0.0  ;;  %v7760_v60 = vpop.eup %6467  ;;  %6473 = vpow2.f32 %v2649_v26 }
 0x3df   : > { %2739 = vadd.xlane.f32.xlu1 %v2738_v14  ;;  %v7762_v3 = vpop.eup %6469  ;;  %v2711_v56 = vsel %vm2030_vm9, %v7760_v60, 0.0  ;;  %6475 = vpow2.f32 %v2633_v11 }
 0x3e0   : > { %2715 = vadd.xlane.f32.xlu0 %v2714_v33  ;;  %v2741_v31 = vsel %vm2030_vm9, %v7762_v3, 0.0 }
 0x3e2   : > { %v7766_v57 = vpop.eup %6471 }
 0x3e3   : > { %v2717_v48 = vsel %vm2030_vm9, %v7766_v57, 0.0 }
 0x3e4   : > { %2712 = vadd.xlane.f32.xlu2 %v2711_v56  ;;  %v7772_v36 = vpop.eup %6473 }
 0x3e5   : > { %v7774_v42 = vpop.eup %6475  ;;  %v2744_v63 = vsel %vm2030_vm9, %v7772_v36, 0.0 }
 0x3e6   : > { %v2720_v12 = vsel %vm2030_vm9, %v7774_v42, 0.0 }
 0x3e7   : > { %2742 = vadd.xlane.f32.xlu1 %v2741_v31 }
 0x3e8   : > { %2718 = vadd.xlane.f32.xlu0 %v2717_v48 }
 0x3ec   : > { %2745 = vadd.xlane.f32.xlu2 %v2744_v63 }
 0x3ef   : > { %2721 = vadd.xlane.f32.xlu1 %v2720_v12 }
 0x3f9   : > { %v2653_v25 = vpop.xlane.xlu0 %2652 }
 0x3ff   : > { %v2677_v23 = vpop.xlane.xlu1 %2676 }
 0x400   : > { %6477 = vrcp.f32 %v2677_v23 }
 0x401   : > { %6479 = vrcp.f32 %v2653_v25 }
 0x406   : > { %v6478_v51 = vpop.eup %6477 }
 0x407   : > { %v2680_v49 = vpop.xlane.xlu2 %2679  ;;  %v6480_v21 = vpop.eup %6479  ;;  %v2787_v24 = vmul.f32 %v6478_v51, %v7628_v46 }
 0x408   : > { %v2656_v2 = vpop.xlane.xlu1 %2655  ;;  %6481 = vrcp.f32 %v2680_v49  ;;  %v2779_v40 = vmul.f32 %v6480_v21, %v7622_v9 }
 0x409   : > { %6483 = vrcp.f32 %v2656_v2  ;;  %v2819_v53 = vpack.c.bf16 %v2787_v24, %v2787_v24 }
 0x40a   : > { %v2811_v61 = vpack.c.bf16 %v2779_v40, %v2779_v40 }
 0x40b   : > { %v2941_v39 = vunpack.c.l.b16 %v2819_v53 }
 0x40c   : > { %v2847_v44 = vunpack.c.l.b16 %v2811_v61 }
 0x40e   : > { %v6482_v29 = vpop.eup %6481 }
 0x40f   : > { %v6484_v52 = vpop.eup %6483  ;;  %v2788_v32 = vmul.f32 %v6482_v29, %v7634_v13  ;;  %v2683_v45 = vpop.xlane.xlu0 %2682 }
 0x410   : > { %v2780_v27 = vmul.f32 %v6484_v52, %v7636_v30  ;;  %v2659_v55 = vpop.xlane.xlu2 %2658  ;;  %6485 = vrcp.f32 %v2683_v45 }
 0x411   : > { %v2820_v5 = vpack.c.bf16 %v2788_v32, %v2788_v32  ;;  %6487 = vrcp.f32 %v2659_v55 }
 0x412   : > { %v2812_v8 = vpack.c.bf16 %v2780_v27, %v2780_v27 }
 0x413   : > { %v2942_v19 = vunpack.c.l.b16 %v2820_v5 }
 0x414   : > { %v2848_v46 = vunpack.c.l.b16 %v2812_v8 }
 0x415   : > { %v2945_v22 = vpack.c.b16 %v2942_v19, %v2941_v39 }
 0x416   : > { %v2851_v9 = vpack.c.b16 %v2848_v46, %v2847_v44  ;;  %v6486_v14 = vpop.eup %6485 }
 0x417   : > { %v2686_v20 = vpop.xlane.xlu1 %2685  ;;  %5664 = vmatmul.msk.bf16.vlgmr.msrb.gmra.mxu2 %vm2030_vm9, %v2945_v22  ;;  %v6488_v30 = vpop.eup %6487  ;;  %v2789_v26 = vmul.f32 %v6486_v14, %v7644_v4 }
 0x418   : > { %6489 = vrcp.f32 %v2686_v20  ;;  %5660 = vmatmul.msk.bf16.vlgmr.msrb.gmra.mxu0 %vm2030_vm9, %v2851_v9  ;;  %v2662_v13 = vpop.xlane.xlu0 %2661  ;;  %v2781_v33 = vmul.f32 %v6488_v30, %v7646_v62 }
 0x419   : > { %6491 = vrcp.f32 %v2662_v13  ;;  %v2821_v31 = vpack.c.bf16 %v2789_v26, %v2789_v26 }
 0x41a   : > { %v2813_v12 = vpack.c.bf16 %v2781_v33, %v2781_v33 }
 0x41b   : > { %v2943_v21 = vunpack.c.l.b16 %v2821_v31 }
 0x41c   : > { %v2849_v40 = vunpack.c.l.b16 %v2813_v12 }
 0x41e   : > { %v6490_v11 = vpop.eup %6489 }
 0x41f   : > { %v6492_v56 = vpop.eup %6491  ;;  %v2790_v48 = vmul.f32 %v6490_v11, %v7655_v10  ;;  %v2701_v63 = vpop.xlane.xlu2 %2700 }
 0x420   : > { %v2782_v23 = vmul.f32 %v6492_v56, %v7657_v59  ;;  %v2665_v49 = vpop.xlane.xlu0 %2664 }
 0x421   : > { %v2725_v25 = vpop.xlane.xlu1 %2724  ;;  %v2822_v51 = vpack.c.bf16 %v2790_v48, %v2790_v48  ;;  %6493 = vrcp.f32 %v2665_v49 }
 0x422   : > { %v2814_v2 = vpack.c.bf16 %v2782_v23, %v2782_v23 }
 0x423   : > { %v2944_v24 = vunpack.c.l.b16 %v2822_v51 }
 0x424   : > { %v2850_v4 = vunpack.c.l.b16 %v2814_v2 }
 0x425   : > { %v2946_v29 = vpack.c.b16 %v2944_v24, %v2943_v21 }
 0x426   : > { %v2852_v62 = vpack.c.b16 %v2850_v4, %v2849_v40 }
 0x427   : > { %v2689_v52 = vpop.xlane.xlu2 %2688  ;;  %5665 = vmatmul.msk.bf16.gmra.mxu2 %vm2030_vm9, %v2946_v29  ;;  %v6494_v10 = vpop.eup %6493 }
 0x428   : > { %6495 = vrcp.f32 %v2689_v52  ;;  %5661 = vmatmul.msk.bf16.gmra.mxu0 %vm2030_vm9, %v2852_v62  ;;  %v2783_v32 = vmul.f32 %v6494_v10, %v7664_v17 }
 0x429   : > { %v2668_v53 = vpop.xlane.xlu1 %2667 }
 0x42a   : > { %6497 = vrcp.f32 %v2668_v53  ;;  %v2815_v8 = vpack.c.bf16 %v2783_v32, %v2783_v32 }
 0x42b   : > { %6499 = vrcp.f32 %v2725_v25  ;;  %v2692_v59 = vpop.xlane.xlu0 %2691 }
 0x42c   : > { %6501 = vrcp.f32 %v2692_v59  ;;  %v2894_v14 = vunpack.c.l.b16 %v2815_v8 }
 0x42d   : > { %6503 = vrcp.f32 %v2701_v63 }
 0x42e   : > { %v6496_v45 = vpop.eup %6495 }
 0x42f   : > { %v2791_v27 = vmul.f32 %v6496_v45, %v7680_v0  ;;  %v2728_v55 = vpop.xlane.xlu2 %2727 }
 0x430   : > { %v6498_v61 = vpop.eup %6497  ;;  %6505 = vrcp.f32 %v2728_v55 }
 0x431   : > { %v6500_v5 = vpop.eup %6499  ;;  %v2784_v39 = vmul.f32 %v6498_v61, %v7682_v15  ;;  %v2823_v46 = vpack.c.bf16 %v2791_v27, %v2791_v27 }
 0x432   : > { %v6502_v19 = vpop.eup %6501  ;;  %v2803_v17 = vmul.f32 %v6500_v5, %v7669_v58 }
 0x433   : > { %v2816_v44 = vpack.c.bf16 %v2784_v39, %v2784_v39  ;;  %v2792_v22 = vmul.f32 %v6502_v19, %v7689_v37  ;;  %v2704_v9 = vpop.xlane.xlu0 %2703  ;;  %v6504_v20 = vpop.eup %6503  ;;  %v2988_v11 = vunpack.c.l.b16 %v2823_v46 }
 0x434   : > { %6507 = vrcp.f32 %v2704_v9  ;;  %v2795_v26 = vmul.f32 %v6504_v20, %v7667_v6  ;;  %v2835_v56 = vpack.c.bf16 %v2803_v17, %v2803_v17 }
 0x435   : > { %v2895_v13 = vunpack.c.l.b16 %v2816_v44  ;;  %v2824_v30 = vpack.c.bf16 %v2792_v22, %v2792_v22 }
 0x436   : > { %v6506_v0 = vpop.eup %6505  ;;  %v2827_v58 = vpack.c.bf16 %v2795_v26, %v2795_v26  ;;  %v3129_v6 = vunpack.c.l.b16 %v2835_v56 }
 0x437   : > { %v2898_v33 = vpack.c.b16 %v2895_v13, %v2894_v14  ;;  %v2989_v15 = vunpack.c.l.b16 %v2824_v30  ;;  %v2804_v31 = vmul.f32 %v6506_v0, %v7695_v43  ;;  %v2671_v25 = vpop.xlane.xlu2 %2670 }
 0x438   : > { %v3035_v43 = vunpack.c.l.b16 %v2827_v58 }
 0x439   : > { %v2992_v48 = vpack.c.b16 %v2989_v15, %v2988_v11  ;;  %v2695_v63 = vpop.xlane.xlu1 %2694  ;;  %5662 = vmatmul.msk.bf16.vlgmr.msrb.gmra.mxu1 %vm2030_vm9, %v2898_v33  ;;  %v2836_v12 = vpack.c.bf16 %v2804_v31, %v2804_v31 }
 0x43a   : > { %v6508_v37 = vpop.eup %6507 }
 0x43b   : > { %v2796_v23 = vmul.f32 %v6508_v37, %v7697_v38  ;;  %5666 = vmatmul.msk.bf16.vlgmr.msrb.gmra.mxu3 %vm2030_vm9, %v2992_v48  ;;  %v2731_v49 = vpop.xlane.xlu0 %2730  ;;  %v3130_v51 = vunpack.c.l.b16 %v2836_v12 }
 0x43c   : > { %6509 = vrcp.f32 %v2731_v49 }
 0x43d   : > { %v2828_v2 = vpack.c.bf16 %v2796_v23, %v2796_v23  ;;  %v3133_v21 = vpack.c.b16 %v3130_v51, %v3129_v6  ;;  %6511 = vrcp.f32 %v2671_v25 }
 0x43f   : > { %v3036_v24 = vunpack.c.l.b16 %v2828_v2  ;;  %5672 = vmatmul.msk.bf16.vlgmr.msra.gmra.mxu2 %vm2030_vm9, %v3133_v21 }
 0x441   : > { %v3039_v40 = vpack.c.b16 %v3036_v24, %v3035_v43  ;;  %v2734_v4 = vpop.xlane.xlu1 %2733 }
 0x442   : > { %v6510_v29 = vpop.eup %6509  ;;  %6513 = vrcp.f32 %v2734_v4 }
 0x443   : > { %6515 = vrcp.f32 %v2695_v63  ;;  %5668 = vmatmul.msk.bf16.vlgmr.msra.gmra.mxu0 %vm2030_vm9, %v3039_v40  ;;  %v2674_v38 = vpop.xlane.xlu0 %2673  ;;  %v6512_v62 = vpop.eup %6511  ;;  %v2805_v52 = vmul.f32 %v6510_v29, %v7704_v16 }
 0x444   : > { %6517 = vrcp.f32 %v2674_v38  ;;  %v2785_v53 = vmul.f32 %v6512_v62, %v7707_v47 }
 0x445   : > { %v2837_v45 = vpack.c.bf16 %v2805_v52, %v2805_v52 }
 0x446   : > { %v2817_v5 = vpack.c.bf16 %v2785_v53, %v2785_v53 }
 0x447   : > { %v2698_v59 = vpop.xlane.xlu2 %2697  ;;  %v3131_v16 = vunpack.c.l.b16 %v2837_v45 }
 0x448   : > { %v6514_v10 = vpop.eup %6513  ;;  %6519 = vrcp.f32 %v2698_v59  ;;  %v2896_v9 = vunpack.c.l.b16 %v2817_v5 }
 0x449   : > { %v6516_v32 = vpop.eup %6515  ;;  %v2806_v61 = vmul.f32 %v6514_v10, %v7723_v50  ;;  %v2707_v27 = vpop.xlane.xlu1 %2706 }
 0x44a   : > { %v6518_v55 = vpop.eup %6517  ;;  %6521 = vrcp.f32 %v2707_v27  ;;  %v2793_v44 = vmul.f32 %v6516_v32, %v7709_v34 }
 0x44b   : > { %v2838_v8 = vpack.c.bf16 %v2806_v61, %v2806_v61  ;;  %v2786_v39 = vmul.f32 %v6518_v55, %v7720_v28  ;;  %v2737_v19 = vpop.xlane.xlu0 %2736 }
 0x44c   : > { %v2825_v14 = vpack.c.bf16 %v2793_v44, %v2793_v44 }
 0x44d   : > { %v3132_v46 = vunpack.c.l.b16 %v2838_v8  ;;  %v2818_v47 = vpack.c.bf16 %v2786_v39, %v2786_v39 }
 0x44e   : > { %v6520_v22 = vpop.eup %6519  ;;  %v2990_v33 = vunpack.c.l.b16 %v2825_v14 }
 0x44f   : > { %v2897_v20 = vunpack.c.l.b16 %v2818_v47  ;;  %v3134_v17 = vpack.c.b16 %v3132_v46, %v3131_v16  ;;  %v2794_v50 = vmul.f32 %v6520_v22, %v7733_v35  ;;  %v2710_v13 = vpop.xlane.xlu2 %2709 }
 0x450   : > { %v6522_v30 = vpop.eup %6521  ;;  %6523 = vrcp.f32 %v2710_v13 }
 0x451   : > { %5673 = vmatmul.msk.bf16.gmra.mxu2 %vm2030_vm9, %v3134_v17  ;;  %v2899_v28 = vpack.c.b16 %v2897_v20, %v2896_v9  ;;  %v2826_v0 = vpack.c.bf16 %v2794_v50, %v2794_v50  ;;  %6525 = vrcp.f32 %v2737_v19  ;;  %v2797_v11 = vmul.f32 %v6522_v30, %v7730_v7  ;;  %v6218_v17 = vld [vmem:[%s6896_s23 + $0x10] sm:$0xff] }
 0x452   : > { %v2740_v26 = vpop.xlane.xlu1 %2739 }
 0x453   : > { %6527 = vrcp.f32 %v2740_v26  ;;  %v2716_v34 = vpop.xlane.xlu0 %2715  ;;  %5663 = vmatmul.msk.bf16.gmra.mxu1 %vm2030_vm9, %v2899_v28  ;;  %v2991_v15 = vunpack.c.l.b16 %v2826_v0  ;;  %v2829_v48 = vpack.c.bf16 %v2797_v11, %v2797_v11 }
 0x454   : > { %6529 = vrcp.f32 %v2716_v34 }
 0x455   : > { %v2993_v56 = vpack.c.b16 %v2991_v15, %v2990_v33  ;;  %v3037_v6 = vunpack.c.l.b16 %v2829_v48  ;;  %v6221_v48 = vld [vmem:[%s6896_s23 + $0x28] sm:$0xff] }
 0x456   : > { %v6524_v35 = vpop.eup %6523  ;;  %3463 = vmatpush.bf16.msrb.mxu2 %v6221_v48 }
 0x457   : > { %v6526_v31 = vpop.eup %6525  ;;  %v2798_v63 = vmul.f32 %v6524_v35, %v7745_v54  ;;  %v2713_v37 = vpop.xlane.xlu2 %2712  ;;  %5667 = vmatmul.msk.bf16.gmra.mxu3 %vm2030_vm9, %v2993_v56 }
 0x458   : > { %6531 = vrcp.f32 %v2713_v37  ;;  %v2807_v7 = vmul.f32 %v6526_v31, %v7736_v41 }
 0x459   : > { %v6528_v12 = vpop.eup %6527  ;;  %v2830_v23 = vpack.c.bf16 %v2798_v63, %v2798_v63 }
 0x45a   : > { %v6530_v58 = vpop.eup %6529  ;;  %v2808_v25 = vmul.f32 %v6528_v12, %v7753_v18  ;;  %v2743_v49 = vpop.xlane.xlu1 %2742  ;;  %v2839_v40 = vpack.c.bf16 %v2807_v7, %v2807_v7  ;;  %v6220_v12 = vld [vmem:[%s6896_s23 + $0x20] sm:$0xff] }
 0x45b   : > { %v3038_v51 = vunpack.c.l.b16 %v2830_v23  ;;  %v2800_v2 = vmul.f32 %v6530_v58, %v7749_v1  ;;  %v2719_v54 = vpop.xlane.xlu0 %2718  ;;  %6533 = vrcp.f32 %v2743_v49  ;;  %v6223_v58 = vld [vmem:[%s6896_s23 + $0x38] sm:$0xff]  ;;  %3464 = vmatpush.bf16.msrb.mxu2 %v6220_v12 }
 0x45c   : > { %v2840_v21 = vpack.c.bf16 %v2808_v25, %v2808_v25  ;;  %v3176_v52 = vunpack.c.l.b16 %v2839_v40  ;;  %3536 = vmatpush.bf16.msrb.mxu3 %v6223_v58 }
 0x45d   : > { %v3040_v43 = vpack.c.b16 %v3038_v51, %v3037_v6  ;;  %v2832_v4 = vpack.c.bf16 %v2800_v2, %v2800_v2  ;;  %v6222_v6 = vld [vmem:[%s6896_s23 + $0x30] sm:$0xff] }
 0x45e   : > { %v6532_v24 = vpop.eup %6531  ;;  %v3177_v18 = vunpack.c.l.b16 %v2840_v21 }
 0x45f   : > { %v2799_v29 = vmul.f32 %v6532_v24, %v7760_v60  ;;  %v2746_v38 = vpop.xlane.xlu2 %2745  ;;  %5669 = vmatmul.msk.bf16.gmra.mxu0 %vm2030_vm9, %v3040_v43  ;;  %v3083_v1 = vunpack.c.l.b16 %v2832_v4 }
 0x460   : > { %6535 = vrcp.f32 %v2746_v38  ;;  %v3180_v59 = vpack.c.b16 %v3177_v18, %v3176_v52  ;;  %3537 = vmatpush.bf16.msrb.mxu3 %v6222_v6 }
 0x461   : > { %v2831_v62 = vpack.c.bf16 %v2799_v29, %v2799_v29  ;;  %6537 = vrcp.f32 %v2719_v54  ;;  %v6534_v10 = vpop.eup %6533 }
 0x462   : > { %v2722_v41 = vpop.xlane.xlu1 %2721  ;;  %v2809_v5 = vmul.f32 %v6534_v10, %v7762_v3  ;;  %v6217_v3 = vld [vmem:[%s6896_s23 + $0x8] sm:$0xff] }
 0x463   : > { %6539 = vrcp.f32 %v2722_v41  ;;  %v3082_v53 = vunpack.c.l.b16 %v2831_v62  ;;  %3317 = vmatpush.bf16.msrb.mxu0 %v6217_v3 }
 0x464   : > { %v2841_v44 = vpack.c.bf16 %v2809_v5, %v2809_v5 }
 0x465   : > { %v3086_v32 = vpack.c.b16 %v3083_v1, %v3082_v53 }
 0x466   : > { %v6536_v45 = vpop.eup %6535  ;;  %v3178_v22 = vunpack.c.l.b16 %v2841_v44 }
 0x467   : > { %v6538_v61 = vpop.eup %6537  ;;  %5670 = vmatmul.msk.bf16.vlgmr.msra.gmra.mxu1 %vm2030_vm9, %v3086_v32  ;;  %5674 = vmatmul.msk.bf16.vlgmr.msra.gmra.mxu3 %vm2030_vm9, %v3180_v59  ;;  %v2810_v27 = vmul.f32 %v6536_v45, %v7772_v36 }
 0x468   : > { %v2801_v8 = vmul.f32 %v6538_v61, %v7766_v57  ;;  %v6219_v57 = vld [vmem:[%s6896_s23 + $0x18] sm:$0xff] }
 0x469   : > { %v6540_v60 = vpop.eup %6539  ;;  %v2842_v39 = vpack.c.bf16 %v2810_v27, %v2810_v27  ;;  %3390 = vmatpush.bf16.msrb.mxu1 %v6219_v57 }
 0x46a   : > { %v2802_v55 = vmul.f32 %v6540_v60, %v7774_v42  ;;  %v2833_v16 = vpack.c.bf16 %v2801_v8, %v2801_v8  ;;  %v6216_v42 = vld [vmem:[%s6896_s23] sm:$0xff] }
 0x46b   : > { %v3179_v46 = vunpack.c.l.b16 %v2842_v39  ;;  %3318 = vmatpush.bf16.msrb.mxu0 %v6216_v42 }
 0x46c   : > { %v2834_v19 = vpack.c.bf16 %v2802_v55, %v2802_v55  ;;  %v3084_v9 = vunpack.c.l.b16 %v2833_v16 }
 0x46d   : > { %v3181_v36 = vpack.c.b16 %v3179_v46, %v3178_v22  ;;  %3391 = vmatpush.bf16.msrb.mxu1 %v6218_v17 }
 0x46e   : > { %v3085_v47 = vunpack.c.l.b16 %v2834_v19 }
 0x470   : > { %v3087_v20 = vpack.c.b16 %v3085_v47, %v3084_v9 }
 0x477   : > { %5671 = vmatmul.msk.bf16.gmra.mxu1 %vm2030_vm9, %v3087_v20  ;;  %5675 = vmatmul.msk.bf16.gmra.mxu3 %vm2030_vm9, %v3181_v36 }
 0x495   : > { %v2880_v14 = vpop.f32.mrf.mxu0 }
 0x496   : > { %v3219_v13 = vpack.c.bf16 %v2880_v14, %v2880_v14 }
 0x498   : > { %v3275_v0 = vunpack.c.l.b16 %v3219_v13 }
 0x49a   : > { %v2974_v50 = vpop.f32.mrf.mxu2 }
 0x49b   : > { %v3227_v34 = vpack.c.bf16 %v2974_v50, %v2974_v50 }
 0x49d   : > { %v2882_v30 = vpop.f32.mrf.mxu0  ;;  %v3348_v56 = vunpack.c.l.b16 %v3227_v34 }
 0x49e   : > { %v3220_v28 = vpack.c.bf16 %v2882_v30, %v2882_v30 }
 0x4a0   : > { %v3276_v26 = vunpack.c.l.b16 %v3220_v28 }
 0x4a2   : > { %v3283_v33 = vpack.c.b16 %v3276_v26, %v3275_v0  ;;  %v2976_v11 = vpop.f32.mrf.mxu2 }
 0x4a3   : > { %v3228_v15 = vpack.c.bf16 %v2976_v11, %v2976_v11 }
 0x4a4   : > { %5684 = vmatmul.msk.bf16.vlgmr.msrb.gmra.mxu0 %vm2030_vm9, %v3283_v33 }
 0x4a5   : > { %v3349_v35 = vunpack.c.l.b16 %v3228_v15  ;;  %v2885_v31 = vpop.f32.mrf.mxu0 }
 0x4a6   : > { %v3221_v23 = vpack.c.bf16 %v2885_v31, %v2885_v31 }
 0x4a7   : > { %v3356_v63 = vpack.c.b16 %v3349_v35, %v3348_v56 }
 0x4a8   : > { %v3277_v7 = vunpack.c.l.b16 %v3221_v23 }
 0x4a9   : > { %5696 = vmatmul.msk.bf16.vlgmr.msrb.gmra.mxu1 %vm2030_vm9, %v3356_v63 }
 0x4aa   : > { %v2979_v37 = vpop.f32.mrf.mxu2 }
 0x4ab   : > { %v3229_v2 = vpack.c.bf16 %v2979_v37, %v2979_v37 }
 0x4ad   : > { %v2887_v25 = vpop.f32.mrf.mxu0  ;;  %v3350_v54 = vunpack.c.l.b16 %v3229_v2 }
 0x4ae   : > { %v3222_v49 = vpack.c.bf16 %v2887_v25, %v2887_v25 }
 0x4b0   : > { %v3278_v51 = vunpack.c.l.b16 %v3222_v49 }
 0x4b2   : > { %v3284_v21 = vpack.c.b16 %v3278_v51, %v3277_v7  ;;  %v2981_v43 = vpop.f32.mrf.mxu2 }
 0x4b3   : > { %v3230_v24 = vpack.c.bf16 %v2981_v43, %v2981_v43 }
 0x4b4   : > { %5685 = vmatmul.msk.bf16.gmra.mxu0 %vm2030_vm9, %v3284_v21 }
 0x4b5   : > { %v3351_v40 = vunpack.c.l.b16 %v3230_v24 }
 0x4b6   : > { %v2927_v4 = vpop.f32.mrf.mxu1 }
 0x4b7   : > { %v3357_v29 = vpack.c.b16 %v3351_v40, %v3350_v54  ;;  %v3223_v38 = vpack.c.bf16 %v2927_v4, %v2927_v4 }
 0x4b9   : > { %5697 = vmatmul.msk.bf16.gmra.mxu1 %vm2030_vm9, %v3357_v29  ;;  %v3279_v1 = vunpack.c.l.b16 %v3223_v38 }
 0x4be   : > { %v2929_v18 = vpop.f32.mrf.mxu1  ;;  %v3021_v62 = vpop.f32.mrf.mxu3 }
 0x4bf   : > { %v3224_v41 = vpack.c.bf16 %v2929_v18, %v2929_v18  ;;  %v3231_v32 = vpack.c.bf16 %v3021_v62, %v3021_v62 }
 0x4c0   : > { %v3068_v52 = vpop.f32.mrf.mxu0 }
 0x4c1   : > { %v3280_v53 = vunpack.c.l.b16 %v3224_v41  ;;  %v3235_v61 = vpack.c.bf16 %v3068_v52, %v3068_v52  ;;  %v3352_v55 = vunpack.c.l.b16 %v3231_v32 }
 0x4c2   : > { %v3162_v59 = vpop.f32.mrf.mxu2 }
 0x4c3   : > { %v3285_v10 = vpack.c.b16 %v3280_v53, %v3279_v1  ;;  %v3243_v39 = vpack.c.bf16 %v3162_v59, %v3162_v59  ;;  %v3421_v19 = vunpack.c.l.b16 %v3235_v61 }
 0x4c5   : > { %5686 = vmatmul.msk.bf16.gmra.mxu0 %vm2030_vm9, %v3285_v10  ;;  %v3494_v9 = vunpack.c.l.b16 %v3243_v39 }
 0x4c6   : > { %v3023_v45 = vpop.f32.mrf.mxu3 }
 0x4c7   : > { %v3232_v60 = vpack.c.bf16 %v3023_v45, %v3023_v45 }
 0x4c8   : > { %v3070_v27 = vpop.f32.mrf.mxu0 }
 0x4c9   : > { %v3353_v5 = vunpack.c.l.b16 %v3232_v60  ;;  %v3236_v8 = vpack.c.bf16 %v3070_v27, %v3070_v27 }
 0x4ca   : > { %v3164_v46 = vpop.f32.mrf.mxu2 }
 0x4cb   : > { %v3358_v44 = vpack.c.b16 %v3353_v5, %v3352_v55  ;;  %v3422_v16 = vunpack.c.l.b16 %v3236_v8  ;;  %v3244_v47 = vpack.c.bf16 %v3164_v46, %v3164_v46 }
 0x4cd   : > { %v3429_v22 = vpack.c.b16 %v3422_v16, %v3421_v19  ;;  %5698 = vmatmul.msk.bf16.gmra.mxu1 %vm2030_vm9, %v3358_v44  ;;  %v3495_v20 = vunpack.c.l.b16 %v3244_v47 }
 0x4cf   : > { %5708 = vmatmul.msk.bf16.vlgmr.msrb.gmra.mxu2 %vm2030_vm9, %v3429_v22  ;;  %v3502_v36 = vpack.c.b16 %v3495_v20, %v3494_v9 }
 0x4d0   : > { %v2932_v3 = vpop.f32.mrf.mxu1 }
 0x4d1   : > { %5720 = vmatmul.msk.bf16.vlgmr.msrb.gmra.mxu3 %vm2030_vm9, %v3502_v36  ;;  %v3225_v57 = vpack.c.bf16 %v2932_v3, %v2932_v3  ;;  %v6621_v3 = vld [vmem:[#allocation2] sm:$0xff] }
 0x4d3   : > { %v3281_v50 = vunpack.c.l.b16 %v3225_v57 }
 0x4d4   : > { %v3167_v42 = vpop.f32.mrf.mxu2 }
 0x4d5   : > { %v3245_v13 = vpack.c.bf16 %v3167_v42, %v3167_v42 }
 0x4d7   : > { %v3496_v11 = vunpack.c.l.b16 %v3245_v13 }
 0x4d8   : > { %v2934_v17 = vpop.f32.mrf.mxu1 }
 0x4d9   : > { %v3226_v14 = vpack.c.bf16 %v2934_v17, %v2934_v17 }
 0x4da   : > { %v3026_v28 = vpop.f32.mrf.mxu3 }
 0x4db   : > { %v3282_v30 = vunpack.c.l.b16 %v3226_v14  ;;  %v3233_v35 = vpack.c.bf16 %v3026_v28, %v3026_v28  ;;  %v6622_v28 = vld [vmem:[#allocation2 + $0x8] sm:$0xff] }
 0x4dc   : > { %v3169_v0 = vpop.f32.mrf.mxu2  ;;  %v3073_v33 = vpop.f32.mrf.mxu0 }
 0x4dd   : > { %v3286_v26 = vpack.c.b16 %v3282_v30, %v3281_v50  ;;  %v3246_v34 = vpack.c.bf16 %v3169_v0, %v3169_v0  ;;  %v3237_v48 = vpack.c.bf16 %v3073_v33, %v3073_v33  ;;  %v3354_v58 = vunpack.c.l.b16 %v3233_v35 }
 0x4df   : > { %v3497_v15 = vunpack.c.l.b16 %v3246_v34  ;;  %5687 = vmatmul.msk.bf16.gmra.mxu0 %vm2030_vm9, %v3286_v26  ;;  %v3423_v49 = vunpack.c.l.b16 %v3237_v48 }
 0x4e1   : > { %v3503_v56 = vpack.c.b16 %v3497_v15, %v3496_v11 }
 0x4e2   : > { %v3028_v31 = vpop.f32.mrf.mxu3 }
 0x4e3   : > { %5721 = vmatmul.msk.bf16.gmra.mxu3 %vm2030_vm9, %v3503_v56  ;;  %v3234_v63 = vpack.c.bf16 %v3028_v31, %v3028_v31 }
 0x4e4   : > { %v3075_v37 = vpop.f32.mrf.mxu0  ;;  %v3115_v12 = vpop.f32.mrf.mxu1 }
 0x4e5   : > { %v3355_v23 = vunpack.c.l.b16 %v3234_v63  ;;  %v3238_v25 = vpack.c.bf16 %v3075_v37, %v3075_v37  ;;  %v3239_v40 = vpack.c.bf16 %v3115_v12, %v3115_v12  ;;  %v6623_v63 = vld [vmem:[#allocation2 + $0x10] sm:$0xff] }
 0x4e7   : > { %v3359_v6 = vpack.c.b16 %v3355_v23, %v3354_v58  ;;  %v3424_v7 = vunpack.c.l.b16 %v3238_v25  ;;  %v3425_v41 = vunpack.c.l.b16 %v3239_v40 }
 0x4e9   : > { %v3430_v51 = vpack.c.b16 %v3424_v7, %v3423_v49  ;;  %5699 = vmatmul.msk.bf16.gmra.mxu1 %vm2030_vm9, %v3359_v6 }
 0x4ea   : > { %v3209_v2 = vpop.f32.mrf.mxu3 }
 0x4eb   : > { %5709 = vmatmul.msk.bf16.gmra.mxu2 %vm2030_vm9, %v3430_v51  ;;  %v3247_v43 = vpack.c.bf16 %v3209_v2, %v3209_v2  ;;  %v6624_v51 = vld [vmem:[#allocation2 + $0x18] sm:$0xff] }
 0x4ec   : > { %v3117_v21 = vpop.f32.mrf.mxu1 }
 0x4ed   : > { %v3240_v24 = vpack.c.bf16 %v3117_v21, %v3117_v21  ;;  %v3498_v38 = vunpack.c.l.b16 %v3247_v43 }
 0x4ef   : > { %v3426_v18 = vunpack.c.l.b16 %v3240_v24 }
 0x4f1   : > { %v3431_v1 = vpack.c.b16 %v3426_v18, %v3425_v41 }
 0x4f2   : > { %v3211_v54 = vpop.f32.mrf.mxu3 }
 0x4f3   : > { %v3248_v4 = vpack.c.bf16 %v3211_v54, %v3211_v54 }
 0x4f4   : > { %v3120_v29 = vpop.f32.mrf.mxu1 }
 0x4f5   : > { %v3499_v62 = vunpack.c.l.b16 %v3248_v4  ;;  %v3241_v61 = vpack.c.bf16 %v3120_v29, %v3120_v29  ;;  %v6625_v29 = vld [vmem:[#allocation2 + $0x20] sm:$0xff] }
 0x4f7   : > { %v3504_v52 = vpack.c.b16 %v3499_v62, %v3498_v38  ;;  %v3427_v8 = vunpack.c.l.b16 %v3241_v61 }
 0x4f9   : > { %5722 = vmatmul.msk.bf16.gmra.mxu3 %vm2030_vm9, %v3504_v52 }
 0x4fa   : > { %v3214_v53 = vpop.f32.mrf.mxu3 }
 0x4fb   : > { %5710 = vmatmul.msk.bf16.gmra.mxu2 %vm2030_vm9, %v3431_v1  ;;  %v3249_v59 = vpack.c.bf16 %v3214_v53, %v3214_v53 }
 0x4fc   : > { %v3122_v10 = vpop.f32.mrf.mxu1 }
 0x4fd   : > { %v3242_v32 = vpack.c.bf16 %v3122_v10, %v3122_v10  ;;  %v3500_v27 = vunpack.c.l.b16 %v3249_v59  ;;  %v6626_v59 = vld [vmem:[#allocation2 + $0x28] sm:$0xff] }
 0x4ff   : > { %v3428_v55 = vunpack.c.l.b16 %v3242_v32 }
 0x501   : > { %v3432_v19 = vpack.c.b16 %v3428_v55, %v3427_v8  ;;  %v6627_v8 = vld [vmem:[#allocation2 + $0x30] sm:$0xff] }
 0x502   : > { %v3216_v45 = vpop.f32.mrf.mxu3 }
 0x503   : > { %v3250_v60 = vpack.c.bf16 %v3216_v45, %v3216_v45 }
 0x505   : > { %v3501_v5 = vunpack.c.l.b16 %v3250_v60 }
 0x507   : > { %v3505_v39 = vpack.c.b16 %v3501_v5, %v3500_v27 }
 0x509   : > { %5723 = vmatmul.msk.bf16.gmra.mxu3 %vm2030_vm9, %v3505_v39 }
 0x50b   : > { %5711 = vmatmul.msk.bf16.gmra.mxu2 %vm2030_vm9, %v3432_v19 }
 0x521   : > { %v3320_v16 = vpop.f32.mrf.mxu0 }
 0x526   : > { %v3393_v44 = vpop.f32.mrf.mxu1 }
 0x527   : > { %v3559_v46 = vadd.f32 %v3393_v44, %v3320_v16  ;;  %v8500_v16 = vld [vmem:[#allocation18_spill] sm:$0xff] }
 0x529   : > { %v3322_v57 = vpop.f32.mrf.mxu0 }
 0x52e   : > { %v3395_v36 = vpop.f32.mrf.mxu1 }
 0x52f   : > { %v3562_v17 = vadd.f32 %v3395_v36, %v3322_v57 }
 0x531   : > { %v3325_v26 = vpop.f32.mrf.mxu0 }
 0x536   : > { %v3398_v34 = vpop.f32.mrf.mxu1 }
 0x537   : > { %v3565_v11 = vadd.f32 %v3398_v34, %v3325_v26 }
 0x539   : > { %v3327_v35 = vpop.f32.mrf.mxu0 }
 0x53e   : > { %v3400_v31 = vpop.f32.mrf.mxu1 }
 0x53f   : > { %v3568_v58 = vadd.f32 %v3400_v31, %v3327_v35 }
 0x542   : > { %v3330_v7 = vpop.f32.mrf.mxu0 }
 0x54a   : > { %v3403_v49 = vpop.f32.mrf.mxu1  ;;  %v3332_v18 = vpop.f32.mrf.mxu0 }
 0x54b   : > { %v3571_v43 = vadd.f32 %v3403_v49, %v3330_v7 }
 0x552   : > { %v3466_v47 = vpop.f32.mrf.mxu2  ;;  %v3405_v4 = vpop.f32.mrf.mxu1 }
 0x553   : > { %v3560_v22 = vadd.f32 %v3559_v46, %v3466_v47  ;;  %v3574_v62 = vadd.f32 %v3405_v4, %v3332_v18  ;;  %v6252_v4 = vld [vmem:[%s6905_s18 + $0xe4] sm:$0xf]  ;;  %v5840_v18 = vld [vmem:[%s6905_s18 + $0xf0] sm:$0xf0] }
 0x554   : > { %v3539_v9 = vpop.f32.mrf.mxu3 }
 0x555   : > { %v3561_v20 = vadd.f32 %v3560_v22, %v3539_v9 }
 0x557   : > { %v7852_v42 = vadd.f32 %v6621_v3, %v3561_v20 }
 0x559   : > { %3592 = vadd.xlane.f32.xlu2 %v7852_v42 }
 0x55a   : > { %v3468_v14 = vpop.f32.mrf.mxu2 }
 0x55b   : > { %v3563_v50 = vadd.f32 %v3562_v17, %v3468_v14 }
 0x55c   : > { %v3541_v13 = vpop.f32.mrf.mxu3  ;;  %v3335_v45 = vpop.f32.mrf.mxu0 }
 0x55d   : > { %v3564_v30 = vadd.f32 %v3563_v50, %v3541_v13 }
 0x55f   : > { %v7855_v0 = vadd.f32 %v6622_v28, %v3564_v30  ;;  %v6628_v28 = vld [vmem:[#allocation2 + $0x38] sm:$0xff] }
 0x561   : > { %3594 = vadd.xlane.f32.xlu0 %v7855_v0 }
 0x564   : > { %v3337_v47 = vpop.f32.mrf.mxu0 }
 0x566   : > { %v3544_v33 = vpop.f32.mrf.mxu3  ;;  %v3408_v10 = vpop.f32.mrf.mxu1 }
 0x567   : > { %v3577_v61 = vadd.f32 %v3408_v10, %v3335_v45  ;;  %v5848_v10 = vld [vmem:[%s6905_s18 + $0xf8] sm:$0xf0]  ;;  %v5822_v45 = vld [vmem:[%s6905_s18 + $0xc0] sm:$0xf] }
 0x56e   : > { %v3471_v15 = vpop.f32.mrf.mxu2  ;;  %v3546_v12 = vpop.f32.mrf.mxu3 }
 0x56f   : > { %v3566_v56 = vadd.f32 %v3565_v11, %v3471_v15  ;;  %v3410_v19 = vpop.f32.mrf.mxu1 }
 0x570   : > { %v3580_v9 = vadd.f32 %v3410_v19, %v3337_v47  ;;  %v5832_v47 = vld [vmem:[%s6905_s18 + $0xd8] sm:$0xf0] }
 0x571   : > { %v3567_v48 = vadd.f32 %v3566_v56, %v3544_v33 }
 0x573   : > { %v7858_v37 = vadd.f32 %v6623_v63, %v3567_v48 }
 0x575   : > { %3596 = vadd.xlane.f32.xlu1 %v7858_v37 }
 0x576   : > { %v3473_v23 = vpop.f32.mrf.mxu2 }
 0x577   : > { %v3569_v25 = vadd.f32 %v3568_v58, %v3473_v23 }
 0x579   : > { %v3570_v6 = vadd.f32 %v3569_v25, %v3546_v12 }
 0x57b   : > { %v7861_v2 = vadd.f32 %v6624_v51, %v3570_v6 }
 0x57c   : > { %v3549_v21 = vpop.f32.mrf.mxu3 }
 0x57d   : > { %3598 = vadd.xlane.f32.xlu2 %v7861_v2 }
 0x57e   : > { %v3476_v24 = vpop.f32.mrf.mxu2 }
 0x57f   : > { %v3572_v54 = vadd.f32 %v3571_v43, %v3476_v24 }
 0x581   : > { %v3573_v40 = vadd.f32 %v3572_v54, %v3549_v21  ;;  %v5838_v54 = vld [vmem:[%s6905_s18 + $0xe0] sm:$0xf] }
 0x583   : > { %v7864_v38 = vadd.f32 %v6625_v29, %v3573_v40  ;;  %v6254_v40 = vld [vmem:[%s6905_s18 + $0xec] sm:$0xf0] }
 0x584   : > { %v3551_v41 = vpop.f32.mrf.mxu3  ;;  %v5839_v29 = vor.u32 %v6254_v40, %v5838_v54  ;;  %v5774_v54 = vld [vmem:[%s6905_s18 + $0x60] sm:$0xf]  ;;  %v6238_v40 = vld [vmem:[%s6905_s18 + $0x6c] sm:$0xf0] }
 0x585   : > { %3600 = vadd.xlane.f32.xlu0 %v7864_v38 }
 0x586   : > { %v3478_v52 = vpop.f32.mrf.mxu2  ;;  %3959 = vmatpush.bf16.msra.mxu0 %v5839_v29  ;;  %v5775_v29 = vor.u32 %v6238_v40, %v5774_v54  ;;  %v6225_v54 = vld [vmem:[%s6905_s18 + $0xc] sm:$0xf]  ;;  %v5736_v40 = vld [vmem:[%s6905_s18 + $0x18] sm:$0xf0] }
 0x587   : > { %v3575_v1 = vadd.f32 %v3574_v62, %v3478_v52  ;;  %v5846_v62 = vld [vmem:[%s6905_s18 + $0xe8] sm:$0xf]  ;;  %v5843_v52 = vor.u32 %v6252_v4, %v5840_v18  ;;  %v6236_v4 = vld [vmem:[%s6905_s18 + $0x64] sm:$0xf]  ;;  %v5776_v18 = vld [vmem:[%s6905_s18 + $0x70] sm:$0xf0] }
 0x589   : > { %v3576_v53 = vadd.f32 %v3575_v1, %v3551_v41  ;;  %v6255_v41 = vld [vmem:[%s6905_s18 + $0xf4] sm:$0xf0]  ;;  %3988 = vmatpush.bf16.msra.mxu1 %v5843_v52  ;;  %v5779_v52 = vor.u32 %v6236_v4, %v5776_v18  ;;  %v5739_v4 = vor.u32 %v6225_v54, %v5736_v40 }
 0x58a   : > { %v5847_v1 = vor.u32 %v6255_v41, %v5846_v62  ;;  %v5782_v62 = vld [vmem:[%s6905_s18 + $0x68] sm:$0xf]  ;;  %v6239_v41 = vld [vmem:[%s6905_s18 + $0x74] sm:$0xf0] }
 0x58b   : > { %v7867_v32 = vadd.f32 %v6626_v59, %v3576_v53  ;;  %v6253_v53 = vld [vmem:[%s6905_s18 + $0xec] sm:$0xf] }
 0x58c   : > { %v3554_v55 = vpop.f32.mrf.mxu3  ;;  %v5851_v59 = vor.u32 %v6253_v53, %v5848_v10  ;;  %4017 = vmatpush.bf16.msra.mxu2 %v5847_v1  ;;  %v5783_v1 = vor.u32 %v6239_v41, %v5782_v62  ;;  %v6237_v53 = vld [vmem:[%s6905_s18 + $0x6c] sm:$0xf]  ;;  %v5784_v10 = vld [vmem:[%s6905_s18 + $0x78] sm:$0xf0] }
 0x58d   : > { %3602 = vadd.xlane.f32.xlu1 %v7867_v32 }
 0x58e   : > { %v3481_v60 = vpop.f32.mrf.mxu2  ;;  %4046 = vmatpush.bf16.msra.mxu3 %v5851_v59  ;;  %v5787_v59 = vor.u32 %v6237_v53, %v5784_v10 }
 0x58f   : > { %v3578_v27 = vadd.f32 %v3577_v61, %v3481_v60  ;;  %v6250_v61 = vld [vmem:[%s6905_s18 + $0xcc] sm:$0xf0]  ;;  %v6248_v60 = vld [vmem:[%s6905_s18 + $0xc4] sm:$0xf] }
 0x591   : > { %v3579_v5 = vadd.f32 %v3578_v27, %v3554_v55  ;;  %v5823_v27 = vor.u32 %v6250_v61, %v5822_v45  ;;  %v5824_v55 = vld [vmem:[%s6905_s18 + $0xd0] sm:$0xf0]  ;;  %v5758_v45 = vld [vmem:[%s6905_s18 + $0x40] sm:$0xf]  ;;  %v6234_v61 = vld [vmem:[%s6905_s18 + $0x4c] sm:$0xf0] }
 0x592   : > { %v5827_v19 = vor.u32 %v6248_v60, %v5824_v55  ;;  %v6232_v60 = vld [vmem:[%s6905_s18 + $0x44] sm:$0xf]  ;;  %v5760_v55 = vld [vmem:[%s6905_s18 + $0x50] sm:$0xf0] }
 0x593   : > { %v7870_v39 = vadd.f32 %v6627_v8, %v3579_v5  ;;  %v5830_v5 = vld [vmem:[%s6905_s18 + $0xc8] sm:$0xf]  ;;  %v6251_v8 = vld [vmem:[%s6905_s18 + $0xd4] sm:$0xf0]  ;;  %3960 = vmatpush.bf16.msra.mxu0 %v5823_v27  ;;  %v5759_v27 = vor.u32 %v6234_v61, %v5758_v45 }
 0x594   : > { %v3556_v57 = vpop.f32.mrf.mxu3  ;;  %3989 = vmatpush.bf16.msra.mxu1 %v5827_v19  ;;  %v5763_v19 = vor.u32 %v6232_v60, %v5760_v55 }
 0x595   : > { %3604 = vadd.xlane.f32.xlu1 %v7870_v39 }
 0x596   : > { %v3483_v22 = vpop.f32.mrf.mxu2 }
 0x597   : > { %v3581_v36 = vadd.f32 %v3580_v9, %v3483_v22  ;;  %v5806_v9 = vld [vmem:[%s6905_s18 + $0xa0] sm:$0xf] }
 0x599   : > { %v3582_v14 = vadd.f32 %v3581_v36, %v3556_v57  ;;  %v6246_v36 = vld [vmem:[%s6905_s18 + $0xac] sm:$0xf0] }
 0x59a   : > { %v5807_v57 = vor.u32 %v6246_v36, %v5806_v9  ;;  %v5742_v9 = vld [vmem:[%s6905_s18 + $0x20] sm:$0xf]  ;;  %v6230_v36 = vld [vmem:[%s6905_s18 + $0x2c] sm:$0xf0] }
 0x59b   : > { %v7885_v26 = vadd.f32 %v6628_v28, %v3582_v14  ;;  %v5814_v14 = vld [vmem:[%s6905_s18 + $0xa8] sm:$0xf] }
 0x59c   : > { %3961 = vmatpush.bf16.msra.mxu0 %v5807_v57  ;;  %v5743_v57 = vor.u32 %v6230_v36, %v5742_v9  ;;  %v7995_v9 = vld [vmem:[%s536_s17] ss:$0 sm:$0xff] }
 0x5cc   : > { %v3593_v44 = vpop.xlane.xlu2 %3592 }
 0x5cd   : > { %v3608_v46 = vmul.f32 %v3593_v44, %v8500_v16  ;;  %v5831_v44 = vor.u32 %v6251_v8, %v5830_v5  ;;  %v5766_v5 = vld [vmem:[%s6905_s18 + $0x48] sm:$0xf]  ;;  %v6235_v8 = vld [vmem:[%s6905_s18 + $0x54] sm:$0xf0] }
 0x5cf   : > { %v7875_v20 = vsub.f32 %v7852_v42, %v3608_v46  ;;  %v6249_v46 = vld [vmem:[%s6905_s18 + $0xcc] sm:$0xf]  ;;  %4018 = vmatpush.bf16.msra.mxu2 %v5831_v44  ;;  %v5767_v44 = vor.u32 %v6235_v8, %v5766_v5 }
 0x5d0   : > { %v5835_v22 = vor.u32 %v6249_v46, %v5832_v47  ;;  %v6233_v46 = vld [vmem:[%s6905_s18 + $0x4c] sm:$0xf]  ;;  %v5768_v47 = vld [vmem:[%s6905_s18 + $0x58] sm:$0xf0] }
 0x5d1   : > { %v3624_v3 = vmul.f32 %v7875_v20, %v7875_v20 }
 0x5d2   : > { %4047 = vmatpush.bf16.msra.mxu3 %v5835_v22  ;;  %v5771_v22 = vor.u32 %v6233_v46, %v5768_v47 }
 0x5d3   : > { %3632 = vadd.xlane.f32.xlu2 %v3624_v3  ;;  %v6244_v3 = vld [vmem:[%s6905_s18 + $0xa4] sm:$0xf] }
 0x5d4   : > { %v3595_v17 = vpop.xlane.xlu0 %3594 }
 0x5d5   : > { %v3609_v50 = vmul.f32 %v3595_v17, %v8500_v16  ;;  %v5808_v17 = vld [vmem:[%s6905_s18 + $0xb0] sm:$0xf0] }
 0x5d7   : > { %v7881_v13 = vsub.f32 %v7855_v0, %v3609_v50  ;;  %v6247_v50 = vld [vmem:[%s6905_s18 + $0xb4] sm:$0xf0] }
 0x5d8   : > { %v5815_v28 = vor.u32 %v6247_v50, %v5814_v14  ;;  %v5750_v14 = vld [vmem:[%s6905_s18 + $0x28] sm:$0xf]  ;;  %v6231_v50 = vld [vmem:[%s6905_s18 + $0x34] sm:$0xf0] }
 0x5d9   : > { %v3625_v30 = vmul.f32 %v7881_v13, %v7881_v13 }
 0x5da   : > { %4019 = vmatpush.bf16.msra.mxu2 %v5815_v28  ;;  %v5751_v28 = vor.u32 %v6231_v50, %v5750_v14 }
 0x5db   : > { %3634 = vadd.xlane.f32.xlu0 %v3625_v30  ;;  %3606 = vadd.xlane.f32.xlu2 %v7885_v26  ;;  %v5811_v30 = vor.u32 %v6244_v3, %v5808_v17  ;;  %v6228_v3 = vld [vmem:[%s6905_s18 + $0x24] sm:$0xf]  ;;  %v5744_v17 = vld [vmem:[%s6905_s18 + $0x30] sm:$0xf0] }
 0x5dd   : > { %3990 = vmatpush.bf16.msra.mxu1 %v5811_v30  ;;  %v5747_v30 = vor.u32 %v6228_v3, %v5744_v17 }
 0x5e8   : > { %v3597_v34 = vpop.xlane.xlu1 %3596 }
 0x5e9   : > { %v3610_v33 = vmul.f32 %v3597_v34, %v8500_v16  ;;  %v6245_v34 = vld [vmem:[%s6905_s18 + $0xac] sm:$0xf] }
 0x5eb   : > { %v7890_v11 = vsub.f32 %v7858_v37, %v3610_v33  ;;  %v5816_v33 = vld [vmem:[%s6905_s18 + $0xb8] sm:$0xf0] }
 0x5ed   : > { %v3626_v15 = vmul.f32 %v7890_v11, %v7890_v11 }
 0x5ef   : > { %3636 = vadd.xlane.f32.xlu0 %v3626_v15  ;;  %v5819_v15 = vor.u32 %v6245_v34, %v5816_v33  ;;  %v6229_v34 = vld [vmem:[%s6905_s18 + $0x2c] sm:$0xf]  ;;  %v5752_v33 = vld [vmem:[%s6905_s18 + $0x38] sm:$0xf0] }
 0x5f0   : > { %v3599_v56 = vpop.xlane.xlu2 %3598 }
 0x5f1   : > { %v3611_v35 = vmul.f32 %v3599_v56, %v8500_v16  ;;  %v5790_v56 = vld [vmem:[%s6905_s18 + $0x80] sm:$0xf]  ;;  %4048 = vmatpush.bf16.msra.mxu3 %v5819_v15 }
 0x5f3   : > { %v7896_v31 = vsub.f32 %v7861_v2, %v3611_v35  ;;  %v6242_v35 = vld [vmem:[%s6905_s18 + $0x8c] sm:$0xf0] }
 0x5f5   : > { %v3627_v48 = vmul.f32 %v7896_v31, %v7896_v31 }
 0x5f7   : > { %3638 = vadd.xlane.f32.xlu1 %v3627_v48  ;;  %v6240_v48 = vld [vmem:[%s6905_s18 + $0x84] sm:$0xf] }
 0x5f8   : > { %v3601_v63 = vpop.xlane.xlu0 %3600 }
 0x5f9   : > { %v3612_v12 = vmul.f32 %v3601_v63, %v8500_v16  ;;  %v5791_v63 = vor.u32 %v6242_v35, %v5790_v56  ;;  %v5755_v56 = vor.u32 %v6229_v34, %v5752_v33 }
 0x5fb   : > { %v7902_v58 = vsub.f32 %v7864_v38, %v3612_v12  ;;  %v5792_v12 = vld [vmem:[%s6905_s18 + $0x90] sm:$0xf0]  ;;  %3962 = vmatpush.bf16.msra.mxu0 %v5791_v63  ;;  %v6226_v63 = vld [vmem:[%s6905_s18 + $0xc] sm:$0xf0] }
 0x5fd   : > { %v3628_v23 = vmul.f32 %v7902_v58, %v7902_v58 }
 0x5ff   : > { %3640 = vadd.xlane.f32.xlu2 %v3628_v23  ;;  %v5798_v23 = vld [vmem:[%s6905_s18 + $0x88] sm:$0xf]  ;;  %3963 = vmatpush.bf16.msra.mxu0 %v5775_v29 }
 0x600   : > { %v3603_v25 = vpop.xlane.xlu1 %3602 }
 0x601   : > { %v3613_v49 = vmul.f32 %v3603_v25, %v8500_v16  ;;  %v6243_v25 = vld [vmem:[%s6905_s18 + $0x94] sm:$0xf0] }
 0x603   : > { %v7908_v6 = vsub.f32 %v7867_v32, %v3613_v49  ;;  %v5795_v49 = vor.u32 %v6240_v48, %v5792_v12  ;;  %3964 = vmatpush.bf16.msra.mxu0 %v5759_v27  ;;  %v5726_v48 = vld [vmem:[%s6905_s18] sm:$0xf]  ;;  %v6224_v12 = vld [vmem:[%s6905_s18 + $0x4] sm:$0xf] }
 0x605   : > { %v3629_v7 = vmul.f32 %v7908_v6, %v7908_v6  ;;  %3991 = vmatpush.bf16.msra.mxu1 %v5795_v49  ;;  %v5734_v49 = vld [vmem:[%s6905_s18 + $0x8] sm:$0xf] }
 0x607   : > { %3642 = vadd.xlane.f32.xlu0 %v3629_v7  ;;  %v5799_v7 = vor.u32 %v6243_v25, %v5798_v23  ;;  %3965 = vmatpush.bf16.msra.mxu0 %v5743_v57  ;;  %v5727_v23 = vor.u32 %v6226_v63, %v5726_v48  ;;  %v5728_v25 = vld [vmem:[%s6905_s18 + $0x10] sm:$0xf0] }
 0x608   : > { %v3605_v51 = vpop.xlane.xlu1 %3604 }
 0x609   : > { %v3614_v21 = vmul.f32 %v3605_v51, %v8500_v16  ;;  %v6241_v51 = vld [vmem:[%s6905_s18 + $0x8c] sm:$0xf]  ;;  %4020 = vmatpush.bf16.msra.mxu2 %v5799_v7  ;;  %3992 = vmatpush.bf16.msra.mxu1 %v5779_v52  ;;  %v6227_v7 = vld [vmem:[%s6905_s18 + $0x14] sm:$0xf0] }
 0x60b   : > { %v7914_v43 = vsub.f32 %v7870_v39, %v3614_v21  ;;  %v5800_v21 = vld [vmem:[%s6905_s18 + $0x98] sm:$0xf0]  ;;  %3966 = vmatpush.bf16.msra.mxu0 %v5727_v23 }
 0x60d   : > { %v3630_v24 = vmul.f32 %v7914_v43, %v7914_v43  ;;  %4021 = vmatpush.bf16.msra.mxu2 %v5783_v1  ;;  %3993 = vmatpush.bf16.msra.mxu1 %v5763_v19 }
 0x60f   : > { %3644 = vadd.xlane.f32.xlu1 %v3630_v24  ;;  %v5803_v24 = vor.u32 %v6241_v51, %v5800_v21  ;;  %v5731_v21 = vor.u32 %v6224_v12, %v5728_v25 }
 0x611   : > { %4049 = vmatpush.bf16.msra.mxu3 %v5803_v24  ;;  %4022 = vmatpush.bf16.msra.mxu2 %v5767_v44  ;;  %v5735_v24 = vor.u32 %v6227_v7, %v5734_v49 }
 0x612   : > { %3994 = vmatpush.bf16.msra.mxu1 %v5747_v30 }
 0x615   : > { %4050 = vmatpush.bf16.msra.mxu3 %v5787_v59  ;;  %4023 = vmatpush.bf16.msra.mxu2 %v5751_v28 }
 0x616   : > { %3995 = vmatpush.bf16.msra.mxu1 %v5731_v21 }
 0x619   : > { %4051 = vmatpush.bf16.msra.mxu3 %v5771_v22  ;;  %4024 = vmatpush.bf16.msra.mxu2 %v5735_v24 }
 0x61d   : > { %4052 = vmatpush.bf16.msra.mxu3 %v5755_v56 }
 0x621   : > { %4053 = vmatpush.bf16.msra.mxu3 %v5739_v4 }
 0x646   : > { %v3633_v15 = vpop.xlane.xlu2 %3632 }
 0x647   : > { %v3648_v35 = vmul.f32 %v3633_v15, %v8500_v16 }
 0x649   : > { %v3656_v51 = vadd.f32 1e-05, %v3648_v35 }
 0x64b   : > { %6541 = vrsqrt.f32 %v3656_v51  ;;  %vm3670_vm15 = vweird.f32 %v3656_v51 }
 0x64e   : > { %v3635_v29 = vpop.xlane.xlu0 %3634  ;;  %v3607_v18 = vpop.xlane.xlu2 %3606 }
 0x64f   : > { %v3649_v62 = vmul.f32 %v3635_v29, %v8500_v16  ;;  %v3615_v41 = vmul.f32 %v3607_v18, %v8500_v16 }
 0x651   : > { %v6542_v52 = vpop.eup %6541  ;;  %v3657_v1 = vadd.f32 1e-05, %v3649_v62  ;;  %v7986_v53 = vsub.f32 %v7885_v26, %v3615_v41 }
 0x652   : > { %v3665_v10 = vmul.f32 %v6542_v52, %v3656_v51  ;;  %vm3671_vm14 = vweird.f32 %v6542_v52 }
 0x653   : > { %6543 = vrsqrt.f32 %v3657_v1  ;;  %v3631_v59 = vmul.f32 %v7986_v53, %v7986_v53  ;;  %vm3672_vm0 = vmor %vm3670_vm15, %vm3671_vm14  ;;  %vm3680_vm2 = vweird.f32 %v3657_v1 }
 0x654   : > { %v3666_v45 = vmul.f32 %v6542_v52, %v3665_v10 }
 0x655   : > { %3646 = vadd.xlane.f32.xlu2 %v3631_v59 }
 0x656   : > { %v3667_v61 = vmul.f32 0.5, %v3666_v45 }
 0x658   : > { %v3668_v60 = vsub.f32 1.5, %v3667_v61 }
 0x659   : > { %v6544_v27 = vpop.eup %6543 }
 0x65a   : > { %v3675_v55 = vmul.f32 %v6544_v27, %v3657_v1  ;;  %v3669_v5 = vmul.f32 %v6542_v52, %v3668_v60  ;;  %vm3681_vm1 = vweird.f32 %v6544_v27 }
 0x65b   : > { %vm3682_vm3 = vmor %vm3680_vm2, %vm3681_vm1 }
 0x65c   : > { %v3676_v8 = vmul.f32 %v6544_v27, %v3675_v55  ;;  %v3673_v44 = vsel %vm3672_vm0, %v6542_v52, %v3669_v5 }
 0x65d   : > { %v3744_v36 = vmul.f32 %v3673_v44, %v7875_v20 }
 0x65e   : > { %v3677_v19 = vmul.f32 0.5, %v3676_v8 }
 0x65f   : > { %v3755_v50 = vmul.f32 %v7995_v9, %v3744_v36 }
 0x660   : > { %v3678_v46 = vsub.f32 1.5, %v3677_v19 }
 0x662   : > { %v3679_v47 = vmul.f32 %v6544_v27, %v3678_v46  ;;  %v3637_v22 = vpop.xlane.xlu0 %3636 }
 0x663   : > { %v3650_v3 = vmul.f32 %v3637_v22, %v8500_v16 }
 0x664   : > { %v3683_v57 = vsel %vm3682_vm3, %v6544_v27, %v3679_v47 }
 0x665   : > { %v3745_v17 = vmul.f32 %v3683_v57, %v7881_v13  ;;  %v3658_v14 = vadd.f32 1e-05, %v3650_v3 }
 0x667   : > { %v3756_v30 = vmul.f32 %v7995_v9, %v3745_v17  ;;  %6545 = vrsqrt.f32 %v3658_v14  ;;  %vm3690_vm5 = vweird.f32 %v3658_v14 }
 0x669   : > { %v3763_v28 = vpack.c.bf16 %v3756_v30, %v3755_v50 }
 0x66a   : > { %v3639_v34 = vpop.xlane.xlu1 %3638 }
 0x66b   : > { %v3651_v33 = vmul.f32 %v3639_v34, %v8500_v16  ;;  %3967 = vmatmul.bf16.vlgmr.msra.gmra.mxu0 %v3763_v28  ;;  %3996 = vmatmul.bf16.vlgmr.msra.gmra.mxu1 %v3763_v28 }
 0x66c   : > { %4025 = vmatmul.bf16.vlgmr.msra.gmra.mxu2 %v3763_v28  ;;  %4054 = vmatmul.bf16.vlgmr.msra.gmra.mxu3 %v3763_v28 }
 0x66d   : > { %v6546_v20 = vpop.eup %6545  ;;  %v3659_v15 = vadd.f32 1e-05, %v3651_v33 }
 0x66e   : > { %v3685_v56 = vmul.f32 %v6546_v20, %v3658_v14  ;;  %vm3691_vm4 = vweird.f32 %v6546_v20 }
 0x66f   : > { %6547 = vrsqrt.f32 %v3659_v15  ;;  %vm3692_vm6 = vmor %vm3690_vm5, %vm3691_vm4  ;;  %vm3700_vm8 = vweird.f32 %v3659_v15 }
 0x670   : > { %v3686_v35 = vmul.f32 %v6546_v20, %v3685_v56 }
 0x672   : > { %v3687_v13 = vmul.f32 0.5, %v3686_v35  ;;  %v3641_v48 = vpop.xlane.xlu2 %3640 }
 0x673   : > { %v3652_v63 = vmul.f32 %v3641_v48, %v8500_v16  ;;  %v6270_v48 = vld [vmem:[%s6910_s16 + $0x70] sm:$0xff] }
 0x674   : > { %v3688_v12 = vsub.f32 1.5, %v3687_v13  ;;  %v6262_v13 = vld [vmem:[%s6910_s16 + $0x30] sm:$0xff] }
 0x675   : > { %v6548_v23 = vpop.eup %6547  ;;  %v3660_v25 = vadd.f32 1e-05, %v3652_v63 }
 0x676   : > { %v3695_v49 = vmul.f32 %v6548_v23, %v3659_v15  ;;  %v3689_v7 = vmul.f32 %v6546_v20, %v3688_v12  ;;  %vm3701_vm7 = vweird.f32 %v6548_v23  ;;  %v6271_v15 = vld [vmem:[%s6910_s16 + $0x78] sm:$0xff] }
 0x677   : > { %6549 = vrsqrt.f32 %v3660_v25  ;;  %vm3702_vm9 = vmor %vm3700_vm8, %vm3701_vm7  ;;  %vm3710_vm11 = vweird.f32 %v3660_v25  ;;  %4664 = vmatpush.bf16.msrb.mxu1 %v6271_v15  ;;  %v6279_v12 = vld [vmem:[%s6910_s16 + $0xb8] sm:$0xff] }
 0x678   : > { %v3696_v51 = vmul.f32 %v6548_v23, %v3695_v49  ;;  %v3693_v40 = vsel %vm3692_vm6, %v6546_v20, %v3689_v7  ;;  %v6263_v20 = vld [vmem:[%s6910_s16 + $0x38] sm:$0xff]  ;;  %4693 = vmatpush.bf16.msrb.mxu2 %v6279_v12 }
 0x679   : > { %v3746_v52 = vmul.f32 %v3693_v40, %v7890_v11  ;;  %4635 = vmatpush.bf16.msrb.mxu0 %v6263_v20  ;;  %v6268_v40 = vld [vmem:[%s6910_s16 + $0x60] sm:$0xff] }
 0x67a   : > { %v3697_v21 = vmul.f32 0.5, %v3696_v51  ;;  %v3643_v24 = vpop.xlane.xlu0 %3642  ;;  %v6278_v51 = vld [vmem:[%s6910_s16 + $0xb0] sm:$0xff] }
 0x67b   : > { %v3653_v54 = vmul.f32 %v3643_v24, %v8500_v16  ;;  %v3757_v61 = vmul.f32 %v7995_v9, %v3746_v52  ;;  %4665 = vmatpush.bf16.msrb.mxu1 %v6270_v48 }
 0x67c   : > { %v3698_v4 = vsub.f32 1.5, %v3697_v21  ;;  %v6286_v21 = vld [vmem:[%s6910_s16 + $0xf0] sm:$0xff]  ;;  %4694 = vmatpush.bf16.msrb.mxu2 %v6278_v51 }
 0x67d   : > { %v6550_v29 = vpop.eup %6549  ;;  %v3661_v18 = vadd.f32 1e-05, %v3653_v54  ;;  %4636 = vmatpush.bf16.msrb.mxu0 %v6262_v13  ;;  %v6260_v54 = vld [vmem:[%s6910_s16 + $0x20] sm:$0xff] }
 0x67e   : > { %v3699_v62 = vmul.f32 %v6548_v23, %v3698_v4  ;;  %v3705_v41 = vmul.f32 %v6550_v29, %v3660_v25  ;;  %vm3711_vm10 = vweird.f32 %v6550_v29  ;;  %v6269_v25 = vld [vmem:[%s6910_s16 + $0x68] sm:$0xff] }
 0x67f   : > { %6551 = vrsqrt.f32 %v3661_v18  ;;  %vm3712_vm12 = vmor %vm3710_vm11, %vm3711_vm10  ;;  %vm3720_vm14 = vweird.f32 %v3661_v18  ;;  %4666 = vmatpush.bf16.msrb.mxu1 %v6269_v25 }
 0x680   : > { %v3703_v1 = vsel %vm3702_vm9, %v6548_v23, %v3699_v62  ;;  %v3706_v10 = vmul.f32 %v6550_v29, %v3705_v41  ;;  %v6261_v23 = vld [vmem:[%s6910_s16 + $0x28] sm:$0xff] }
 0x681   : > { %v3747_v59 = vmul.f32 %v3703_v1, %v7896_v31  ;;  %4637 = vmatpush.bf16.msrb.mxu0 %v6261_v23  ;;  %v6277_v62 = vld [vmem:[%s6910_s16 + $0xa8] sm:$0xff] }
 0x682   : > { %v3707_v45 = vmul.f32 0.5, %v3706_v10  ;;  %v3645_v50 = vpop.xlane.xlu1 %3644  ;;  %v6285_v41 = vld [vmem:[%s6910_s16 + $0xe8] sm:$0xff]  ;;  %4695 = vmatpush.bf16.msrb.mxu2 %v6277_v62  ;;  %v6259_v10 = vld [vmem:[%s6910_s16 + $0x18] sm:$0xff] }
 0x683   : > { %v3758_v60 = vmul.f32 %v7995_v9, %v3747_v59  ;;  %4667 = vmatpush.bf16.msrb.mxu1 %v6268_v40  ;;  %v6267_v59 = vld [vmem:[%s6910_s16 + $0x58] sm:$0xff] }
 0x684   : > { %v3708_v27 = vsub.f32 1.5, %v3707_v45 }
 0x685   : > { %v6552_v55 = vpop.eup %6551  ;;  %v3764_v5 = vpack.c.bf16 %v3758_v60, %v3757_v61  ;;  %4638 = vmatpush.bf16.msrb.mxu0 %v6260_v54  ;;  %v6276_v61 = vld [vmem:[%s6910_s16 + $0xa0] sm:$0xff] }
 0x686   : > { %v3715_v8 = vmul.f32 %v6552_v55, %v3661_v18  ;;  %v3709_v19 = vmul.f32 %v6550_v29, %v3708_v27  ;;  %vm3721_vm13 = vweird.f32 %v6552_v55  ;;  %v6284_v60 = vld [vmem:[%s6910_s16 + $0xe0] sm:$0xff]  ;;  %4696 = vmatpush.bf16.msrb.mxu2 %v6276_v61 }
 0x687   : > { %3972 = vmatmul.bf16.gmra.mxu0 %v3764_v5  ;;  %4001 = vmatmul.bf16.gmra.mxu1 %v3764_v5  ;;  %vm3722_vm15 = vmor %vm3720_vm14, %vm3721_vm13 }
 0x688   : > { %v3716_v11 = vmul.f32 %v6552_v55, %v3715_v8  ;;  %4030 = vmatmul.bf16.gmra.mxu2 %v3764_v5  ;;  %4059 = vmatmul.bf16.gmra.mxu3 %v3764_v5  ;;  %v3713_v31 = vsel %vm3712_vm12, %v6550_v29, %v3709_v19  ;;  %v6258_v5 = vld [vmem:[%s6910_s16 + $0x10] sm:$0xff] }
 0x689   : > { %v3748_v22 = vmul.f32 %v3713_v31, %v7902_v58  ;;  %v3654_v58 = vmul.f32 %v3645_v50, %v8500_v16  ;;  %4639 = vmatpush.bf16.msrb.mxu0 %v6259_v10  ;;  %4668 = vmatpush.bf16.msrb.mxu1 %v6267_v59  ;;  %v6266_v8 = vld [vmem:[%s6910_s16 + $0x50] sm:$0xff]  ;;  %v6281_v50 = vld [vmem:[%s6910_s16 + $0xc8] sm:$0xff] }
 0x68a   : > { %v3717_v44 = vmul.f32 0.5, %v3716_v11  ;;  %v6275_v11 = vld [vmem:[%s6910_s16 + $0x98] sm:$0xff] }
 0x68b   : > { %v3759_v57 = vmul.f32 %v7995_v9, %v3748_v22  ;;  %v3662_v30 = vadd.f32 1e-05, %v3654_v58  ;;  %4697 = vmatpush.bf16.msrb.mxu2 %v6275_v11 }
 0x68c   : > { %v3718_v46 = vsub.f32 1.5, %v3717_v44  ;;  %v6283_v44 = vld [vmem:[%s6910_s16 + $0xd8] sm:$0xff] }
 0x68d   : > { %6553 = vrsqrt.f32 %v3662_v30  ;;  %vm3730_vm1 = vweird.f32 %v3662_v30  ;;  %4640 = vmatpush.bf16.msrb.mxu0 %v6258_v5  ;;  %4669 = vmatpush.bf16.msrb.mxu1 %v6266_v8 }
 0x68e   : > { %v3719_v47 = vmul.f32 %v6552_v55, %v3718_v46  ;;  %v6257_v46 = vld [vmem:[%s6910_s16 + $0x8] sm:$0xff] }
 0x690   : > { %v3723_v36 = vsel %vm3722_vm15, %v6552_v55, %v3719_v47  ;;  %v6265_v47 = vld [vmem:[%s6910_s16 + $0x48] sm:$0xff] }
 0x691   : > { %v3749_v3 = vmul.f32 %v3723_v36, %v7908_v6  ;;  %4641 = vmatpush.bf16.msrb.mxu0 %v6257_v46  ;;  %4670 = vmatpush.bf16.msrb.mxu1 %v6265_v47  ;;  %v6282_v36 = vld [vmem:[%s6910_s16 + $0xd0] sm:$0xff] }
 0x693   : > { %v3760_v17 = vmul.f32 %v7995_v9, %v3749_v3  ;;  %v6554_v28 = vpop.eup %6553  ;;  %v6256_v3 = vld [vmem:[%s6910_s16] sm:$0xff] }
 0x694   : > { %v3725_v6 = vmul.f32 %v6554_v28, %v3662_v30  ;;  %vm3731_vm0 = vweird.f32 %v6554_v28 }
 0x695   : > { %v3765_v14 = vpack.c.bf16 %v3760_v17, %v3759_v57  ;;  %vm3732_vm2 = vmor %vm3730_vm1, %vm3731_vm0  ;;  %v6264_v57 = vld [vmem:[%s6910_s16 + $0x40] sm:$0xff]  ;;  %4642 = vmatpush.bf16.msrb.mxu0 %v6256_v3 }
 0x696   : > { %v3726_v56 = vmul.f32 %v6554_v28, %v3725_v6  ;;  %4671 = vmatpush.bf16.msrb.mxu1 %v6264_v57 }
 0x697   : > { %3977 = vmatmul.bf16.gmra.mxu0 %v3765_v14  ;;  %4006 = vmatmul.bf16.gmra.mxu1 %v3765_v14 }
 0x698   : > { %4035 = vmatmul.bf16.gmra.mxu2 %v3765_v14  ;;  %4064 = vmatmul.bf16.gmra.mxu3 %v3765_v14  ;;  %v3727_v63 = vmul.f32 0.5, %v3726_v56  ;;  %v6273_v14 = vld [vmem:[%s6910_s16 + $0x88] sm:$0xff] }
 0x69a   : > { %v3728_v49 = vsub.f32 1.5, %v3727_v63 }
 0x69c   : > { %v3729_v4 = vmul.f32 %v6554_v28, %v3728_v49 }
 0x69e   : > { %v3733_v52 = vsel %vm3732_vm2, %v6554_v28, %v3729_v4 }
 0x69f   : > { %v3750_v27 = vmul.f32 %v3733_v52, %v7914_v43 }
 0x6a1   : > { %v3761_v31 = vmul.f32 %v7995_v9, %v3750_v27 }
 0x6c8   : > { %v3647_v34 = vpop.xlane.xlu2 %3646 }
 0x6c9   : > { %v3655_v33 = vmul.f32 %v3647_v34, %v8500_v16  ;;  %v6287_v16 = vld [vmem:[%s6910_s16 + $0xf8] sm:$0xff]  ;;  %v6272_v34 = vld [vmem:[%s6910_s16 + $0x80] sm:$0xff] }
 0x6ca   : > { %4722 = vmatpush.bf16.msrb.mxu3 %v6287_v16 }
 0x6cb   : > { %v3663_v35 = vadd.f32 1e-05, %v3655_v33  ;;  %v6280_v33 = vld [vmem:[%s6910_s16 + $0xc0] sm:$0xff] }
 0x6cd   : > { %6555 = vrsqrt.f32 %v3663_v35  ;;  %vm3740_vm4 = vweird.f32 %v3663_v35 }
 0x6ce   : > { %4723 = vmatpush.bf16.msrb.mxu3 %v6286_v21 }
 0x6d2   : > { %4724 = vmatpush.bf16.msrb.mxu3 %v6285_v41 }
 0x6d3   : > { %v6556_v7 = vpop.eup %6555 }
 0x6d4   : > { %v3735_v24 = vmul.f32 %v6556_v7, %v3663_v35  ;;  %vm3741_vm3 = vweird.f32 %v6556_v7 }
 0x6d5   : > { %vm3742_vm5 = vmor %vm3740_vm4, %vm3741_vm3 }
 0x6d6   : > { %v3736_v29 = vmul.f32 %v6556_v7, %v3735_v24  ;;  %4725 = vmatpush.bf16.msrb.mxu3 %v6284_v60 }
 0x6d8   : > { %v3737_v18 = vmul.f32 0.5, %v3736_v29 }
 0x6da   : > { %v3738_v1 = vsub.f32 1.5, %v3737_v18  ;;  %4726 = vmatpush.bf16.msrb.mxu3 %v6283_v44 }
 0x6dc   : > { %v3739_v45 = vmul.f32 %v6556_v7, %v3738_v1 }
 0x6de   : > { %v3743_v55 = vsel %vm3742_vm5, %v6556_v7, %v3739_v45  ;;  %4727 = vmatpush.bf16.msrb.mxu3 %v6282_v36 }
 0x6df   : > { %v3751_v19 = vmul.f32 %v3743_v55, %v7986_v53  ;;  %v6274_v53 = vld [vmem:[%s6910_s16 + $0x90] sm:$0xff] }
 0x6e0   : > { %4698 = vmatpush.bf16.msrb.mxu2 %v6274_v53 }
 0x6e1   : > { %v3762_v43 = vmul.f32 %v7995_v9, %v3751_v19 }
 0x6e2   : > { %4728 = vmatpush.bf16.msrb.mxu3 %v6281_v50 }
 0x6e3   : > { %v3766_v22 = vpack.c.bf16 %v3762_v43, %v3761_v31 }
 0x6e4   : > { %4699 = vmatpush.bf16.msrb.mxu2 %v6273_v14 }
 0x6e5   : > { %3982 = vmatmul.bf16.gmra.mxu0 %v3766_v22  ;;  %4011 = vmatmul.bf16.gmra.mxu1 %v3766_v22 }
 0x6e6   : > { %4040 = vmatmul.bf16.gmra.mxu2 %v3766_v22  ;;  %4069 = vmatmul.bf16.gmra.mxu3 %v3766_v22 }
 0x6e7   : > { %4729 = vmatpush.bf16.msrb.mxu3 %v6280_v33 }
 0x6e8   : > { %v8047_v9 = vpop.f32.mrf.mxu0  ;;  %v8049_v17 = vpop.f32.mrf.mxu1  ;;  %4700 = vmatpush.bf16.msrb.mxu2 %v6272_v34 }
 0x6e9   : > { %v4107_v58 = vmul.f32 0.044715, %v8047_v9  ;;  %v4108_v30 = vmul.f32 0.044715, %v8049_v17  ;;  %v4076_v34 = vmul.f32 0.5, %v8049_v17 }
 0x6eb   : > { %v4139_v28 = vmul.f32 %v4107_v58, %v8047_v9  ;;  %v4140_v6 = vmul.f32 %v4108_v30, %v8049_v17  ;;  %v4075_v58 = vmul.f32 0.5, %v8047_v9 }
 0x6ed   : > { %v4171_v20 = vmul.f32 %v4139_v28, %v8047_v9  ;;  %v4172_v15 = vmul.f32 %v4140_v6, %v8049_v17 }
 0x6ef   : > { %v8061_v56 = vpop.f32.mrf.mxu2  ;;  %v8063_v35 = vpop.f32.mrf.mxu3  ;;  %v4203_v13 = vadd.f32 %v4171_v20, %v8047_v9  ;;  %v4204_v23 = vadd.f32 %v4172_v15, %v8049_v17 }
 0x6f0   : > { %v4109_v48 = vmul.f32 0.044715, %v8061_v56  ;;  %v4110_v63 = vmul.f32 0.044715, %v8063_v35  ;;  %v3970_v12 = vpop.f32.mrf.mxu0  ;;  %v3999_v16 = vpop.f32.mrf.mxu1  ;;  %v4077_v17 = vmul.f32 0.5, %v8061_v56 }
 0x6f1   : > { %v4111_v7 = vmul.f32 0.044715, %v3970_v12  ;;  %v4112_v51 = vmul.f32 0.044715, %v3999_v16  ;;  %v4235_v21 = vmul.f32 0.7978846, %v4203_v13 }
 0x6f2   : > { %v4141_v25 = vmul.f32 %v4109_v48, %v8061_v56  ;;  %v4142_v49 = vmul.f32 %v4110_v63, %v8063_v35  ;;  %v4236_v4 = vmul.f32 0.7978846, %v4204_v23  ;;  %v4079_v30 = vmul.f32 0.5, %v3970_v12 }
 0x6f3   : > { %v4143_v40 = vmul.f32 %v4111_v7, %v3970_v12  ;;  %v4144_v29 = vmul.f32 %v4112_v51, %v3999_v16  ;;  %6557 = vtanh.f32 %v4235_v21  ;;  %v4080_v33 = vmul.f32 0.5, %v3999_v16 }
 0x6f4   : > { %v4173_v24 = vmul.f32 %v4141_v25, %v8061_v56  ;;  %v4174_v54 = vmul.f32 %v4142_v49, %v8063_v35  ;;  %6559 = vtanh.f32 %v4236_v4 }
 0x6f5   : > { %v4175_v62 = vmul.f32 %v4143_v40, %v3970_v12  ;;  %v4176_v52 = vmul.f32 %v4144_v29, %v3999_v16 }
 0x6f6   : > { %v4205_v18 = vadd.f32 %v4173_v24, %v8061_v56  ;;  %v4206_v41 = vadd.f32 %v4174_v54, %v8063_v35 }
 0x6f7   : > { %v4028_v1 = vpop.f32.mrf.mxu2  ;;  %v4057_v10 = vpop.f32.mrf.mxu3  ;;  %v4207_v59 = vadd.f32 %v4175_v62, %v3970_v12  ;;  %v4208_v45 = vadd.f32 %v4176_v52, %v3999_v16  ;;  %v4078_v62 = vmul.f32 0.5, %v8063_v35 }
 0x6f8   : > { %v4113_v61 = vmul.f32 0.044715, %v4028_v1  ;;  %v4114_v60 = vmul.f32 0.044715, %v4057_v10  ;;  %v4237_v27 = vmul.f32 0.7978846, %v4205_v18 }
 0x6f9   : > { %v4239_v55 = vmul.f32 0.7978846, %v4207_v59  ;;  %v4238_v5 = vmul.f32 0.7978846, %v4206_v41  ;;  %v4240_v8 = vmul.f32 0.7978846, %v4208_v45  ;;  %v6558_v31 = vpop.eup %6557 }
 0x6fa   : > { %v4145_v19 = vmul.f32 %v4113_v61, %v4028_v1  ;;  %v4146_v11 = vmul.f32 %v4114_v60, %v4057_v10  ;;  %v6560_v46 = vpop.eup %6559  ;;  %v4299_v53 = vadd.f32 1.0, %v6558_v31  ;;  %v4081_v41 = vmul.f32 0.5, %v4028_v1 }
 0x6fb   : > { %6561 = vtanh.f32 %v4239_v55  ;;  %v4300_v57 = vadd.f32 1.0, %v6560_v46  ;;  %v4082_v59 = vmul.f32 0.5, %v4057_v10 }
 0x6fc   : > { %6563 = vtanh.f32 %v4240_v8  ;;  %v4177_v44 = vmul.f32 %v4145_v19, %v4028_v1  ;;  %v4178_v43 = vmul.f32 %v4146_v11, %v4057_v10  ;;  %v4331_v63 = vmul.f32 %v4299_v53, %v4075_v58 }
 0x6fd   : > { %6565 = vtanh.f32 %v4237_v27  ;;  %v4332_v7 = vmul.f32 %v4300_v57, %v4076_v34 }
 0x6fe   : > { %6567 = vtanh.f32 %v4238_v5  ;;  %v4209_v47 = vadd.f32 %v4177_v44, %v4028_v1  ;;  %v4210_v22 = vadd.f32 %v4178_v43, %v4057_v10 }
 0x700   : > { %v4241_v36 = vmul.f32 0.7978846, %v4209_v47  ;;  %v4242_v14 = vmul.f32 0.7978846, %v4210_v22 }
 0x701   : > { %v6562_v3 = vpop.eup %6561 }
 0x702   : > { %v6564_v50 = vpop.eup %6563  ;;  %v4303_v28 = vadd.f32 1.0, %v6562_v3  ;;  %6569 = vtanh.f32 %v4241_v36 }
 0x703   : > { %v6566_v6 = vpop.eup %6565  ;;  %v4304_v20 = vadd.f32 1.0, %v6564_v50  ;;  %6571 = vtanh.f32 %v4242_v14 }
 0x704   : > { %v3973_v15 = vpop.f32.mrf.mxu0  ;;  %v4002_v13 = vpop.f32.mrf.mxu1  ;;  %v4335_v23 = vmul.f32 %v4303_v28, %v4079_v30  ;;  %v4301_v21 = vadd.f32 1.0, %v6566_v6 }
 0x705   : > { %v6568_v48 = vpop.eup %6567  ;;  %v4115_v25 = vmul.f32 0.044715, %v3973_v15  ;;  %v4116_v49 = vmul.f32 0.044715, %v4002_v13  ;;  %v4336_v51 = vmul.f32 %v4304_v20, %v4080_v33 }
 0x706   : > { %v4363_v24 = vpack.c.bf16 %v4335_v23, %v4331_v63  ;;  %v4302_v54 = vadd.f32 1.0, %v6568_v48  ;;  %v4333_v45 = vmul.f32 %v4301_v21, %v4077_v17  ;;  %v4083_v48 = vmul.f32 0.5, %v3973_v15 }
 0x707   : > { %v4147_v9 = vmul.f32 %v4115_v25, %v3973_v15  ;;  %v4148_v12 = vmul.f32 %v4116_v49, %v4002_v13  ;;  %v4364_v40 = vpack.c.bf16 %v4336_v51, %v4332_v7  ;;  %v4084_v63 = vmul.f32 0.5, %v4002_v13 }
 0x708   : > { %v6570_v4 = vpop.eup %6569  ;;  %4643 = vmatmul.bf16.vlgmr.msrb.gmra.mxu0 %v4363_v24  ;;  %v4334_v8 = vmul.f32 %v4302_v54, %v4078_v62 }
 0x709   : > { %v4179_v16 = vmul.f32 %v4147_v9, %v3973_v15  ;;  %v4180_v29 = vmul.f32 %v4148_v12, %v4002_v13  ;;  %v6572_v18 = vpop.eup %6571  ;;  %v4305_v52 = vadd.f32 1.0, %v6570_v4  ;;  %4672 = vmatmul.bf16.vlgmr.msrb.gmra.mxu1 %v4364_v40 }
 0x70a   : > { %v4306_v61 = vadd.f32 1.0, %v6572_v18 }
 0x70b   : > { %v4211_v60 = vadd.f32 %v4179_v16, %v3973_v15  ;;  %v4212_v27 = vadd.f32 %v4180_v29, %v4002_v13  ;;  %v4031_v55 = vpop.f32.mrf.mxu2  ;;  %v8079_v5 = vpop.f32.mrf.mxu3  ;;  %v4337_v19 = vmul.f32 %v4305_v52, %v4081_v41 }
 0x70c   : > { %v4117_v56 = vmul.f32 0.044715, %v4031_v55  ;;  %v4118_v11 = vmul.f32 0.044715, %v8079_v5  ;;  %v3975_v44 = vpop.f32.mrf.mxu0  ;;  %v4004_v31 = vpop.f32.mrf.mxu1  ;;  %v4338_v43 = vmul.f32 %v4306_v61, %v4082_v59  ;;  %v8091_v21 = vmul.f32 0.5, %v4031_v55 }
 0x70d   : > { %v4243_v35 = vmul.f32 0.7978846, %v4211_v60  ;;  %v4244_v1 = vmul.f32 0.7978846, %v4212_v27  ;;  %v4119_v46 = vmul.f32 0.044715, %v3975_v44  ;;  %v4365_v53 = vpack.c.bf16 %v4337_v19, %v4333_v45 }
 0x70e   : > { %v4149_v10 = vmul.f32 %v4117_v56, %v4031_v55  ;;  %v4150_v47 = vmul.f32 %v4118_v11, %v8079_v5  ;;  %v4120_v22 = vmul.f32 0.044715, %v4004_v31  ;;  %v4366_v3 = vpack.c.bf16 %v4338_v43, %v4334_v8 }
 0x70f   : > { %6573 = vtanh.f32 %v4243_v35  ;;  %v4151_v36 = vmul.f32 %v4119_v46, %v3975_v44  ;;  %4701 = vmatmul.bf16.vlgmr.msrb.gmra.mxu2 %v4365_v53  ;;  %v4087_v51 = vmul.f32 0.5, %v3975_v44  ;;  %v4088_v59 = vmul.f32 0.5, %v4004_v31 }
 0x710   : > { %6575 = vtanh.f32 %v4244_v1  ;;  %v4181_v57 = vmul.f32 %v4149_v10, %v4031_v55  ;;  %v4182_v14 = vmul.f32 %v4150_v47, %v8079_v5  ;;  %v4152_v50 = vmul.f32 %v4120_v22, %v4004_v31  ;;  %4730 = vmatmul.bf16.vlgmr.msrb.gmra.mxu3 %v4366_v3 }
 0x711   : > { %v4183_v58 = vmul.f32 %v4151_v36, %v3975_v44  ;;  %v8103_v8 = vmul.f32 0.5, %v8079_v5 }
 0x712   : > { %v4213_v30 = vadd.f32 %v4181_v57, %v4031_v55  ;;  %v4184_v28 = vmul.f32 %v4152_v50, %v4004_v31  ;;  %v4214_v6 = vadd.f32 %v4182_v14, %v8079_v5 }
 0x713   : > { %v4215_v34 = vadd.f32 %v4183_v58, %v3975_v44  ;;  %v4033_v33 = vpop.f32.mrf.mxu2  ;;  %v8085_v20 = vpop.f32.mrf.mxu3 }
 0x714   : > { %v4216_v23 = vadd.f32 %v4184_v28, %v4004_v31  ;;  %v4121_v25 = vmul.f32 0.044715, %v4033_v33  ;;  %v8087_v49 = vpop.f32.mrf.mxu0  ;;  %v8089_v7 = vpop.f32.mrf.mxu1  ;;  %v4122_v24 = vmul.f32 0.044715, %v8085_v20  ;;  %v4245_v4 = vmul.f32 0.7978846, %v4213_v30 }
 0x715   : > { %v6574_v9 = vpop.eup %6573  ;;  %v4247_v12 = vmul.f32 0.7978846, %v4215_v34  ;;  %v4123_v54 = vmul.f32 0.044715, %v8087_v49  ;;  %v4124_v13 = vmul.f32 0.044715, %v8089_v7 }
 0x716   : > { %v6576_v40 = vpop.eup %6575  ;;  %v4248_v17 = vmul.f32 0.7978846, %v4216_v23  ;;  %v4153_v15 = vmul.f32 %v4121_v25, %v4033_v33  ;;  %v4246_v16 = vmul.f32 0.7978846, %v4214_v6  ;;  %v4154_v29 = vmul.f32 %v4122_v24, %v8085_v20 }
 0x717   : > { %v4155_v18 = vmul.f32 %v4123_v54, %v8087_v49  ;;  %v4307_v62 = vadd.f32 1.0, %v6574_v9  ;;  %6577 = vtanh.f32 %v4247_v12  ;;  %v4156_v52 = vmul.f32 %v4124_v13, %v8089_v7 }
 0x718   : > { %v4185_v41 = vmul.f32 %v4153_v15, %v4033_v33  ;;  %6579 = vtanh.f32 %v4248_v17  ;;  %v4186_v45 = vmul.f32 %v4154_v29, %v8085_v20  ;;  %v4308_v60 = vadd.f32 1.0, %v6576_v40 }
 0x719   : > { %v4187_v61 = vmul.f32 %v4155_v18, %v8087_v49  ;;  %6581 = vtanh.f32 %v4245_v4  ;;  %v4188_v55 = vmul.f32 %v4156_v52, %v8089_v7  ;;  %v4339_v31 = vmul.f32 %v4307_v62, %v4083_v48 }
 0x71a   : > { %v4217_v27 = vadd.f32 %v4185_v41, %v4033_v33  ;;  %6583 = vtanh.f32 %v4246_v16  ;;  %v4218_v19 = vadd.f32 %v4186_v45, %v8085_v20  ;;  %v4340_v53 = vmul.f32 %v4308_v60, %v4084_v63 }
 0x71b   : > { %v4219_v56 = vadd.f32 %v4187_v61, %v8087_v49  ;;  %v8107_v11 = vpop.f32.mrf.mxu2  ;;  %v8109_v44 = vpop.f32.mrf.mxu3  ;;  %v4220_v35 = vadd.f32 %v4188_v55, %v8089_v7  ;;  %v4089_v36 = vmul.f32 0.5, %v4033_v33  ;;  %v4090_v54 = vmul.f32 0.5, %v8085_v20 }
 0x71c   : > { %v4249_v43 = vmul.f32 0.7978846, %v4217_v27  ;;  %v4125_v1 = vmul.f32 0.044715, %v8107_v11  ;;  %v4126_v46 = vmul.f32 0.044715, %v8109_v44  ;;  %v8114_v10 = vpop.f32.mrf.mxu0  ;;  %v8116_v5 = vpop.f32.mrf.mxu1 }
 0x71d   : > { %v4250_v47 = vmul.f32 0.7978846, %v4218_v19  ;;  %v4127_v22 = vmul.f32 0.044715, %v8114_v10  ;;  %v6578_v3 = vpop.eup %6577  ;;  %v4251_v57 = vmul.f32 0.7978846, %v4219_v56 }
 0x71e   : > { %6585 = vtanh.f32 %v4249_v43  ;;  %v4157_v14 = vmul.f32 %v4125_v1, %v8107_v11  ;;  %v4158_v50 = vmul.f32 %v4126_v46, %v8109_v44  ;;  %v6580_v58 = vpop.eup %6579  ;;  %v4128_v28 = vmul.f32 0.044715, %v8116_v5 }
 0x71f   : > { %6587 = vtanh.f32 %v4250_v47  ;;  %v4159_v30 = vmul.f32 %v4127_v22, %v8114_v10  ;;  %v4311_v6 = vadd.f32 1.0, %v6578_v3  ;;  %v6582_v34 = vpop.eup %6581  ;;  %v4252_v48 = vmul.f32 0.7978846, %v4220_v35 }
 0x720   : > { %v4189_v23 = vmul.f32 %v4157_v14, %v8107_v11  ;;  %v4190_v33 = vmul.f32 %v4158_v50, %v8109_v44  ;;  %v4312_v63 = vadd.f32 1.0, %v6580_v58  ;;  %v6584_v25 = vpop.eup %6583  ;;  %v4160_v12 = vmul.f32 %v4128_v28, %v8116_v5 }
 0x721   : > { %v4191_v9 = vmul.f32 %v4159_v30, %v8114_v10  ;;  %v4343_v24 = vmul.f32 %v4311_v6, %v4087_v51  ;;  %6589 = vtanh.f32 %v4251_v57  ;;  %v4309_v62 = vadd.f32 1.0, %v6582_v34 }
 0x722   : > { %v4221_v40 = vadd.f32 %v4189_v23, %v8107_v11  ;;  %v4222_v4 = vadd.f32 %v4190_v33, %v8109_v44  ;;  %v4344_v17 = vmul.f32 %v4312_v63, %v4088_v59  ;;  %v4192_v13 = vmul.f32 %v4160_v12, %v8116_v5 }
 0x723   : > { %v4223_v15 = vadd.f32 %v4191_v9, %v8114_v10  ;;  %v8132_v16 = vpop.f32.mrf.mxu2  ;;  %v8134_v29 = vpop.f32.mrf.mxu3  ;;  %v4367_v18 = vpack.c.bf16 %v4343_v24, %v4339_v31  ;;  %6591 = vtanh.f32 %v4252_v48  ;;  %v4310_v52 = vadd.f32 1.0, %v6584_v25 }
 0x724   : > { %v6586_v41 = vpop.eup %6585  ;;  %v4129_v20 = vmul.f32 0.044715, %v8132_v16  ;;  %v4368_v51 = vpack.c.bf16 %v4344_v17, %v4340_v53  ;;  %v4224_v59 = vadd.f32 %v4192_v13, %v8116_v5  ;;  %v4130_v60 = vmul.f32 0.044715, %v8134_v29 }
 0x725   : > { %v6588_v45 = vpop.eup %6587  ;;  %v4255_v61 = vmul.f32 0.7978846, %v4223_v15  ;;  %4648 = vmatmul.bf16.gmra.mxu0 %v4367_v18  ;;  %v4313_v27 = vadd.f32 1.0, %v6586_v41  ;;  %v4253_v55 = vmul.f32 0.7978846, %v4221_v40  ;;  %v4341_v1 = vmul.f32 %v4309_v62, %v8091_v21 }
 0x726   : > { %v4254_v19 = vmul.f32 0.7978846, %v4222_v4  ;;  %v4161_v56 = vmul.f32 %v4129_v20, %v8132_v16  ;;  %4677 = vmatmul.bf16.gmra.mxu1 %v4368_v51  ;;  %v4314_v31 = vadd.f32 1.0, %v6588_v45  ;;  %v4256_v43 = vmul.f32 0.7978846, %v4224_v59 }
 0x727   : > { %v4162_v35 = vmul.f32 %v4130_v60, %v8134_v29  ;;  %v4345_v46 = vmul.f32 %v4313_v27, %v4089_v36  ;;  %v6590_v47 = vpop.eup %6589  ;;  %6593 = vtanh.f32 %v4255_v61  ;;  %v4342_v53 = vmul.f32 %v4310_v52, %v8103_v8 }
 0x728   : > { %v4193_v22 = vmul.f32 %v4161_v56, %v8132_v16  ;;  %v4346_v3 = vmul.f32 %v4314_v31, %v4090_v54  ;;  %6595 = vtanh.f32 %v4256_v43  ;;  %v4315_v6 = vadd.f32 1.0, %v6590_v47 }
 0x729   : > { %v4194_v57 = vmul.f32 %v4162_v35, %v8134_v29  ;;  %v4369_v14 = vpack.c.bf16 %v4345_v46, %v4341_v1  ;;  %v6592_v50 = vpop.eup %6591  ;;  %6597 = vtanh.f32 %v4253_v55  ;;  %v4091_v23 = vmul.f32 0.5, %v8087_v49 }
 0x72a   : > { %v4225_v58 = vadd.f32 %v4193_v22, %v8132_v16  ;;  %v4370_v30 = vpack.c.bf16 %v4346_v3, %v4342_v53  ;;  %6599 = vtanh.f32 %v4254_v19  ;;  %v4316_v8 = vadd.f32 1.0, %v6592_v50 }
 0x72b   : > { %v4226_v21 = vadd.f32 %v4194_v57, %v8134_v29  ;;  %4706 = vmatmul.bf16.gmra.mxu2 %v4369_v14  ;;  %v4095_v33 = vmul.f32 0.5, %v8114_v10  ;;  %v4092_v9 = vmul.f32 0.5, %v8089_v7  ;;  %v4096_v12 = vmul.f32 0.5, %v8116_v5 }
 0x72c   : > { %v4257_v36 = vmul.f32 0.7978846, %v4225_v58  ;;  %4735 = vmatmul.bf16.gmra.mxu3 %v4370_v30  ;;  %v4347_v40 = vmul.f32 %v4315_v6, %v4091_v23  ;;  %v4093_v10 = vmul.f32 0.5, %v8107_v11  ;;  %v4097_v51 = vmul.f32 0.5, %v8132_v16 }
 0x72d   : > { %v4258_v28 = vmul.f32 0.7978846, %v4226_v21  ;;  %v6594_v34 = vpop.eup %6593  ;;  %v4348_v17 = vmul.f32 %v4316_v8, %v4092_v9  ;;  %v4094_v5 = vmul.f32 0.5, %v8109_v44  ;;  %v4098_v52 = vmul.f32 0.5, %v8134_v29 }
 0x72e   : > { %6601 = vtanh.f32 %v4257_v36  ;;  %v6596_v48 = vpop.eup %6595  ;;  %v4319_v63 = vadd.f32 1.0, %v6594_v34 }
 0x72f   : > { %6603 = vtanh.f32 %v4258_v28  ;;  %v6598_v25 = vpop.eup %6597  ;;  %v4320_v24 = vadd.f32 1.0, %v6596_v48 }
 0x730   : > { %v6600_v54 = vpop.eup %6599  ;;  %v4351_v4 = vmul.f32 %v4319_v63, %v4095_v33  ;;  %v4317_v18 = vadd.f32 1.0, %v6598_v25 }
 0x731   : > { %v4352_v15 = vmul.f32 %v4320_v24, %v4096_v12  ;;  %v4318_v20 = vadd.f32 1.0, %v6600_v54 }
 0x732   : > { %v4371_v13 = vpack.c.bf16 %v4351_v4, %v4347_v40  ;;  %v4349_v61 = vmul.f32 %v4317_v18, %v4093_v10 }
 0x733   : > { %v4372_v41 = vpack.c.bf16 %v4352_v15, %v4348_v17  ;;  %v4350_v60 = vmul.f32 %v4318_v20, %v4094_v5 }
 0x734   : > { %v6602_v62 = vpop.eup %6601 }
 0x735   : > { %v6604_v49 = vpop.eup %6603  ;;  %4653 = vmatmul.bf16.gmra.mxu0 %v4371_v13  ;;  %v4321_v7 = vadd.f32 1.0, %v6602_v62 }
 0x736   : > { %4682 = vmatmul.bf16.gmra.mxu1 %v4372_v41  ;;  %v4322_v45 = vadd.f32 1.0, %v6604_v49 }
 0x737   : > { %v4353_v59 = vmul.f32 %v4321_v7, %v4097_v51 }
 0x738   : > { %v4354_v27 = vmul.f32 %v4322_v45, %v4098_v52 }
 0x739   : > { %v4373_v55 = vpack.c.bf16 %v4353_v59, %v4349_v61 }
 0x73a   : > { %v4374_v19 = vpack.c.bf16 %v4354_v27, %v4350_v60 }
 0x73b   : > { %4711 = vmatmul.bf16.gmra.mxu2 %v4373_v55 }
 0x73c   : > { %4740 = vmatmul.bf16.gmra.mxu3 %v4374_v19 }
 0x762   : > { %v3983_v56 = vpop.f32.mrf.mxu0  ;;  %v8155_v31 = vpop.f32.mrf.mxu1 }
 0x763   : > { %v4131_v11 = vmul.f32 0.044715, %v3983_v56  ;;  %v4132_v16 = vmul.f32 0.044715, %v8155_v31  ;;  %v4099_v55 = vmul.f32 0.5, %v3983_v56 }
 0x765   : > { %v4163_v43 = vmul.f32 %v4131_v11, %v3983_v56  ;;  %v4164_v44 = vmul.f32 %v4132_v16, %v8155_v31 }
 0x767   : > { %v4195_v35 = vmul.f32 %v4163_v43, %v3983_v56  ;;  %v4196_v29 = vmul.f32 %v4164_v44, %v8155_v31  ;;  %v4100_v43 = vmul.f32 0.5, %v8155_v31 }
 0x769   : > { %v8160_v1 = vpop.f32.mrf.mxu2  ;;  %v8162_v46 = vpop.f32.mrf.mxu3  ;;  %v4227_v47 = vadd.f32 %v4195_v35, %v3983_v56  ;;  %v4228_v14 = vadd.f32 %v4196_v29, %v8155_v31 }
 0x76a   : > { %v4133_v22 = vmul.f32 0.044715, %v8160_v1  ;;  %v4134_v53 = vmul.f32 0.044715, %v8162_v46  ;;  %v3985_v3 = vpop.f32.mrf.mxu0  ;;  %v4014_v57 = vpop.f32.mrf.mxu1  ;;  %v4101_v56 = vmul.f32 0.5, %v8160_v1  ;;  %v4102_v31 = vmul.f32 0.5, %v8162_v46 }
 0x76b   : > { %v4135_v50 = vmul.f32 0.044715, %v3985_v3  ;;  %v4136_v21 = vmul.f32 0.044715, %v4014_v57  ;;  %v4259_v28 = vmul.f32 0.7978846, %v4227_v47 }
 0x76c   : > { %v4165_v58 = vmul.f32 %v4133_v22, %v8160_v1  ;;  %v4166_v30 = vmul.f32 %v4134_v53, %v8162_v46  ;;  %v4260_v48 = vmul.f32 0.7978846, %v4228_v14  ;;  %v4103_v19 = vmul.f32 0.5, %v3985_v3 }
 0x76d   : > { %v4167_v36 = vmul.f32 %v4135_v50, %v3985_v3  ;;  %v4168_v8 = vmul.f32 %v4136_v21, %v4014_v57  ;;  %6605 = vtanh.f32 %v4259_v28  ;;  %v4104_v44 = vmul.f32 0.5, %v4014_v57 }
 0x76e   : > { %v4197_v6 = vmul.f32 %v4165_v58, %v8160_v1  ;;  %v4198_v34 = vmul.f32 %v4166_v30, %v8162_v46  ;;  %6607 = vtanh.f32 %v4260_v48 }
 0x76f   : > { %v4199_v23 = vmul.f32 %v4167_v36, %v3985_v3  ;;  %v4200_v63 = vmul.f32 %v4168_v8, %v4014_v57 }
 0x770   : > { %v4229_v33 = vadd.f32 %v4197_v6, %v8160_v1  ;;  %v4230_v25 = vadd.f32 %v4198_v34, %v8162_v46 }
 0x771   : > { %v4231_v9 = vadd.f32 %v4199_v23, %v3985_v3  ;;  %v4043_v12 = vpop.f32.mrf.mxu2  ;;  %v4072_v24 = vpop.f32.mrf.mxu3  ;;  %v4232_v54 = vadd.f32 %v4200_v63, %v4014_v57 }
 0x772   : > { %v4137_v40 = vmul.f32 0.044715, %v4043_v12  ;;  %v4138_v17 = vmul.f32 0.044715, %v4072_v24  ;;  %v4261_v15 = vmul.f32 0.7978846, %v4229_v33 }
 0x773   : > { %v4263_v4 = vmul.f32 0.7978846, %v4231_v9  ;;  %v4264_v13 = vmul.f32 0.7978846, %v4232_v54  ;;  %v4262_v62 = vmul.f32 0.7978846, %v4230_v25  ;;  %v6606_v10 = vpop.eup %6605 }
 0x774   : > { %v4169_v18 = vmul.f32 %v4137_v40, %v4043_v12  ;;  %v4170_v41 = vmul.f32 %v4138_v17, %v4072_v24  ;;  %v6608_v7 = vpop.eup %6607  ;;  %v4323_v61 = vadd.f32 1.0, %v6606_v10  ;;  %v4105_v3 = vmul.f32 0.5, %v4043_v12 }
 0x775   : > { %6609 = vtanh.f32 %v4263_v4  ;;  %v4324_v60 = vadd.f32 1.0, %v6608_v7  ;;  %v4106_v57 = vmul.f32 0.5, %v4072_v24 }
 0x776   : > { %v4201_v20 = vmul.f32 %v4169_v18, %v4043_v12  ;;  %6611 = vtanh.f32 %v4264_v13  ;;  %v4202_v49 = vmul.f32 %v4170_v41, %v4072_v24  ;;  %v4355_v47 = vmul.f32 %v4323_v61, %v4099_v55 }
 0x777   : > { %6613 = vtanh.f32 %v4261_v15  ;;  %v4356_v53 = vmul.f32 %v4324_v60, %v4100_v43 }
 0x778   : > { %v4233_v51 = vadd.f32 %v4201_v20, %v4043_v12  ;;  %6615 = vtanh.f32 %v4262_v62  ;;  %v4234_v5 = vadd.f32 %v4202_v49, %v4072_v24 }
 0x77a   : > { %v4265_v52 = vmul.f32 0.7978846, %v4233_v51  ;;  %v4266_v45 = vmul.f32 0.7978846, %v4234_v5 }
 0x77b   : > { %v6610_v59 = vpop.eup %6609 }
 0x77c   : > { %6617 = vtanh.f32 %v4265_v52  ;;  %v6612_v27 = vpop.eup %6611  ;;  %v4327_v11 = vadd.f32 1.0, %v6610_v59 }
 0x77d   : > { %6619 = vtanh.f32 %v4266_v45  ;;  %v6614_v16 = vpop.eup %6613  ;;  %v4328_v35 = vadd.f32 1.0, %v6612_v27 }
 0x77e   : > { %v6616_v29 = vpop.eup %6615  ;;  %v4359_v22 = vmul.f32 %v4327_v11, %v4103_v19  ;;  %v4325_v58 = vadd.f32 1.0, %v6614_v16 }
 0x77f   : > { %v4360_v14 = vmul.f32 %v4328_v35, %v4104_v44  ;;  %v4326_v36 = vadd.f32 1.0, %v6616_v29 }
 0x780   : > { %v4375_v50 = vpack.c.bf16 %v4359_v22, %v4355_v47  ;;  %v4357_v8 = vmul.f32 %v4325_v58, %v4101_v56 }
 0x781   : > { %v4376_v21 = vpack.c.bf16 %v4360_v14, %v4356_v53  ;;  %v4358_v23 = vmul.f32 %v4326_v36, %v4102_v31 }
 0x782   : > { %v6618_v30 = vpop.eup %6617  ;;  %4658 = vmatmul.bf16.gmra.mxu0 %v4375_v50 }
 0x783   : > { %v6620_v28 = vpop.eup %6619  ;;  %v4329_v6 = vadd.f32 1.0, %v6618_v30  ;;  %4687 = vmatmul.bf16.gmra.mxu1 %v4376_v21 }
 0x784   : > { %v4330_v34 = vadd.f32 1.0, %v6620_v28 }
 0x785   : > { %v4361_v48 = vmul.f32 %v4329_v6, %v4105_v3  ;;  %v4644_v9 = vpop.f32.mrf.mxu0 }
 0x786   : > { %v4362_v33 = vmul.f32 %v4330_v34, %v4106_v57  ;;  %v4673_v54 = vpop.f32.mrf.mxu1 }
 0x787   : > { %v4377_v63 = vpack.c.bf16 %v4361_v48, %v4357_v8  ;;  %v4674_v40 = vadd.f32 %v4673_v54, %v4644_v9 }
 0x788   : > { %v4378_v25 = vpack.c.bf16 %v4362_v33, %v4358_v23 }
 0x789   : > { %4716 = vmatmul.bf16.gmra.mxu2 %v4377_v63 }
 0x78a   : > { %4745 = vmatmul.bf16.gmra.mxu3 %v4378_v25 }
 0x78d   : > { %v4646_v15 = vpop.f32.mrf.mxu0 }
 0x78e   : > { %v4675_v13 = vpop.f32.mrf.mxu1 }
 0x78f   : > { %v4676_v24 = vadd.f32 %v4675_v13, %v4646_v15 }
 0x792   : > { %v4702_v4 = vpop.f32.mrf.mxu2 }
 0x793   : > { %v4703_v1 = vadd.f32 %v4702_v4, %v4674_v40  ;;  %v4731_v12 = vpop.f32.mrf.mxu3 }
 0x795   : > { %v4732_v17 = vadd.f32 %v4731_v12, %v4703_v1 }
 0x797   : > { %v4751_v46 = vadd.f32 %v4732_v17, %v7852_v42 }
 0x799   : > { %4759 = vst [vmem:[#allocation2] sm:$0xff] %v4751_v46 }
 0x79a   : > { %v4704_v18 = vpop.f32.mrf.mxu2 }
 0x79b   : > { %v4705_v62 = vadd.f32 %v4704_v18, %v4676_v24  ;;  %v4733_v41 = vpop.f32.mrf.mxu3 }
 0x79d   : > { %v4734_v20 = vadd.f32 %v4733_v41, %v4705_v62 }
 0x79f   : > { %v4752_v49 = vadd.f32 %v4734_v20, %v7855_v0 }
 0x7a1   : > { %4760 = vst [vmem:[#allocation2 + $0x8] sm:$0xff] %v4752_v49 }
 0x7a2   : > { %v4649_v10 = vpop.f32.mrf.mxu0 }
 0x7a3   : > { %v4678_v51 = vpop.f32.mrf.mxu1 }
 0x7a4   : > { %v4679_v7 = vadd.f32 %v4678_v51, %v4649_v10 }
 0x7aa   : > { %v4651_v5 = vpop.f32.mrf.mxu0 }
 0x7ab   : > { %v4680_v52 = vpop.f32.mrf.mxu1 }
 0x7ac   : > { %v4681_v27 = vadd.f32 %v4680_v52, %v4651_v5 }
 0x7ae   : > { %v4707_v45 = vpop.f32.mrf.mxu2 }
 0x7af   : > { %v4708_v61 = vadd.f32 %v4707_v45, %v4679_v7  ;;  %v4736_v59 = vpop.f32.mrf.mxu3 }
 0x7b1   : > { %v4737_v60 = vadd.f32 %v4736_v59, %v4708_v61 }
 0x7b2   : > { %v4654_v16 = vpop.f32.mrf.mxu0 }
 0x7b3   : > { %v4753_v42 = vadd.f32 %v4737_v60, %v7858_v37  ;;  %v4683_v43 = vpop.f32.mrf.mxu1 }
 0x7b4   : > { %v4684_v35 = vadd.f32 %v4683_v43, %v4654_v16 }
 0x7b5   : > { %4761 = vst [vmem:[#allocation2 + $0x10] sm:$0xff] %v4753_v42 }
 0x7b6   : > { %v4709_v55 = vpop.f32.mrf.mxu2 }
 0x7b7   : > { %v4710_v19 = vadd.f32 %v4709_v55, %v4681_v27  ;;  %v4738_v11 = vpop.f32.mrf.mxu3 }
 0x7b9   : > { %v4739_v0 = vadd.f32 %v4738_v11, %v4710_v19 }
 0x7ba   : > { %v4656_v14 = vpop.f32.mrf.mxu0 }
 0x7bb   : > { %v4754_v44 = vadd.f32 %v4739_v0, %v7861_v2  ;;  %v4685_v50 = vpop.f32.mrf.mxu1 }
 0x7bc   : > { %v4686_v58 = vadd.f32 %v4685_v50, %v4656_v14 }
 0x7bd   : > { %4762 = vst [vmem:[#allocation2 + $0x18] sm:$0xff] %v4754_v44 }
 0x7be   : > { %v4712_v29 = vpop.f32.mrf.mxu2 }
 0x7bf   : > { %v4713_v47 = vadd.f32 %v4712_v29, %v4684_v35  ;;  %v4741_v22 = vpop.f32.mrf.mxu3 }
 0x7c1   : > { %v4742_v53 = vadd.f32 %v4741_v22, %v4713_v47 }
 0x7c3   : > { %v4755_v37 = vadd.f32 %v4742_v53, %v7864_v38 }
 0x7c5   : > { %4763 = vst [vmem:[#allocation2 + $0x20] sm:$0xff] %v4755_v37 }
 0x7c6   : > { %v4714_v30 = vpop.f32.mrf.mxu2 }
 0x7c7   : > { %v4715_v21 = vadd.f32 %v4714_v30, %v4686_v58  ;;  %v4743_v36 = vpop.f32.mrf.mxu3 }
 0x7c9   : > { %v4744_v28 = vadd.f32 %v4743_v36, %v4715_v21 }
 0x7cb   : > { %v4756_v56 = vadd.f32 %v4744_v28, %v7867_v32 }
 0x7cd   : > { %4764 = vst [vmem:[#allocation2 + $0x28] sm:$0xff] %v4756_v56 }
 0x7ff   : > { %v4659_v2 = vpop.f32.mrf.mxu0 }
 0x800   : > { %v4688_v3 = vpop.f32.mrf.mxu1 }
 0x801   : > { %v4689_v6 = vadd.f32 %v4688_v3, %v4659_v2 }
 0x807   : > { %v4661_v48 = vpop.f32.mrf.mxu0 }
 0x808   : > { %v4690_v23 = vpop.f32.mrf.mxu1 }
 0x809   : > { %v4691_v33 = vadd.f32 %v4690_v23, %v4661_v48 }
 0x80c   : > { %v4717_v31 = vpop.f32.mrf.mxu2 }
 0x80d   : > { %v4718_v57 = vadd.f32 %v4717_v31, %v4689_v6  ;;  %v4746_v34 = vpop.f32.mrf.mxu3 }
 0x80f   : > { %v4747_v8 = vadd.f32 %v4746_v34, %v4718_v57 }
 0x811   : > { %v4757_v38 = vadd.f32 %v4747_v8, %v7870_v39 }
 0x813   : > { %4765 = vst [vmem:[#allocation2 + $0x30] sm:$0xff] %v4757_v38 }
 0x814   : > { %v4719_v63 = vpop.f32.mrf.mxu2 }
 0x815   : > { %v4720_v25 = vadd.f32 %v4719_v63, %v4691_v33  ;;  %v4748_v9 = vpop.f32.mrf.mxu3 }
 0x817   : > { %v4749_v54 = vadd.f32 %v4748_v9, %v4720_v25  ;;  %4770 = sbr.rel (%p5980_p1) target bundleno = 2494 (0x9be), region = 72 }
 0x819   : > { %v4758_v32 = vadd.f32 %v4749_v54, %v7885_v26 }
 0x81b   : > { %4766 = vst [vmem:[#allocation2 + $0x38] sm:$0xff] %v4758_v32 }
 0x81c   : > { %v4772_v40 = vld [vmem:[#allocation2 + $0x1f] ss:$32 sm:$0x1]  ;;  %vm4776_vm6 = vcmask 1041408   ;;  %v6095_v39 = vld [vmem:[%s8448_s10 + $0xe0] sm:$0xf] }
 0x81d   : > { %v6318_v17 = vld [vmem:[%s8448_s10 + $0xec] sm:$0xf0]  ;;  %v6316_v26 = vld [vmem:[%s8448_s10 + $0xe4] sm:$0xf]  ;;  %v6097_v13 = vld [vmem:[%s8448_s10 + $0xf0] sm:$0xf0] }
 0x81e   : > { %v6096_v15 = vor.u32 %v6318_v17, %v6095_v39  ;;  %v6103_v46 = vld [vmem:[%s8448_s10 + $0xe8] sm:$0xf]  ;;  %v6319_v24 = vld [vmem:[%s8448_s10 + $0xf4] sm:$0xf0]  ;;  %v6100_v18 = vor.u32 %v6316_v26, %v6097_v13  ;;  %v6317_v41 = vld [vmem:[%s8448_s10 + $0xec] sm:$0xf] }
 0x81f   : > { %v6104_v62 = vor.u32 %v6319_v24, %v6103_v46  ;;  %v6105_v20 = vld [vmem:[%s8448_s10 + $0xf8] sm:$0xf0]  ;;  %v8501_v51 = vld [vmem:[#allocation18_spill] sm:$0xff]  ;;  %v6079_v61 = vld [vmem:[%s8448_s10 + $0xc0] sm:$0xf]  ;;  %vm5056_vm10 = vcmask 1045508  }
 0x820   : > { %4996 = vmatpush.bf16.msra.mxu0 %v6096_v15  ;;  %v6108_v49 = vor.u32 %v6317_v41, %v6105_v20  ;;  %5009 = vmatpush.bf16.msra.mxu1 %v6100_v18  ;;  %v6314_v59 = vld [vmem:[%s8448_s10 + $0xcc] sm:$0xf0]  ;;  %v6312_v60 = vld [vmem:[%s8448_s10 + $0xc4] sm:$0xf]  ;;  %v6081_v27 = vld [vmem:[%s8448_s10 + $0xd0] sm:$0xf0] }
 0x821   : > { %5022 = vmatpush.bf16.msra.mxu2 %v6104_v62  ;;  %v6080_v42 = vor.u32 %v6314_v59, %v6079_v61  ;;  %v6087_v55 = vld [vmem:[%s8448_s10 + $0xc8] sm:$0xf]  ;;  %v6315_v19 = vld [vmem:[%s8448_s10 + $0xd4] sm:$0xf0]  ;;  %v6084_v11 = vor.u32 %v6312_v60, %v6081_v27  ;;  %v6313_v43 = vld [vmem:[%s8448_s10 + $0xcc] sm:$0xf] }
 0x822   : > { %v4773_v4 = vld [vmem:[#allocation2 + $0x1f] ss:$32 sm:$0x2]  ;;  %5035 = vmatpush.bf16.msra.mxu3 %v6108_v49  ;;  %v6088_v16 = vor.u32 %v6315_v19, %v6087_v55  ;;  %v6063_v35 = vld [vmem:[%s8448_s10 + $0xa0] sm:$0xf]  ;;  %vm5058_vm11 = vcmask 1043456  }
 0x823   : > { %v4774_v1 = vor.u32 %v4773_v4, %v4772_v40  ;;  %v6089_v0 = vld [vmem:[%s8448_s10 + $0xd8] sm:$0xf0]  ;;  %v6310_v29 = vld [vmem:[%s8448_s10 + $0xac] sm:$0xf0]  ;;  %v6308_v47 = vld [vmem:[%s8448_s10 + $0xa4] sm:$0xf] }
 0x824   : > { %4997 = vmatpush.bf16.msra.mxu0 %v6080_v42  ;;  %v6092_v44 = vor.u32 %v6313_v43, %v6089_v0  ;;  %5010 = vmatpush.bf16.msra.mxu1 %v6084_v11  ;;  %v6064_v22 = vor.u32 %v6310_v29, %v6063_v35  ;;  %v6065_v53 = vld [vmem:[%s8448_s10 + $0xb0] sm:$0xf0]  ;;  %v6071_v14 = vld [vmem:[%s8448_s10 + $0xa8] sm:$0xf]  ;;  %v6311_v50 = vld [vmem:[%s8448_s10 + $0xb4] sm:$0xf0] }
 0x825   : > { %v4777_v12 = vsel %vm4776_vm6, %v4774_v1, 0.0  ;;  %5023 = vmatpush.bf16.msra.mxu2 %v6088_v16  ;;  %v6068_v37 = vor.u32 %v6308_v47, %v6065_v53  ;;  %v6072_v58 = vor.u32 %v6311_v50, %v6071_v14  ;;  %v6309_v30 = vld [vmem:[%s8448_s10 + $0xac] sm:$0xf]  ;;  %v6073_v21 = vld [vmem:[%s8448_s10 + $0xb8] sm:$0xf0] }
 0x826   : > { %4778 = vadd.xlane.f32.xlu0 %v4777_v12  ;;  %5036 = vmatpush.bf16.msra.mxu3 %v6092_v44  ;;  %v6076_v36 = vor.u32 %v6309_v30, %v6073_v21  ;;  %v6047_v28 = vld [vmem:[%s8448_s10 + $0x80] sm:$0xf]  ;;  %v6306_v56 = vld [vmem:[%s8448_s10 + $0x8c] sm:$0xf0]  ;;  %v6304_v2 = vld [vmem:[%s8448_s10 + $0x84] sm:$0xf] }
 0x827   : > { %v6048_v3 = vor.u32 %v6306_v56, %v6047_v28  ;;  %v6049_v6 = vld [vmem:[%s8448_s10 + $0x90] sm:$0xf0]  ;;  %v6055_v31 = vld [vmem:[%s8448_s10 + $0x88] sm:$0xf]  ;;  %v6307_v57 = vld [vmem:[%s8448_s10 + $0x94] sm:$0xf0] }
 0x828   : > { %4998 = vmatpush.bf16.msra.mxu0 %v6064_v22  ;;  %5011 = vmatpush.bf16.msra.mxu1 %v6068_v37  ;;  %v6052_v34 = vor.u32 %v6304_v2, %v6049_v6  ;;  %v6056_v8 = vor.u32 %v6307_v57, %v6055_v31  ;;  %v6305_v48 = vld [vmem:[%s8448_s10 + $0x8c] sm:$0xf]  ;;  %v6057_v23 = vld [vmem:[%s8448_s10 + $0x98] sm:$0xf0]  ;;  %v6031_v33 = vld [vmem:[%s8448_s10 + $0x60] sm:$0xf] }
 0x829   : > { %5024 = vmatpush.bf16.msra.mxu2 %v6072_v58  ;;  %v6060_v38 = vor.u32 %v6305_v48, %v6057_v23  ;;  %v6302_v63 = vld [vmem:[%s8448_s10 + $0x6c] sm:$0xf0]  ;;  %v6300_v25 = vld [vmem:[%s8448_s10 + $0x64] sm:$0xf]  ;;  %v6033_v54 = vld [vmem:[%s8448_s10 + $0x70] sm:$0xf0] }
 0x82a   : > { %5037 = vmatpush.bf16.msra.mxu3 %v6076_v36  ;;  %v6032_v9 = vor.u32 %v6302_v63, %v6031_v33  ;;  %v6039_v32 = vld [vmem:[%s8448_s10 + $0x68] sm:$0xf]  ;;  %v6303_v40 = vld [vmem:[%s8448_s10 + $0x74] sm:$0xf0]  ;;  %v6036_v4 = vor.u32 %v6300_v25, %v6033_v54  ;;  %v6301_v12 = vld [vmem:[%s8448_s10 + $0x6c] sm:$0xf] }
 0x82b   : > { %v6041_v39 = vld [vmem:[%s8448_s10 + $0x78] sm:$0xf0]  ;;  %v6015_v26 = vld [vmem:[%s8448_s10 + $0x40] sm:$0xf]  ;;  %v6298_v15 = vld [vmem:[%s8448_s10 + $0x4c] sm:$0xf0] }
 0x82c   : > { %4999 = vmatpush.bf16.msra.mxu0 %v6048_v3  ;;  %5012 = vmatpush.bf16.msra.mxu1 %v6052_v34  ;;  %v6044_v17 = vor.u32 %v6301_v12, %v6041_v39  ;;  %v6296_v13 = vld [vmem:[%s8448_s10 + $0x44] sm:$0xf]  ;;  %v6016_v46 = vor.u32 %v6298_v15, %v6015_v26  ;;  %v6017_v24 = vld [vmem:[%s8448_s10 + $0x50] sm:$0xf0]  ;;  %v6023_v18 = vld [vmem:[%s8448_s10 + $0x48] sm:$0xf] }
 0x82d   : > { %5025 = vmatpush.bf16.msra.mxu2 %v6056_v8  ;;  %v6299_v62 = vld [vmem:[%s8448_s10 + $0x54] sm:$0xf0]  ;;  %v6020_v41 = vor.u32 %v6296_v13, %v6017_v24  ;;  %v6297_v49 = vld [vmem:[%s8448_s10 + $0x4c] sm:$0xf]  ;;  %v6292_v61 = vld [vmem:[%s8448_s10 + $0x24] sm:$0xf] }
 0x82e   : > { %5038 = vmatpush.bf16.msra.mxu3 %v6060_v38  ;;  %v6024_v20 = vor.u32 %v6299_v62, %v6023_v18  ;;  %v6001_v60 = vld [vmem:[%s8448_s10 + $0x30] sm:$0xf0]  ;;  %v6007_v42 = vld [vmem:[%s8448_s10 + $0x28] sm:$0xf]  ;;  %v6295_v27 = vld [vmem:[%s8448_s10 + $0x34] sm:$0xf0] }
 0x82f   : > { %v6004_v55 = vor.u32 %v6292_v61, %v6001_v60  ;;  %v6008_v19 = vor.u32 %v6295_v27, %v6007_v42  ;;  %v6293_v11 = vld [vmem:[%s8448_s10 + $0x2c] sm:$0xf]  ;;  %v6009_v16 = vld [vmem:[%s8448_s10 + $0x38] sm:$0xf0]  ;;  %v5983_v0 = vld [vmem:[%s8448_s10] sm:$0xf] }
 0x830   : > { %5000 = vmatpush.bf16.msra.mxu0 %v6032_v9  ;;  %5013 = vmatpush.bf16.msra.mxu1 %v6036_v4  ;;  %v6012_v43 = vor.u32 %v6293_v11, %v6009_v16  ;;  %v6290_v44 = vld [vmem:[%s8448_s10 + $0xc] sm:$0xf0]  ;;  %v6288_v35 = vld [vmem:[%s8448_s10 + $0x4] sm:$0xf]  ;;  %v5985_v47 = vld [vmem:[%s8448_s10 + $0x10] sm:$0xf0] }
 0x831   : > { %v5984_v29 = vor.u32 %v6290_v44, %v5983_v0  ;;  %v5991_v22 = vld [vmem:[%s8448_s10 + $0x8] sm:$0xf]  ;;  %v6291_v53 = vld [vmem:[%s8448_s10 + $0x14] sm:$0xf0]  ;;  %v5988_v14 = vor.u32 %v6288_v35, %v5985_v47  ;;  %v6289_v37 = vld [vmem:[%s8448_s10 + $0xc] sm:$0xf] }
 0x832   : > { %5039 = vmatpush.bf16.msra.mxu3 %v6044_v17  ;;  %v5992_v50 = vor.u32 %v6291_v53, %v5991_v22  ;;  %v5993_v58 = vld [vmem:[%s8448_s10 + $0x18] sm:$0xf0]  ;;  %v6629_v34 = vld [vmem:[%s8447_s9] ss:$0 sm:$0xff] }
 0x833   : > { %v5996_v30 = vor.u32 %v6289_v37, %v5993_v58 }
 0x834   : > { %5001 = vmatpush.bf16.msra.mxu0 %v6016_v46  ;;  %5014 = vmatpush.bf16.msra.mxu1 %v6020_v41 }
 0x838   : > { %5015 = vmatpush.bf16.msra.mxu1 %v6004_v55 }
 0x83c   : > { %5016 = vmatpush.bf16.msra.mxu1 %v5988_v14 }
 0x899   : > { %v4779_v10 = vpop.xlane.xlu0 %4778 }
 0x89a   : > { %v4780_v7 = vmul.f32 %v4779_v10, %v8501_v51  ;;  %v6025_v10 = vld [vmem:[%s8448_s10 + $0x58] sm:$0xf0] }
 0x89c   : > { %v8211_v5 = vsub.f32 %v4774_v1, %v4780_v7  ;;  %v6040_v1 = vor.u32 %v6303_v40, %v6039_v32  ;;  %v6028_v7 = vor.u32 %v6297_v49, %v6025_v10 }
 0x89e   : > { %v4782_v52 = vmul.f32 %v8211_v5, %v8211_v5  ;;  %5026 = vmatpush.bf16.msra.mxu2 %v6040_v1  ;;  %5040 = vmatpush.bf16.msra.mxu3 %v6028_v7 }
 0x8a0   : > { %v4783_v45 = vsel %vm4776_vm6, %v4782_v52, 0.0  ;;  %v5999_v52 = vld [vmem:[%s8448_s10 + $0x20] sm:$0xf] }
 0x8a1   : > { %4784 = vadd.xlane.f32.xlu0 %v4783_v45  ;;  %v6294_v45 = vld [vmem:[%s8448_s10 + $0x2c] sm:$0xf0] }
 0x8a2   : > { %5027 = vmatpush.bf16.msra.mxu2 %v6024_v20  ;;  %v6000_v59 = vor.u32 %v6294_v45, %v5999_v52  ;;  %5041 = vmatpush.bf16.msra.mxu3 %v6012_v43 }
 0x8a4   : > { %5002 = vmatpush.bf16.msra.mxu0 %v6000_v59 }
 0x8a6   : > { %5028 = vmatpush.bf16.msra.mxu2 %v6008_v19  ;;  %5042 = vmatpush.bf16.msra.mxu3 %v5996_v30 }
 0x8a8   : > { %5003 = vmatpush.bf16.msra.mxu0 %v5984_v29 }
 0x8aa   : > { %5029 = vmatpush.bf16.msra.mxu2 %v5992_v50 }
 0x914   : > { %v4785_v21 = vpop.xlane.xlu0 %4784 }
 0x915   : > { %v4786_v36 = vmul.f32 %v4785_v21, %v8501_v51 }
 0x917   : > { %v4787_v28 = vadd.f32 1e-05, %v4786_v36 }
 0x919   : > { %6630 = vrsqrt.f32 %v4787_v28  ;;  %vm4794_vm8 = vweird.f32 %v4787_v28 }
 0x91f   : > { %v6631_v56 = vpop.eup %6630 }
 0x920   : > { %v4789_v2 = vmul.f32 %v6631_v56, %v4787_v28  ;;  %vm4795_vm7 = vweird.f32 %v6631_v56 }
 0x921   : > { %vm4796_vm9 = vmor %vm4794_vm8, %vm4795_vm7 }
 0x922   : > { %v4790_v3 = vmul.f32 %v6631_v56, %v4789_v2 }
 0x924   : > { %v4791_v6 = vmul.f32 0.5, %v4790_v3 }
 0x926   : > { %v4792_v31 = vsub.f32 1.5, %v4791_v6 }
 0x928   : > { %v4793_v57 = vmul.f32 %v6631_v56, %v4792_v31 }
 0x92a   : > { %v4797_v8 = vsel %vm4796_vm9, %v6631_v56, %v4793_v57 }
 0x92b   : > { %v4798_v48 = vmul.f32 %v4797_v8, %v8211_v5 }
 0x92d   : > { %v4802_v23 = vmul.f32 %v6629_v34, %v4798_v48 }
 0x92f   : > { %v4803_v51 = vpack.c.bf16 %v4802_v23, %v4802_v23 }
 0x931   : > { %5004 = vmatmul.bf16.vlgmr.msra.gmra.mxu0 %v4803_v51  ;;  %5017 = vmatmul.bf16.vlgmr.msra.gmra.mxu1 %v4803_v51 }
 0x932   : > { %5030 = vmatmul.bf16.vlgmr.msra.gmra.mxu2 %v4803_v51  ;;  %5043 = vmatmul.bf16.vlgmr.msra.gmra.mxu3 %v4803_v51 }
 0x9ae   : > { %v5005_v38 = vpop.f32.mrf.mxu0  ;;  %v5018_v33 = vpop.f32.mrf.mxu1 }
 0x9af   : > { %v5052_v63 = vrot.slane %v5018_v33, 6 }
 0x9b1   : > { %v5055_v5 = vsel %vm4776_vm6, %v5005_v38, %v5052_v63 }
 0x9b5   : > { %v5031_v25 = vpop.f32.mrf.mxu2  ;;  %v5044_v9 = vpop.f32.mrf.mxu3 }
 0x9b6   : > { %v5053_v54 = vrot.slane %v5031_v25, 4  ;;  %v5054_v32 = vrot.slane %v5044_v9, 2  ;;  %v5007_v40 = vpop.f32.mrf.mxu0  ;;  %v5020_v4 = vpop.f32.mrf.mxu1 }
 0x9b8   : > { %v5057_v1 = vsel %vm5056_vm10, %v5053_v54, %v5054_v32 }
 0x9b9   : > { %v5059_v12 = vsel %vm5058_vm11, %v5055_v5, %v5057_v1 }
 0x9ba   : > { %5061 = vst [vmem:[%s504_s26] sm:$0xff] %v5059_v12 }
 0x9bd   : > { %v5033_v39 = vpop.f32.mrf.mxu2  ;;  %v5046_v17 = vpop.f32.mrf.mxu3 }
 0x9be PF: > { %s8502_s17 = sld [smem:[#allocation17_spill]]  ;;  %s5076_s19 = sshll.u32 %s504_s26, 4  ;;  %s5077_s19 = int_to_ptr.vmem [resolvable:$true] %s5076_s19 }
 0x9bf   : > { %s8503_s29 = sld [smem:[#allocation21_spill]] }
 0x9c0   : > { %s8504_s16 = sld [smem:[#allocation7_spill]] }
 0x9c5   : > { %s5074_s2 = scalar_lea.hbm %s8503_s29, %s8502_s17  ;;  %s6652_s28 = scalar_lea.hbm %s8503_s29, 16 }
 0x9c6   : > { %s5078_s11 = sshll.u32 %s5074_s2, 4  ;;  %s8506_s24 = sand.u32 1, %s8504_s16   ;;  %s5079_s11 = int_to_ptr.hbm [resolvable:$true] %s5078_s11 }
 0x9c7   : > { %s5063_s14 = scalar_lea.sflag [#allocation4], %s8506_s24  ;;  %s6646_s15 = sshra.s32 %s5079_s11, 4  ;;  %s6647_s15 = int_to_ptr.hbm [resolvable:$true] %s6646_s15 }
 0x9c8   : > { %s6648_s12 = scalar_lea.hbm %s6647_s15, 8  ;;  %p6653_p6 = scmp.lt.s32.totalorder %s6647_s15, %s8503_s29 }
 0x9c9   : > { %p6649_p2 = scmp.ne.s32.totalorder %s6647_s15, %s6648_s12  ;;  %p6654_p7 = scmp.lt.s32.totalorder %s6652_s28, %s6648_s12 }
 0x9cb   : > { %p6650_p4 = pnand %p6649_p2, %p6836_p3  ;;  %p6655_p8 = por %p6654_p7, %p6653_p6 }
 0x9cd   : > { %p6651_p5 = pneg %p6650_p4 }
 0x9cf   : > { %p6656_p10 = pnand %p6655_p8, %p6651_p5 }
 0x9d1   : > { %6659 = shalt.err (!%p6656_p10)
}
 0x9d2   : > { %6321 = dma.vmem_to_hbm [thread:$0]  (%p6836_p3), %s5077_s19, 128, %s5079_s11, %s5063_s14  }
 0x9d3 PF: > { %s8507_s25 = sld [smem:[#allocation11_spill]] }
 0x9d4   : > { %s8508_s26 = sld [smem:[#allocation6_spill]] }
 0x9d9   : > { %p6327_p11 = scmp.ge.s32.totalorder %s8507_s25, 2 }
 0x9da   : > { %s5090_s13 = sand.u32 1, %s8508_s26  }
 0x9db   : > { %p6324_p12 = pnand %p6327_p11, %p6846_p9  ;;  %s5091_s17 = scalar_lea.sflag [#allocation4], %s5090_s13 }
 0x9dd   : > { %p6325_p13 = pneg %p6324_p12 }
 0x9df   : > { %6693 = dma.done.wait (%p6325_p13), %s5091_s17, 128  }
 0x9e0   : > { %6695 = vsyncadd (%p6325_p13), %s5091_s17, 4294967168  ;;  %s24_s24 = sadd.s32 1, %s8507_s25   ;;  %s8510_s17 = sld [smem:[#allocation7_spill]] }
 0x9e1   : > { %p21_p0 = scmp.ge.s32.totalorder %s24_s24, 6   ;;  %s8511_s18 = sld [smem:[#allocation8_spill]] }
 0x9e2   : > { %s8512_s19 = sld [smem:[#allocation16_spill]] }
 0x9e3   : > { %s8513_s20 = sld [smem:[#allocation9_spill]]  ;;  %23 = sbr.rel (!%p21_p0) target bundleno = 9 (0x9), region = 132 }
 0x9e4   : > { %s8514_s21 = sld [smem:[#allocation10_spill]] }
 0x9e5   : > { %s8515_s22 = sld [smem:[#allocation12_spill]] }
 0x9e6   : > { %s8516_s23 = sld [smem:[#allocation14_spill]] }
 0x9e8   :  { %5097 = vsyncpa [#allocation4], 1 }
 0x9e9   :  { %5099 = vsyncpa [#allocation4 + $0x1], 1 }

</bundles_post_ra>
